<compile_context>
chip_gen: v5e
topology: v5e:2x2
jax: 0.10.0
libtpu: 0.0.40
codegen_flags: <defaults>
</compile_context>

<pallas_src>
import functools
import math

import jax
import jax.numpy as jnp
from jax.experimental import pallas as pl
from jax.experimental.pallas import tpu as pltpu

HALO_H = 8      # >= 5 (depthwise reach) and a multiple of 8 (aligned interior rows)
_MIN_HALO = 5   # max(avg-pool reach 3, depthwise reach 5)


def _halo_w(C):
    # Smallest halo >= _MIN_HALO whose lane offset (halo*C) is 128-aligned, so
    # interior loads/stores of the padded slab are unmasked full-lane accesses.
    q = 128 // math.gcd(C, 128)
    return ((_MIN_HALO + q - 1) // q) * q


def _sigmoid(v):
    # sigmoid via EUP exp + approx reciprocal (both land on the EUP path and
    # avoid jax.nn.sigmoid's extra selects).  The clamp keeps exp finite.
    return pl.reciprocal(1.0 + jnp.exp(jnp.minimum(-v, 80.0)), approx=True)


def _caa_kernel(x_ref, w1_ref, b1_ref, wh_ref, bh_ref, wv_ref, bv_ref,
                w2_ref, b2_ref, o_ref, pad_ref, *, C, H, W, hw):
    f32 = jnp.float32
    nb = x_ref.shape[0]
    WC = W * C                       # lane-dense interior width (multiple of 128)
    HP = H + 2 * HALO_H              # padded rows (sublanes)
    WLP = (W + 2 * hw) * C           # padded lanes
    L0 = hw * C                      # interior lane offset (128-aligned)
    rows = nb * H

    # --- zero the halo strips (corners included via the full-lane rows) ------
    pad_ref[:, 0:HALO_H, :] = jnp.zeros((nb, HALO_H, WLP), f32)
    pad_ref[:, HALO_H + H:HP, :] = jnp.zeros((nb, HALO_H, WLP), f32)
    pad_ref[:, HALO_H:HALO_H + H, 0:L0] = jnp.zeros((nb, H, L0), f32)
    pad_ref[:, HALO_H:HALO_H + H, L0 + WC:WLP] = (
        jnp.zeros((nb, H, WLP - L0 - WC), f32))

    def write_interior(v):                        # v: (nb, H, WC) f32
        pad_ref[:, HALO_H:HALO_H + H, L0:L0 + WC] = v

    def w_slab():                                 # interior rows, all padded lanes
        return pad_ref[:, HALO_H:HALO_H + H, :].reshape(rows, WLP)

    def w_tap(slab, dw):                          # values at column w + dw
        if dw == 0:
            return slab[:, L0:L0 + WC]
        rolled = pltpu.roll(slab, (-dw * C) % WLP, 1)   # XLU lane rotation
        return rolled[:, L0:L0 + WC]              # aligned interior slice

    def h_tap(dh):                                # values at row h + dh
        return pad_ref[:, HALO_H + dh:HALO_H + dh + H, L0:L0 + WC]

    # --- AvgPool2d(7, stride=1, pad=3), count_include_pad=True ----------------
    # (the 1/49 scale is folded into conv1's weights on the host)
    write_interior(x_ref[...].astype(f32))
    slab = w_slab()
    acc = w_tap(slab, -3)
    for dw in range(-2, 4):
        acc = acc + w_tap(slab, dw)
    write_interior(acc.reshape(nb, H, WC))        # W-summed rows; H halo stays 0
    acc = h_tap(-3)
    for dh in range(-2, 4):
        acc = acc + h_tap(dh)
    pooled = acc.reshape(rows, WC)

    # --- conv1: 1x1 conv (+BN, +1/49 folded) + SiLU — block-diagonal weights
    #     keep the lane-dense layout; bf16 MXU, f32 accumulate -----------------
    y = jnp.dot(pooled.astype(jnp.bfloat16), w1_ref[...],
                preferred_element_type=f32) + b1_ref[...]
    y = y * _sigmoid(y)                           # SiLU

    # --- h_conv: depthwise (1, 11), pad (0, 5), bias --------------------------
    write_interior(y.reshape(nb, H, WC))
    slab = w_slab()
    wh = wh_ref[...]                              # (11, WC), loaded once
    acc = w_tap(slab, -5) * wh[0]
    for k in range(1, 11):
        acc = acc + w_tap(slab, k - 5) * wh[k]
    y = acc + bh_ref[...]

    # --- v_conv: depthwise (11, 1), pad (5, 0), bias --------------------------
    write_interior(y.reshape(nb, H, WC))
    wv = wv_ref[...]                              # (11, WC), loaded once
    acc = h_tap(-5) * wv[0]
    for k in range(1, 11):
        acc = acc + h_tap(k - 5) * wv[k]
    y = (acc + bv_ref[...]).reshape(rows, WC)

    # --- conv2: 1x1 conv (+BN folded) + SiLU, then sigmoid attention gate -----
    z = jnp.dot(y.astype(jnp.bfloat16), w2_ref[...],
                preferred_element_type=f32) + b2_ref[...]
    z = z * _sigmoid(z)
    o_ref[...] = _sigmoid(z).reshape(nb, H, WC).astype(o_ref.dtype)


def _vmem_capacity_bytes():
    # Per-core VMEM so the block heuristic adapts to v5e/v6e (128 MiB) vs v7x
    # (64 MiB); fall back to the most conservative figure if unavailable.
    try:
        get_info = getattr(pltpu, "get_tpu_info", None)
        if get_info is not None:
            info = get_info()
            for attr in ("vmem_capacity_bytes", "vmem_bytes", "vmem_size_bytes"):
                v = getattr(info, attr, None)
                if v:
                    return int(v)
    except Exception:
        pass
    return 64 * 1024 * 1024


def _images_per_block(n, per_image_bytes, fixed_bytes, budget_bytes):
    feasible = []
    for nb in range(1, n + 1):
        if n % nb:
            continue
        steps = n // nb
        if n >= 2 and steps < 2:      # >= 2 grid steps so both v7x cores get work
            continue
        if fixed_bytes + nb * per_image_bytes > budget_bytes:
            continue
        feasible.append(nb)
    if not feasible:
        return 1
    even = [nb for nb in feasible if (n // nb) % 2 == 0]
    return max(even) if even else max(feasible)


@jax.jit
def caa_forward(x_nhwc, w1, b1, wh, bh, wv, bv, w2, b2):
    N, H, W, C = x_nhwc.shape
    WC = W * C
    if WC % 128 != 0 or H % 8 != 0:
        # TODO(synk): pad W / H in the wrapper for shapes that do not tile cleanly.
        raise NotImplementedError("lane-dense CAA needs W*C % 128 == 0 and H % 8 == 0")
    hw = _halo_w(C)
    HP = H + 2 * HALO_H
    WLP = (W + 2 * hw) * C

    # --- host-side weight packing (lane-dense) --------------------------------
    eye_w = jnp.eye(W, dtype=jnp.float32)
    w1bd = jnp.kron(eye_w, w1 * (1.0 / 49.0)).astype(jnp.bfloat16)   # (WC, WC)
    w2bd = jnp.kron(eye_w, w2).astype(jnp.bfloat16)                  # (WC, WC)
    b1t = jnp.tile(b1, (1, W))                                       # (1, WC)
    b2t = jnp.tile(b2, (1, W))
    wht = jnp.tile(wh, (1, W))                                       # (11, WC)
    bht = jnp.tile(bh, (1, W))
    wvt = jnp.tile(wv, (1, W))
    bvt = jnp.tile(bv, (1, W))

    # --- VMEM-aware images-per-block and vmem limit ----------------------------
    cap = _vmem_capacity_bytes()
    vmem_limit = max(32 * 1024 * 1024, min(3 * cap // 4, 96 * 1024 * 1024))
    nb_budget = min(vmem_limit, 48 * 1024 * 1024) - 4 * 1024 * 1024  # v7x-safe
    itemsize = x_nhwc.dtype.itemsize
    per_img = HP * WLP * 4                    # f32 halo scratch
    per_img += 2 * H * WC * itemsize          # double-buffered input block
    per_img += 2 * H * WC * itemsize          # double-buffered output block
    fixed = 2 * (WC * WC * 2) * 2             # two bf16 block-diag mats, 2 buffers
    fixed += (2 * 11 + 4) * WC * 4 * 2        # depthwise taps + biases
    fixed += 2 * 1024 * 1024                  # compiler / pipeline slack
    nb = _images_per_block(N, per_img, fixed, nb_budget)

    x_p = x_nhwc.reshape(N, H, WC)            # lane-dense packing (free reshape)

    kernel = functools.partial(_caa_kernel, C=C, H=H, W=W, hw=hw)

    def _rep(shape):
        zeros = (0,) * len(shape)
        return pl.BlockSpec(shape, lambda n, _z=zeros: _z)

    out = pl.pallas_call(
        kernel,
        out_shape=jax.ShapeDtypeStruct((N, H, WC), x_nhwc.dtype),
        grid_spec=pltpu.PrefetchScalarGridSpec(
            num_scalar_prefetch=0,
            grid=(N // nb,),
            in_specs=[
                pl.BlockSpec((nb, H, WC), lambda n: (n, 0, 0)),  # x (lane-dense)
                _rep((WC, WC)),     # conv1 block-diag weights (BN + 1/49 folded, bf16)
                _rep((1, WC)),      # conv1 bias
                _rep((11, WC)),     # h_conv depthwise taps
                _rep((1, WC)),      # h_conv bias
                _rep((11, WC)),     # v_conv depthwise taps
                _rep((1, WC)),      # v_conv bias
                _rep((WC, WC)),     # conv2 block-diag weights (BN folded, bf16)
                _rep((1, WC)),      # conv2 bias
            ],
            out_specs=pl.BlockSpec((nb, H, WC), lambda n: (n, 0, 0)),
            scratch_shapes=[pltpu.VMEM((nb, HP, WLP), jnp.float32)],
        ),
        compiler_params=pltpu.CompilerParams(
            dimension_semantics=("parallel",),
            vmem_limit_bytes=vmem_limit,
        ),
    )(x_p, w1bd, b1t, wht, bht, wvt, bvt, w2bd, b2t)

    return out.reshape(N, H, W, C)


def init_params(key, C, kh=11, kv=11, eps=1e-3):
    """Deterministic synthetic parameters; BN (eval mode) folded into 1x1 convs."""
    ks = jax.random.split(key, 14)
    unif = lambda k, shape, s: s * jax.random.uniform(k, shape, jnp.float32, -1.0, 1.0)

    # conv1 (1x1, bias=False) + BN
    w1 = unif(ks[0], (C, C), 1.0 / (C ** 0.5))            # [in, out]
    g1 = 1.0 + 0.1 * unif(ks[1], (C,), 1.0)
    be1 = 0.1 * unif(ks[2], (C,), 1.0)
    rm1 = 0.1 * unif(ks[3], (C,), 1.0)
    rv1 = 1.0 + 0.1 * jnp.abs(unif(ks[4], (C,), 1.0))
    s1 = g1 / jnp.sqrt(rv1 + eps)
    w1f = w1 * s1[None, :]
    b1f = (be1 - rm1 * s1).reshape(1, C)

    # depthwise convs (bias=True)
    wh = unif(ks[5], (kh, C), 1.0 / (kh ** 0.5))
    bh = unif(ks[6], (1, C), 0.1)
    wv = unif(ks[7], (kv, C), 1.0 / (kv ** 0.5))
    bv = unif(ks[8], (1, C), 0.1)

    # conv2 (1x1, bias=False) + BN
    w2 = unif(ks[9], (C, C), 1.0 / (C ** 0.5))
    g2 = 1.0 + 0.1 * unif(ks[10], (C,), 1.0)
    be2 = 0.1 * unif(ks[11], (C,), 1.0)
    rm2 = 0.1 * unif(ks[12], (C,), 1.0)
    rv2 = 1.0 + 0.1 * jnp.abs(unif(ks[13], (C,), 1.0))
    s2 = g2 / jnp.sqrt(rv2 + eps)
    w2f = w2 * s2[None, :]
    b2f = (be2 - rm2 * s2).reshape(1, C)

    return (w1f, b1f, wh, bh, wv, bv, w2f, b2f)


if __name__ == "__main__":
    key = jax.random.PRNGKey(0)
    kx, kp = jax.random.split(key)

    N, C, H, W = 2, 32, 16, 16                 # small shapes consistent with CAA
    x_nchw = jax.random.normal(kx, (N, C, H, W), jnp.float32)   # PyTorch-style input
    x_nhwc = jnp.transpose(x_nchw, (0, 2, 3, 1))                # kernel layout: NHWC

    params = init_params(kp, C)
    out = caa_forward(x_nhwc, *params)
    out = jax.block_until_ready(out)

    assert out.shape == (N, H, W, C)
    assert bool(jnp.all(jnp.isfinite(out)))
    # sigmoid gate output; small slack for the approx-reciprocal sigmoid path
    assert bool(jnp.all((out > -1e-3) & (out < 1.0 + 1e-3)))
    print("KERNEL_OK")
</pallas_src>

<mosaic_0001>
module attributes {stable_mosaic.version = 11 : i64} {
  func.func @_caa_kernel(%arg0: i32, %arg1: memref<1x16x512xf32, #tpu.memory_space<vmem>>, %arg2: memref<512x512xbf16, #tpu.memory_space<vmem>>, %arg3: memref<1x512xf32, #tpu.memory_space<vmem>>, %arg4: memref<11x512xf32, #tpu.memory_space<vmem>>, %arg5: memref<1x512xf32, #tpu.memory_space<vmem>>, %arg6: memref<11x512xf32, #tpu.memory_space<vmem>>, %arg7: memref<1x512xf32, #tpu.memory_space<vmem>>, %arg8: memref<512x512xbf16, #tpu.memory_space<vmem>>, %arg9: memref<1x512xf32, #tpu.memory_space<vmem>>, %arg10: memref<1x16x512xf32, #tpu.memory_space<vmem>>, %arg11: memref<1x32x1024xf32, #tpu.memory_space<vmem>>) attributes {dimension_semantics = [#tpu.dimension_semantics<parallel>], iteration_bounds = array<i64: 2>, scalar_prefetch = 0 : i64, scratch_operands = 1 : i64, tpu.core_type = #tpu.core_type<tc>, window_params = [{transform_indices = @transform_0, window_bounds = array<i64: 1, 16, 512>}, {pipeline_mode = #tpu.pipeline_mode<synchronous>, transform_indices = @transform_1, window_bounds = array<i64: 512, 512>}, {pipeline_mode = #tpu.pipeline_mode<synchronous>, transform_indices = @transform_2, window_bounds = array<i64: 1, 512>}, {pipeline_mode = #tpu.pipeline_mode<synchronous>, transform_indices = @transform_3, window_bounds = array<i64: 11, 512>}, {pipeline_mode = #tpu.pipeline_mode<synchronous>, transform_indices = @transform_4, window_bounds = array<i64: 1, 512>}, {pipeline_mode = #tpu.pipeline_mode<synchronous>, transform_indices = @transform_5, window_bounds = array<i64: 11, 512>}, {pipeline_mode = #tpu.pipeline_mode<synchronous>, transform_indices = @transform_6, window_bounds = array<i64: 1, 512>}, {pipeline_mode = #tpu.pipeline_mode<synchronous>, transform_indices = @transform_7, window_bounds = array<i64: 512, 512>}, {pipeline_mode = #tpu.pipeline_mode<synchronous>, transform_indices = @transform_8, window_bounds = array<i64: 1, 512>}, {transform_indices = @transform_9, window_bounds = array<i64: 1, 16, 512>}]} {
    %cst = arith.constant 0.000000e+00 : f32
    %0 = vector.broadcast %cst : f32 to vector<1x8x1024xf32>
    %c0 = arith.constant 0 : index
    %c0_0 = arith.constant 0 : index
    %c0_1 = arith.constant 0 : index
    %1 = vector.load %arg11[%c0, %c0_0, %c0_1] : memref<1x32x1024xf32, #tpu.memory_space<vmem>>, vector<1x8x1024xf32>
    tpu.vector_store %arg11[%c0, %c0_0, %c0_1], %0 {strides = array<i32>} : memref<1x32x1024xf32, #tpu.memory_space<vmem>>, vector<1x8x1024xf32>,
    %cst_2 = arith.constant 0.000000e+00 : f32
    %2 = vector.broadcast %cst_2 : f32 to vector<1x8x1024xf32>
    %c0_3 = arith.constant 0 : index
    %c24 = arith.constant 24 : index
    %c0_4 = arith.constant 0 : index
    %3 = vector.load %arg11[%c0_3, %c24, %c0_4] : memref<1x32x1024xf32, #tpu.memory_space<vmem>>, vector<1x8x1024xf32>
    tpu.vector_store %arg11[%c0_3, %c24, %c0_4], %2 {strides = array<i32>} : memref<1x32x1024xf32, #tpu.memory_space<vmem>>, vector<1x8x1024xf32>,
    %cst_5 = arith.constant 0.000000e+00 : f32
    %4 = vector.broadcast %cst_5 : f32 to vector<1x16x256xf32>
    %c0_6 = arith.constant 0 : index
    %c8 = arith.constant 8 : index
    %c0_7 = arith.constant 0 : index
    %5 = vector.load %arg11[%c0_6, %c8, %c0_7] : memref<1x32x1024xf32, #tpu.memory_space<vmem>>, vector<1x16x256xf32>
    tpu.vector_store %arg11[%c0_6, %c8, %c0_7], %4 {strides = array<i32>} : memref<1x32x1024xf32, #tpu.memory_space<vmem>>, vector<1x16x256xf32>,
    %cst_8 = arith.constant 0.000000e+00 : f32
    %6 = vector.broadcast %cst_8 : f32 to vector<1x16x256xf32>
    %c0_9 = arith.constant 0 : index
    %c8_10 = arith.constant 8 : index
    %c768 = arith.constant 768 : index
    %7 = vector.load %arg11[%c0_9, %c8_10, %c768] : memref<1x32x1024xf32, #tpu.memory_space<vmem>>, vector<1x16x256xf32>
    tpu.vector_store %arg11[%c0_9, %c8_10, %c768], %6 {strides = array<i32>} : memref<1x32x1024xf32, #tpu.memory_space<vmem>>, vector<1x16x256xf32>,
    %c0_11 = arith.constant 0 : index
    %c0_12 = arith.constant 0 : index
    %c0_13 = arith.constant 0 : index
    %8 = vector.load %arg1[%c0_11, %c0_12, %c0_13] : memref<1x16x512xf32, #tpu.memory_space<vmem>>, vector<1x16x512xf32>
    %c0_14 = arith.constant 0 : index
    %c8_15 = arith.constant 8 : index
    %c256 = arith.constant 256 : index
    %9 = vector.load %arg11[%c0_14, %c8_15, %c256] : memref<1x32x1024xf32, #tpu.memory_space<vmem>>, vector<1x16x512xf32>
    tpu.vector_store %arg11[%c0_14, %c8_15, %c256], %8 {strides = array<i32>} : memref<1x32x1024xf32, #tpu.memory_space<vmem>>, vector<1x16x512xf32>,
    %c0_16 = arith.constant 0 : index
    %c8_17 = arith.constant 8 : index
    %c0_18 = arith.constant 0 : index
    %10 = vector.load %arg11[%c0_16, %c8_17, %c0_18] : memref<1x32x1024xf32, #tpu.memory_space<vmem>>, vector<1x16x1024xf32>
    %11 = vector.shape_cast %10 : vector<1x16x1024xf32> to vector<16x1024xf32>
    %c96_i32 = arith.constant 96 : i32
    %12 = tpu.dynamic_rotate %11 by %c96_i32 dim 1 : vector<16x1024xf32>, i32 -> vector<16x1024xf32>
    %13 = vector.extract_strided_slice %12 {offsets = [0, 256], sizes = [16, 512], strides = [1, 1]} : vector<16x1024xf32> to vector<16x512xf32>
    %c64_i32 = arith.constant 64 : i32
    %14 = tpu.dynamic_rotate %11 by %c64_i32 dim 1 : vector<16x1024xf32>, i32 -> vector<16x1024xf32>
    %15 = vector.extract_strided_slice %14 {offsets = [0, 256], sizes = [16, 512], strides = [1, 1]} : vector<16x1024xf32> to vector<16x512xf32>
    %16 = arith.addf %13, %15 : vector<16x512xf32>
    %c32_i32 = arith.constant 32 : i32
    %17 = tpu.dynamic_rotate %11 by %c32_i32 dim 1 : vector<16x1024xf32>, i32 -> vector<16x1024xf32>
    %18 = vector.extract_strided_slice %17 {offsets = [0, 256], sizes = [16, 512], strides = [1, 1]} : vector<16x1024xf32> to vector<16x512xf32>
    %19 = arith.addf %16, %18 : vector<16x512xf32>
    %20 = vector.extract_strided_slice %11 {offsets = [0, 256], sizes = [16, 512], strides = [1, 1]} : vector<16x1024xf32> to vector<16x512xf32>
    %21 = arith.addf %19, %20 : vector<16x512xf32>
    %c992_i32 = arith.constant 992 : i32
    %22 = tpu.dynamic_rotate %11 by %c992_i32 dim 1 : vector<16x1024xf32>, i32 -> vector<16x1024xf32>
    %23 = vector.extract_strided_slice %22 {offsets = [0, 256], sizes = [16, 512], strides = [1, 1]} : vector<16x1024xf32> to vector<16x512xf32>
    %24 = arith.addf %21, %23 : vector<16x512xf32>
    %c960_i32 = arith.constant 960 : i32
    %25 = tpu.dynamic_rotate %11 by %c960_i32 dim 1 : vector<16x1024xf32>, i32 -> vector<16x1024xf32>
    %26 = vector.extract_strided_slice %25 {offsets = [0, 256], sizes = [16, 512], strides = [1, 1]} : vector<16x1024xf32> to vector<16x512xf32>
    %27 = arith.addf %24, %26 : vector<16x512xf32>
    %c928_i32 = arith.constant 928 : i32
    %28 = tpu.dynamic_rotate %11 by %c928_i32 dim 1 : vector<16x1024xf32>, i32 -> vector<16x1024xf32>
    %29 = vector.extract_strided_slice %28 {offsets = [0, 256], sizes = [16, 512], strides = [1, 1]} : vector<16x1024xf32> to vector<16x512xf32>
    %30 = arith.addf %27, %29 : vector<16x512xf32>
    %31 = vector.shape_cast %30 : vector<16x512xf32> to vector<1x16x512xf32>
    %c0_19 = arith.constant 0 : index
    %c8_20 = arith.constant 8 : index
    %c256_21 = arith.constant 256 : index
    %32 = vector.load %arg11[%c0_19, %c8_20, %c256_21] : memref<1x32x1024xf32, #tpu.memory_space<vmem>>, vector<1x16x512xf32>
    tpu.vector_store %arg11[%c0_19, %c8_20, %c256_21], %31 {strides = array<i32>} : memref<1x32x1024xf32, #tpu.memory_space<vmem>>, vector<1x16x512xf32>,
    %c0_22 = arith.constant 0 : index
    %c5 = arith.constant 5 : index
    %c256_23 = arith.constant 256 : index
    %33 = vector.load %arg11[%c0_22, %c5, %c256_23] : memref<1x32x1024xf32, #tpu.memory_space<vmem>>, vector<1x16x512xf32>
    %c0_24 = arith.constant 0 : index
    %c6 = arith.constant 6 : index
    %c256_25 = arith.constant 256 : index
    %34 = vector.load %arg11[%c0_24, %c6, %c256_25] : memref<1x32x1024xf32, #tpu.memory_space<vmem>>, vector<1x16x512xf32>
    %35 = arith.addf %33, %34 : vector<1x16x512xf32>
    %c0_26 = arith.constant 0 : index
    %c7 = arith.constant 7 : index
    %c256_27 = arith.constant 256 : index
    %36 = vector.load %arg11[%c0_26, %c7, %c256_27] : memref<1x32x1024xf32, #tpu.memory_space<vmem>>, vector<1x16x512xf32>
    %37 = arith.addf %35, %36 : vector<1x16x512xf32>
    %c0_28 = arith.constant 0 : index
    %c8_29 = arith.constant 8 : index
    %c256_30 = arith.constant 256 : index
    %38 = vector.load %arg11[%c0_28, %c8_29, %c256_30] : memref<1x32x1024xf32, #tpu.memory_space<vmem>>, vector<1x16x512xf32>
    %39 = arith.addf %37, %38 : vector<1x16x512xf32>
    %c0_31 = arith.constant 0 : index
    %c9 = arith.constant 9 : index
    %c256_32 = arith.constant 256 : index
    %40 = vector.load %arg11[%c0_31, %c9, %c256_32] : memref<1x32x1024xf32, #tpu.memory_space<vmem>>, vector<1x16x512xf32>
    %41 = arith.addf %39, %40 : vector<1x16x512xf32>
    %c0_33 = arith.constant 0 : index
    %c10 = arith.constant 10 : index
    %c256_34 = arith.constant 256 : index
    %42 = vector.load %arg11[%c0_33, %c10, %c256_34] : memref<1x32x1024xf32, #tpu.memory_space<vmem>>, vector<1x16x512xf32>
    %43 = arith.addf %41, %42 : vector<1x16x512xf32>
    %c0_35 = arith.constant 0 : index
    %c11 = arith.constant 11 : index
    %c256_36 = arith.constant 256 : index
    %44 = vector.load %arg11[%c0_35, %c11, %c256_36] : memref<1x32x1024xf32, #tpu.memory_space<vmem>>, vector<1x16x512xf32>
    %45 = arith.addf %43, %44 : vector<1x16x512xf32>
    %46 = vector.shape_cast %45 : vector<1x16x512xf32> to vector<16x512xf32>
    %47 = arith.truncf %46 : vector<16x512xf32> to vector<16x512xbf16>
    %c0_37 = arith.constant 0 : index
    %c0_38 = arith.constant 0 : index
    %48 = vector.load %arg2[%c0_37, %c0_38] : memref<512x512xbf16, #tpu.memory_space<vmem>>, vector<512x512xbf16>
    %cst_39 = arith.constant dense<0.000000e+00> : vector<16x512xf32>
    %49 = tpu.matmul %47, %48, %cst_39 {dimension_numbers = #tpu.dot_dimension_numbers<[1], [0], [0], [1], [0, 0, 1, 1], [], []>} : vector<16x512xbf16>, vector<512x512xbf16>, vector<16x512xf32> -> vector<16x512xf32>
    %c0_40 = arith.constant 0 : index
    %c0_41 = arith.constant 0 : index
    %50 = vector.load %arg3[%c0_40, %c0_41] : memref<1x512xf32, #tpu.memory_space<vmem>>, vector<1x512xf32>
    %51 = vector.broadcast %50 : vector<1x512xf32> to vector<16x512xf32>
    %52 = arith.addf %49, %51 : vector<16x512xf32>
    %cst_42 = arith.constant 0.000000e+00 : f32
    %53 = vector.broadcast %cst_42 : f32 to vector<16x512xf32>
    %54 = arith.subf %53, %52 : vector<16x512xf32>
    %cst_43 = arith.constant 8.000000e+01 : f32
    %55 = vector.broadcast %cst_43 : f32 to vector<16x512xf32>
    %56 = arith.minimumf %54, %55 : vector<16x512xf32>
    %57 = math.exp %56 : vector<16x512xf32>
    %cst_44 = arith.constant 1.000000e+00 : f32
    %58 = vector.broadcast %cst_44 : f32 to vector<16x512xf32>
    %59 = arith.addf %58, %57 : vector<16x512xf32>
    %60 = tpu.reciprocal %59 {approx = true} : vector<16x512xf32> -> vector<16x512xf32>
    %61 = arith.mulf %52, %60 : vector<16x512xf32>
    %62 = vector.shape_cast %61 : vector<16x512xf32> to vector<1x16x512xf32>
    %c0_45 = arith.constant 0 : index
    %c8_46 = arith.constant 8 : index
    %c256_47 = arith.constant 256 : index
    %63 = vector.load %arg11[%c0_45, %c8_46, %c256_47] : memref<1x32x1024xf32, #tpu.memory_space<vmem>>, vector<1x16x512xf32>
    tpu.vector_store %arg11[%c0_45, %c8_46, %c256_47], %62 {strides = array<i32>} : memref<1x32x1024xf32, #tpu.memory_space<vmem>>, vector<1x16x512xf32>,
    %c0_48 = arith.constant 0 : index
    %c8_49 = arith.constant 8 : index
    %c0_50 = arith.constant 0 : index
    %64 = vector.load %arg11[%c0_48, %c8_49, %c0_50] : memref<1x32x1024xf32, #tpu.memory_space<vmem>>, vector<1x16x1024xf32>
    %65 = vector.shape_cast %64 : vector<1x16x1024xf32> to vector<16x1024xf32>
    %c0_51 = arith.constant 0 : index
    %c0_52 = arith.constant 0 : index
    %66 = vector.load %arg4[%c0_51, %c0_52] : memref<11x512xf32, #tpu.memory_space<vmem>>, vector<11x512xf32>
    %c160_i32 = arith.constant 160 : i32
    %67 = tpu.dynamic_rotate %65 by %c160_i32 dim 1 : vector<16x1024xf32>, i32 -> vector<16x1024xf32>
    %68 = vector.extract_strided_slice %67 {offsets = [0, 256], sizes = [16, 512], strides = [1, 1]} : vector<16x1024xf32> to vector<16x512xf32>
    %69 = vector.extract_strided_slice %66 {offsets = [0, 0], sizes = [1, 512], strides = [1, 1]} : vector<11x512xf32> to vector<1x512xf32>
    %70 = vector.shape_cast %69 : vector<1x512xf32> to vector<512xf32>
    %71 = vector.shape_cast %70 : vector<512xf32> to vector<1x512xf32>
    %72 = vector.broadcast %71 : vector<1x512xf32> to vector<16x512xf32>
    %73 = arith.mulf %68, %72 : vector<16x512xf32>
    %c128_i32 = arith.constant 128 : i32
    %74 = tpu.dynamic_rotate %65 by %c128_i32 dim 1 : vector<16x1024xf32>, i32 -> vector<16x1024xf32>
    %75 = vector.extract_strided_slice %74 {offsets = [0, 256], sizes = [16, 512], strides = [1, 1]} : vector<16x1024xf32> to vector<16x512xf32>
    %76 = vector.extract_strided_slice %66 {offsets = [1, 0], sizes = [1, 512], strides = [1, 1]} : vector<11x512xf32> to vector<1x512xf32>
    %77 = vector.shape_cast %76 : vector<1x512xf32> to vector<512xf32>
    %78 = vector.shape_cast %77 : vector<512xf32> to vector<1x512xf32>
    %79 = vector.broadcast %78 : vector<1x512xf32> to vector<16x512xf32>
    %80 = arith.mulf %75, %79 : vector<16x512xf32>
    %81 = arith.addf %73, %80 : vector<16x512xf32>
    %c96_i32_53 = arith.constant 96 : i32
    %82 = tpu.dynamic_rotate %65 by %c96_i32_53 dim 1 : vector<16x1024xf32>, i32 -> vector<16x1024xf32>
    %83 = vector.extract_strided_slice %82 {offsets = [0, 256], sizes = [16, 512], strides = [1, 1]} : vector<16x1024xf32> to vector<16x512xf32>
    %84 = vector.extract_strided_slice %66 {offsets = [2, 0], sizes = [1, 512], strides = [1, 1]} : vector<11x512xf32> to vector<1x512xf32>
    %85 = vector.shape_cast %84 : vector<1x512xf32> to vector<512xf32>
    %86 = vector.shape_cast %85 : vector<512xf32> to vector<1x512xf32>
    %87 = vector.broadcast %86 : vector<1x512xf32> to vector<16x512xf32>
    %88 = arith.mulf %83, %87 : vector<16x512xf32>
    %89 = arith.addf %81, %88 : vector<16x512xf32>
    %c64_i32_54 = arith.constant 64 : i32
    %90 = tpu.dynamic_rotate %65 by %c64_i32_54 dim 1 : vector<16x1024xf32>, i32 -> vector<16x1024xf32>
    %91 = vector.extract_strided_slice %90 {offsets = [0, 256], sizes = [16, 512], strides = [1, 1]} : vector<16x1024xf32> to vector<16x512xf32>
    %92 = vector.extract_strided_slice %66 {offsets = [3, 0], sizes = [1, 512], strides = [1, 1]} : vector<11x512xf32> to vector<1x512xf32>
    %93 = vector.shape_cast %92 : vector<1x512xf32> to vector<512xf32>
    %94 = vector.shape_cast %93 : vector<512xf32> to vector<1x512xf32>
    %95 = vector.broadcast %94 : vector<1x512xf32> to vector<16x512xf32>
    %96 = arith.mulf %91, %95 : vector<16x512xf32>
    %97 = arith.addf %89, %96 : vector<16x512xf32>
    %c32_i32_55 = arith.constant 32 : i32
    %98 = tpu.dynamic_rotate %65 by %c32_i32_55 dim 1 : vector<16x1024xf32>, i32 -> vector<16x1024xf32>
    %99 = vector.extract_strided_slice %98 {offsets = [0, 256], sizes = [16, 512], strides = [1, 1]} : vector<16x1024xf32> to vector<16x512xf32>
    %100 = vector.extract_strided_slice %66 {offsets = [4, 0], sizes = [1, 512], strides = [1, 1]} : vector<11x512xf32> to vector<1x512xf32>
    %101 = vector.shape_cast %100 : vector<1x512xf32> to vector<512xf32>
    %102 = vector.shape_cast %101 : vector<512xf32> to vector<1x512xf32>
    %103 = vector.broadcast %102 : vector<1x512xf32> to vector<16x512xf32>
    %104 = arith.mulf %99, %103 : vector<16x512xf32>
    %105 = arith.addf %97, %104 : vector<16x512xf32>
    %106 = vector.extract_strided_slice %65 {offsets = [0, 256], sizes = [16, 512], strides = [1, 1]} : vector<16x1024xf32> to vector<16x512xf32>
    %107 = vector.extract_strided_slice %66 {offsets = [5, 0], sizes = [1, 512], strides = [1, 1]} : vector<11x512xf32> to vector<1x512xf32>
    %108 = vector.shape_cast %107 : vector<1x512xf32> to vector<512xf32>
    %109 = vector.shape_cast %108 : vector<512xf32> to vector<1x512xf32>
    %110 = vector.broadcast %109 : vector<1x512xf32> to vector<16x512xf32>
    %111 = arith.mulf %106, %110 : vector<16x512xf32>
    %112 = arith.addf %105, %111 : vector<16x512xf32>
    %c992_i32_56 = arith.constant 992 : i32
    %113 = tpu.dynamic_rotate %65 by %c992_i32_56 dim 1 : vector<16x1024xf32>, i32 -> vector<16x1024xf32>
    %114 = vector.extract_strided_slice %113 {offsets = [0, 256], sizes = [16, 512], strides = [1, 1]} : vector<16x1024xf32> to vector<16x512xf32>
    %115 = vector.extract_strided_slice %66 {offsets = [6, 0], sizes = [1, 512], strides = [1, 1]} : vector<11x512xf32> to vector<1x512xf32>
    %116 = vector.shape_cast %115 : vector<1x512xf32> to vector<512xf32>
    %117 = vector.shape_cast %116 : vector<512xf32> to vector<1x512xf32>
    %118 = vector.broadcast %117 : vector<1x512xf32> to vector<16x512xf32>
    %119 = arith.mulf %114, %118 : vector<16x512xf32>
    %120 = arith.addf %112, %119 : vector<16x512xf32>
    %c960_i32_57 = arith.constant 960 : i32
    %121 = tpu.dynamic_rotate %65 by %c960_i32_57 dim 1 : vector<16x1024xf32>, i32 -> vector<16x1024xf32>
    %122 = vector.extract_strided_slice %121 {offsets = [0, 256], sizes = [16, 512], strides = [1, 1]} : vector<16x1024xf32> to vector<16x512xf32>
    %123 = vector.extract_strided_slice %66 {offsets = [7, 0], sizes = [1, 512], strides = [1, 1]} : vector<11x512xf32> to vector<1x512xf32>
    %124 = vector.shape_cast %123 : vector<1x512xf32> to vector<512xf32>
    %125 = vector.shape_cast %124 : vector<512xf32> to vector<1x512xf32>
    %126 = vector.broadcast %125 : vector<1x512xf32> to vector<16x512xf32>
    %127 = arith.mulf %122, %126 : vector<16x512xf32>
    %128 = arith.addf %120, %127 : vector<16x512xf32>
    %c928_i32_58 = arith.constant 928 : i32
    %129 = tpu.dynamic_rotate %65 by %c928_i32_58 dim 1 : vector<16x1024xf32>, i32 -> vector<16x1024xf32>
    %130 = vector.extract_strided_slice %129 {offsets = [0, 256], sizes = [16, 512], strides = [1, 1]} : vector<16x1024xf32> to vector<16x512xf32>
    %131 = vector.extract_strided_slice %66 {offsets = [8, 0], sizes = [1, 512], strides = [1, 1]} : vector<11x512xf32> to vector<1x512xf32>
    %132 = vector.shape_cast %131 : vector<1x512xf32> to vector<512xf32>
    %133 = vector.shape_cast %132 : vector<512xf32> to vector<1x512xf32>
    %134 = vector.broadcast %133 : vector<1x512xf32> to vector<16x512xf32>
    %135 = arith.mulf %130, %134 : vector<16x512xf32>
    %136 = arith.addf %128, %135 : vector<16x512xf32>
    %c896_i32 = arith.constant 896 : i32
    %137 = tpu.dynamic_rotate %65 by %c896_i32 dim 1 : vector<16x1024xf32>, i32 -> vector<16x1024xf32>
    %138 = vector.extract_strided_slice %137 {offsets = [0, 256], sizes = [16, 512], strides = [1, 1]} : vector<16x1024xf32> to vector<16x512xf32>
    %139 = vector.extract_strided_slice %66 {offsets = [9, 0], sizes = [1, 512], strides = [1, 1]} : vector<11x512xf32> to vector<1x512xf32>
    %140 = vector.shape_cast %139 : vector<1x512xf32> to vector<512xf32>
    %141 = vector.shape_cast %140 : vector<512xf32> to vector<1x512xf32>
    %142 = vector.broadcast %141 : vector<1x512xf32> to vector<16x512xf32>
    %143 = arith.mulf %138, %142 : vector<16x512xf32>
    %144 = arith.addf %136, %143 : vector<16x512xf32>
    %c864_i32 = arith.constant 864 : i32
    %145 = tpu.dynamic_rotate %65 by %c864_i32 dim 1 : vector<16x1024xf32>, i32 -> vector<16x1024xf32>
    %146 = vector.extract_strided_slice %145 {offsets = [0, 256], sizes = [16, 512], strides = [1, 1]} : vector<16x1024xf32> to vector<16x512xf32>
    %147 = vector.extract_strided_slice %66 {offsets = [10, 0], sizes = [1, 512], strides = [1, 1]} : vector<11x512xf32> to vector<1x512xf32>
    %148 = vector.shape_cast %147 : vector<1x512xf32> to vector<512xf32>
    %149 = vector.shape_cast %148 : vector<512xf32> to vector<1x512xf32>
    %150 = vector.broadcast %149 : vector<1x512xf32> to vector<16x512xf32>
    %151 = arith.mulf %146, %150 : vector<16x512xf32>
    %152 = arith.addf %144, %151 : vector<16x512xf32>
    %c0_59 = arith.constant 0 : index
    %c0_60 = arith.constant 0 : index
    %153 = vector.load %arg5[%c0_59, %c0_60] : memref<1x512xf32, #tpu.memory_space<vmem>>, vector<1x512xf32>
    %154 = vector.broadcast %153 : vector<1x512xf32> to vector<16x512xf32>
    %155 = arith.addf %152, %154 : vector<16x512xf32>
    %156 = vector.shape_cast %155 : vector<16x512xf32> to vector<1x16x512xf32>
    %c0_61 = arith.constant 0 : index
    %c8_62 = arith.constant 8 : index
    %c256_63 = arith.constant 256 : index
    %157 = vector.load %arg11[%c0_61, %c8_62, %c256_63] : memref<1x32x1024xf32, #tpu.memory_space<vmem>>, vector<1x16x512xf32>
    tpu.vector_store %arg11[%c0_61, %c8_62, %c256_63], %156 {strides = array<i32>} : memref<1x32x1024xf32, #tpu.memory_space<vmem>>, vector<1x16x512xf32>,
    %c0_64 = arith.constant 0 : index
    %c0_65 = arith.constant 0 : index
    %158 = vector.load %arg6[%c0_64, %c0_65] : memref<11x512xf32, #tpu.memory_space<vmem>>, vector<11x512xf32>
    %c0_66 = arith.constant 0 : index
    %c3 = arith.constant 3 : index
    %c256_67 = arith.constant 256 : index
    %159 = vector.load %arg11[%c0_66, %c3, %c256_67] : memref<1x32x1024xf32, #tpu.memory_space<vmem>>, vector<1x16x512xf32>
    %160 = vector.extract_strided_slice %158 {offsets = [0, 0], sizes = [1, 512], strides = [1, 1]} : vector<11x512xf32> to vector<1x512xf32>
    %161 = vector.shape_cast %160 : vector<1x512xf32> to vector<512xf32>
    %162 = vector.shape_cast %161 : vector<512xf32> to vector<1x1x512xf32>
    %163 = vector.broadcast %162 : vector<1x1x512xf32> to vector<1x16x512xf32>
    %164 = arith.mulf %159, %163 : vector<1x16x512xf32>
    %c0_68 = arith.constant 0 : index
    %c4 = arith.constant 4 : index
    %c256_69 = arith.constant 256 : index
    %165 = vector.load %arg11[%c0_68, %c4, %c256_69] : memref<1x32x1024xf32, #tpu.memory_space<vmem>>, vector<1x16x512xf32>
    %166 = vector.extract_strided_slice %158 {offsets = [1, 0], sizes = [1, 512], strides = [1, 1]} : vector<11x512xf32> to vector<1x512xf32>
    %167 = vector.shape_cast %166 : vector<1x512xf32> to vector<512xf32>
    %168 = vector.shape_cast %167 : vector<512xf32> to vector<1x1x512xf32>
    %169 = vector.broadcast %168 : vector<1x1x512xf32> to vector<1x16x512xf32>
    %170 = arith.mulf %165, %169 : vector<1x16x512xf32>
    %171 = arith.addf %164, %170 : vector<1x16x512xf32>
    %c0_70 = arith.constant 0 : index
    %c5_71 = arith.constant 5 : index
    %c256_72 = arith.constant 256 : index
    %172 = vector.load %arg11[%c0_70, %c5_71, %c256_72] : memref<1x32x1024xf32, #tpu.memory_space<vmem>>, vector<1x16x512xf32>
    %173 = vector.extract_strided_slice %158 {offsets = [2, 0], sizes = [1, 512], strides = [1, 1]} : vector<11x512xf32> to vector<1x512xf32>
    %174 = vector.shape_cast %173 : vector<1x512xf32> to vector<512xf32>
    %175 = vector.shape_cast %174 : vector<512xf32> to vector<1x1x512xf32>
    %176 = vector.broadcast %175 : vector<1x1x512xf32> to vector<1x16x512xf32>
    %177 = arith.mulf %172, %176 : vector<1x16x512xf32>
    %178 = arith.addf %171, %177 : vector<1x16x512xf32>
    %c0_73 = arith.constant 0 : index
    %c6_74 = arith.constant 6 : index
    %c256_75 = arith.constant 256 : index
    %179 = vector.load %arg11[%c0_73, %c6_74, %c256_75] : memref<1x32x1024xf32, #tpu.memory_space<vmem>>, vector<1x16x512xf32>
    %180 = vector.extract_strided_slice %158 {offsets = [3, 0], sizes = [1, 512], strides = [1, 1]} : vector<11x512xf32> to vector<1x512xf32>
    %181 = vector.shape_cast %180 : vector<1x512xf32> to vector<512xf32>
    %182 = vector.shape_cast %181 : vector<512xf32> to vector<1x1x512xf32>
    %183 = vector.broadcast %182 : vector<1x1x512xf32> to vector<1x16x512xf32>
    %184 = arith.mulf %179, %183 : vector<1x16x512xf32>
    %185 = arith.addf %178, %184 : vector<1x16x512xf32>
    %c0_76 = arith.constant 0 : index
    %c7_77 = arith.constant 7 : index
    %c256_78 = arith.constant 256 : index
    %186 = vector.load %arg11[%c0_76, %c7_77, %c256_78] : memref<1x32x1024xf32, #tpu.memory_space<vmem>>, vector<1x16x512xf32>
    %187 = vector.extract_strided_slice %158 {offsets = [4, 0], sizes = [1, 512], strides = [1, 1]} : vector<11x512xf32> to vector<1x512xf32>
    %188 = vector.shape_cast %187 : vector<1x512xf32> to vector<512xf32>
    %189 = vector.shape_cast %188 : vector<512xf32> to vector<1x1x512xf32>
    %190 = vector.broadcast %189 : vector<1x1x512xf32> to vector<1x16x512xf32>
    %191 = arith.mulf %186, %190 : vector<1x16x512xf32>
    %192 = arith.addf %185, %191 : vector<1x16x512xf32>
    %c0_79 = arith.constant 0 : index
    %c8_80 = arith.constant 8 : index
    %c256_81 = arith.constant 256 : index
    %193 = vector.load %arg11[%c0_79, %c8_80, %c256_81] : memref<1x32x1024xf32, #tpu.memory_space<vmem>>, vector<1x16x512xf32>
    %194 = vector.extract_strided_slice %158 {offsets = [5, 0], sizes = [1, 512], strides = [1, 1]} : vector<11x512xf32> to vector<1x512xf32>
    %195 = vector.shape_cast %194 : vector<1x512xf32> to vector<512xf32>
    %196 = vector.shape_cast %195 : vector<512xf32> to vector<1x1x512xf32>
    %197 = vector.broadcast %196 : vector<1x1x512xf32> to vector<1x16x512xf32>
    %198 = arith.mulf %193, %197 : vector<1x16x512xf32>
    %199 = arith.addf %192, %198 : vector<1x16x512xf32>
    %c0_82 = arith.constant 0 : index
    %c9_83 = arith.constant 9 : index
    %c256_84 = arith.constant 256 : index
    %200 = vector.load %arg11[%c0_82, %c9_83, %c256_84] : memref<1x32x1024xf32, #tpu.memory_space<vmem>>, vector<1x16x512xf32>
    %201 = vector.extract_strided_slice %158 {offsets = [6, 0], sizes = [1, 512], strides = [1, 1]} : vector<11x512xf32> to vector<1x512xf32>
    %202 = vector.shape_cast %201 : vector<1x512xf32> to vector<512xf32>
    %203 = vector.shape_cast %202 : vector<512xf32> to vector<1x1x512xf32>
    %204 = vector.broadcast %203 : vector<1x1x512xf32> to vector<1x16x512xf32>
    %205 = arith.mulf %200, %204 : vector<1x16x512xf32>
    %206 = arith.addf %199, %205 : vector<1x16x512xf32>
    %c0_85 = arith.constant 0 : index
    %c10_86 = arith.constant 10 : index
    %c256_87 = arith.constant 256 : index
    %207 = vector.load %arg11[%c0_85, %c10_86, %c256_87] : memref<1x32x1024xf32, #tpu.memory_space<vmem>>, vector<1x16x512xf32>
    %208 = vector.extract_strided_slice %158 {offsets = [7, 0], sizes = [1, 512], strides = [1, 1]} : vector<11x512xf32> to vector<1x512xf32>
    %209 = vector.shape_cast %208 : vector<1x512xf32> to vector<512xf32>
    %210 = vector.shape_cast %209 : vector<512xf32> to vector<1x1x512xf32>
    %211 = vector.broadcast %210 : vector<1x1x512xf32> to vector<1x16x512xf32>
    %212 = arith.mulf %207, %211 : vector<1x16x512xf32>
    %213 = arith.addf %206, %212 : vector<1x16x512xf32>
    %c0_88 = arith.constant 0 : index
    %c11_89 = arith.constant 11 : index
    %c256_90 = arith.constant 256 : index
    %214 = vector.load %arg11[%c0_88, %c11_89, %c256_90] : memref<1x32x1024xf32, #tpu.memory_space<vmem>>, vector<1x16x512xf32>
    %215 = vector.extract_strided_slice %158 {offsets = [8, 0], sizes = [1, 512], strides = [1, 1]} : vector<11x512xf32> to vector<1x512xf32>
    %216 = vector.shape_cast %215 : vector<1x512xf32> to vector<512xf32>
    %217 = vector.shape_cast %216 : vector<512xf32> to vector<1x1x512xf32>
    %218 = vector.broadcast %217 : vector<1x1x512xf32> to vector<1x16x512xf32>
    %219 = arith.mulf %214, %218 : vector<1x16x512xf32>
    %220 = arith.addf %213, %219 : vector<1x16x512xf32>
    %c0_91 = arith.constant 0 : index
    %c12 = arith.constant 12 : index
    %c256_92 = arith.constant 256 : index
    %221 = vector.load %arg11[%c0_91, %c12, %c256_92] : memref<1x32x1024xf32, #tpu.memory_space<vmem>>, vector<1x16x512xf32>
    %222 = vector.extract_strided_slice %158 {offsets = [9, 0], sizes = [1, 512], strides = [1, 1]} : vector<11x512xf32> to vector<1x512xf32>
    %223 = vector.shape_cast %222 : vector<1x512xf32> to vector<512xf32>
    %224 = vector.shape_cast %223 : vector<512xf32> to vector<1x1x512xf32>
    %225 = vector.broadcast %224 : vector<1x1x512xf32> to vector<1x16x512xf32>
    %226 = arith.mulf %221, %225 : vector<1x16x512xf32>
    %227 = arith.addf %220, %226 : vector<1x16x512xf32>
    %c0_93 = arith.constant 0 : index
    %c13 = arith.constant 13 : index
    %c256_94 = arith.constant 256 : index
    %228 = vector.load %arg11[%c0_93, %c13, %c256_94] : memref<1x32x1024xf32, #tpu.memory_space<vmem>>, vector<1x16x512xf32>
    %229 = vector.extract_strided_slice %158 {offsets = [10, 0], sizes = [1, 512], strides = [1, 1]} : vector<11x512xf32> to vector<1x512xf32>
    %230 = vector.shape_cast %229 : vector<1x512xf32> to vector<512xf32>
    %231 = vector.shape_cast %230 : vector<512xf32> to vector<1x1x512xf32>
    %232 = vector.broadcast %231 : vector<1x1x512xf32> to vector<1x16x512xf32>
    %233 = arith.mulf %228, %232 : vector<1x16x512xf32>
    %234 = arith.addf %227, %233 : vector<1x16x512xf32>
    %c0_95 = arith.constant 0 : index
    %c0_96 = arith.constant 0 : index
    %235 = vector.load %arg7[%c0_95, %c0_96] : memref<1x512xf32, #tpu.memory_space<vmem>>, vector<1x512xf32>
    %236 = vector.shape_cast %235 : vector<1x512xf32> to vector<1x1x512xf32>
    %237 = vector.broadcast %236 : vector<1x1x512xf32> to vector<1x16x512xf32>
    %238 = arith.addf %234, %237 : vector<1x16x512xf32>
    %239 = vector.shape_cast %238 : vector<1x16x512xf32> to vector<16x512xf32>
    %240 = arith.truncf %239 : vector<16x512xf32> to vector<16x512xbf16>
    %c0_97 = arith.constant 0 : index
    %c0_98 = arith.constant 0 : index
    %241 = vector.load %arg8[%c0_97, %c0_98] : memref<512x512xbf16, #tpu.memory_space<vmem>>, vector<512x512xbf16>
    %cst_99 = arith.constant dense<0.000000e+00> : vector<16x512xf32>
    %242 = tpu.matmul %240, %241, %cst_99 {dimension_numbers = #tpu.dot_dimension_numbers<[1], [0], [0], [1], [0, 0, 1, 1], [], []>} : vector<16x512xbf16>, vector<512x512xbf16>, vector<16x512xf32> -> vector<16x512xf32>
    %c0_100 = arith.constant 0 : index
    %c0_101 = arith.constant 0 : index
    %243 = vector.load %arg9[%c0_100, %c0_101] : memref<1x512xf32, #tpu.memory_space<vmem>>, vector<1x512xf32>
    %244 = vector.broadcast %243 : vector<1x512xf32> to vector<16x512xf32>
    %245 = arith.addf %242, %244 : vector<16x512xf32>
    %cst_102 = arith.constant 0.000000e+00 : f32
    %246 = vector.broadcast %cst_102 : f32 to vector<16x512xf32>
    %247 = arith.subf %246, %245 : vector<16x512xf32>
    %cst_103 = arith.constant 8.000000e+01 : f32
    %248 = vector.broadcast %cst_103 : f32 to vector<16x512xf32>
    %249 = arith.minimumf %247, %248 : vector<16x512xf32>
    %250 = math.exp %249 : vector<16x512xf32>
    %cst_104 = arith.constant 1.000000e+00 : f32
    %251 = vector.broadcast %cst_104 : f32 to vector<16x512xf32>
    %252 = arith.addf %251, %250 : vector<16x512xf32>
    %253 = tpu.reciprocal %252 {approx = true} : vector<16x512xf32> -> vector<16x512xf32>
    %254 = arith.mulf %245, %253 : vector<16x512xf32>
    %cst_105 = arith.constant 0.000000e+00 : f32
    %255 = vector.broadcast %cst_105 : f32 to vector<16x512xf32>
    %256 = arith.subf %255, %254 : vector<16x512xf32>
    %cst_106 = arith.constant 8.000000e+01 : f32
    %257 = vector.broadcast %cst_106 : f32 to vector<16x512xf32>
    %258 = arith.minimumf %256, %257 : vector<16x512xf32>
    %259 = math.exp %258 : vector<16x512xf32>
    %cst_107 = arith.constant 1.000000e+00 : f32
    %260 = vector.broadcast %cst_107 : f32 to vector<16x512xf32>
    %261 = arith.addf %260, %259 : vector<16x512xf32>
    %262 = tpu.reciprocal %261 {approx = true} : vector<16x512xf32> -> vector<16x512xf32>
    %263 = vector.shape_cast %262 : vector<16x512xf32> to vector<1x16x512xf32>
    %c0_108 = arith.constant 0 : index
    %c0_109 = arith.constant 0 : index
    %c0_110 = arith.constant 0 : index
    %264 = vector.load %arg10[%c0_108, %c0_109, %c0_110] : memref<1x16x512xf32, #tpu.memory_space<vmem>>, vector<1x16x512xf32>
    tpu.vector_store %arg10[%c0_108, %c0_109, %c0_110], %263 {strides = array<i32>} : memref<1x16x512xf32, #tpu.memory_space<vmem>>, vector<1x16x512xf32>,
    return
  }
  func.func @transform_0(%arg0: i32) -> (i32, i32, i32) {
    %c0_i32 = arith.constant 0 : i32
    %c0_i32_0 = arith.constant 0 : i32
    %c0_i32_1 = arith.constant 0 : i32
    return %arg0, %c0_i32, %c0_i32_0 : i32, i32, i32
  }
  func.func @transform_1(%arg0: i32) -> (i32, i32) {
    %c0_i32 = arith.constant 0 : i32
    %c0_i32_0 = arith.constant 0 : i32
    %c0_i32_1 = arith.constant 0 : i32
    return %c0_i32, %c0_i32_0 : i32, i32
  }
  func.func @transform_2(%arg0: i32) -> (i32, i32) {
    %c0_i32 = arith.constant 0 : i32
    %c0_i32_0 = arith.constant 0 : i32
    %c0_i32_1 = arith.constant 0 : i32
    return %c0_i32, %c0_i32_0 : i32, i32
  }
  func.func @transform_3(%arg0: i32) -> (i32, i32) {
    %c0_i32 = arith.constant 0 : i32
    %c0_i32_0 = arith.constant 0 : i32
    %c0_i32_1 = arith.constant 0 : i32
    return %c0_i32, %c0_i32_0 : i32, i32
  }
  func.func @transform_4(%arg0: i32) -> (i32, i32) {
    %c0_i32 = arith.constant 0 : i32
    %c0_i32_0 = arith.constant 0 : i32
    %c0_i32_1 = arith.constant 0 : i32
    return %c0_i32, %c0_i32_0 : i32, i32
  }
  func.func @transform_5(%arg0: i32) -> (i32, i32) {
    %c0_i32 = arith.constant 0 : i32
    %c0_i32_0 = arith.constant 0 : i32
    %c0_i32_1 = arith.constant 0 : i32
    return %c0_i32, %c0_i32_0 : i32, i32
  }
  func.func @transform_6(%arg0: i32) -> (i32, i32) {
    %c0_i32 = arith.constant 0 : i32
    %c0_i32_0 = arith.constant 0 : i32
    %c0_i32_1 = arith.constant 0 : i32
    return %c0_i32, %c0_i32_0 : i32, i32
  }
  func.func @transform_7(%arg0: i32) -> (i32, i32) {
    %c0_i32 = arith.constant 0 : i32
    %c0_i32_0 = arith.constant 0 : i32
    %c0_i32_1 = arith.constant 0 : i32
    return %c0_i32, %c0_i32_0 : i32, i32
  }
  func.func @transform_8(%arg0: i32) -> (i32, i32) {
    %c0_i32 = arith.constant 0 : i32
    %c0_i32_0 = arith.constant 0 : i32
    %c0_i32_1 = arith.constant 0 : i32
    return %c0_i32, %c0_i32_0 : i32, i32
  }
  func.func @transform_9(%arg0: i32) -> (i32, i32, i32) {
    %c0_i32 = arith.constant 0 : i32
    %c0_i32_0 = arith.constant 0 : i32
    %c0_i32_1 = arith.constant 0 : i32
    return %arg0, %c0_i32, %c0_i32_0 : i32, i32, i32
  }
}

</mosaic_0001>

<bundles_post_ra>
// kernel: tile.44
= control target key start
LH: loop header
LB: loop body
LE: loop exit
PB: predicated region body
PF: predicated region fallthrough
CT: control target
= control target key end

     0   :  { %vm46_vm0 = vcmask 1043458   ;;  %s88_s6 = smov 3  ;;  %vm51_vm1 = vcmask 1045508   ;;  %vm56_vm2 = vcmask 1047558   ;;  %s91_s9 = smov 12  ;;  %vm3_vm3 = vcmask 261120   ;;  %s1036_s0 = inlined_call_operand.vmem [shape: f32[11,16,32], index: 0, kind: input, shape index: {}]   ;;  %s1037_s1 = inlined_call_operand.vmem [shape: f32[11,512], index: 1, kind: output, shape index: {}]  }
   0x1   :  { %v476_v0 = vld [vmem:[%s1036_s0 + $0x87] ss:$16 sm:%s88_s6]   ;;  %s96_s10 = smov 48  ;;  %s101_s15 = smov 192  ;;  %vm60_vm4 = vcmask 1048320   ;;  %vm197_vm5 = vcmask 785920  }
   0x2   :  { %v477_v1 = vld [vmem:[%s1036_s0 + $0x147] ss:$-80 sm:%s91_s9]   ;;  %s41_s16 = smov 3  ;;  %v479_v4 = vld [vmem:[%s1036_s0 - $0x55] ss:$16 sm:%s101_s15]   ;;  %s44_s21 = smov 12 }
   0x3   :  { %v478_v2 = vld [vmem:[%s1036_s0 + $0x27] ss:$16 sm:%s96_s10]   ;;  %v94_v3 = vsel %vm46_vm0, %v477_v1, %v476_v0  ;;  %v466_v5 = vld [vmem:[%s1036_s0 + $0x3] ss:$16 sm:%s41_s16]   ;;  %s49_s22 = smov 48  ;;  %s54_s27 = smov 192 }
   0x4   :  { %v99_v6 = vsel %vm51_vm1, %v478_v2, %v94_v3  ;;  %v467_v7 = vld [vmem:[%s1036_s0 + $0x3] ss:$16 sm:%s44_s21]   ;;  %s113_s28 = smov 3  ;;  %s116_s4 = smov 12  ;;  %vm334_vm6 = vcmask 523520  }
   0x5   :  { %v468_v8 = vld [vmem:[%s1036_s0 + $0x3] ss:$16 sm:%s49_s22]   ;;  %v104_v9 = vsel %vm56_vm2, %v479_v4, %v99_v6  ;;  %v47_v10 = vsel %vm46_vm0, %v467_v7, %v466_v5  ;;  %v482_v12 = vld [vmem:[%s1036_s0 + $0x8b] ss:$16 sm:%s113_s28]   ;;  %s121_s5 = smov 48  ;;  %s565_s6 = smov 96  }
   0x6   :  { %v469_v11 = vld [vmem:[%s1036_s0 + $0x3] ss:$16 sm:%s54_s27]   ;;  %105 = vrot.lane.b32.xlu1 %v104_v9, %s565_s6  ;;  %v52_v13 = vsel %vm51_vm1, %v468_v8, %v47_v10  ;;  %s126_s9 = smov 192  ;;  %s63_s10 = smov 3 }
   0x7   :  { %v483_v14 = vld [vmem:[%s1036_s0 + $0xb] ss:$16 sm:%s116_s4]   ;;  %v57_v15 = vsel %vm56_vm2, %v469_v11, %v52_v13  ;;  %s66_s15 = smov 12  ;;  %s71_s16 = smov 48  ;;  %v470_v20 = vld [vmem:[%s1036_s0 + $0x83] ss:$16 sm:%s63_s10]  }
   0x8   :  { %v119_v16 = vsel %vm46_vm0, %v483_v14, %v482_v12  ;;  %v484_v17 = vld [vmem:[%s1036_s0 + $0xb] ss:$16 sm:%s121_s5]   ;;  %58 = vrot.lane.b32.xlu0 %v57_v15, %s565_s6  ;;  %s76_s19 = smov 192  ;;  %s200_s24 = smov 3 }
   0x9   :  { %v485_v18 = vld [vmem:[%s1036_s0 + $0xb] ss:$16 sm:%s126_s9]   ;;  %v124_v19 = vsel %vm51_vm1, %v484_v17, %v119_v16  ;;  %v472_v22 = vld [vmem:[%s1036_s0 - $0x29] ss:$16 sm:%s71_s16]   ;;  %s203_s25 = smov 12  ;;  %s208_s30 = smov 48 }
   0xa   :  { %v471_v21 = vld [vmem:[%s1036_s0 + $0x1db] ss:$-156 sm:%s66_s15]   ;;  %v502_v25 = vld [vmem:[%s1036_s0 + $0x82] ss:$16 sm:%s200_s24]   ;;  %s213_s2 = smov 192  ;;  %v129_v26 = vsel %vm56_vm2, %v485_v18, %v124_v19  ;;  %s178_s5 = smov 3 }
   0xb   :  { %v69_v23 = vsel %vm46_vm0, %v471_v21, %v470_v20  ;;  %v473_v24 = vld [vmem:[%s1036_s0 - $0x29] ss:$16 sm:%s76_s19]   ;;  %v503_v28 = vld [vmem:[%s1036_s0 + $0x1da] ss:$-156 sm:%s203_s25]   ;;  %s181_s7 = smov 12  ;;  %s186_s10 = smov 48 }
   0xc   :  { %v74_v27 = vsel %vm51_vm1, %v472_v22, %v69_v23  ;;  %v498_v29 = vld [vmem:[%s1036_s0 + $0x2] ss:$16 sm:%s178_s5]   ;;  %s191_s11 = smov 192  ;;  %v206_v31 = vsel %vm46_vm0, %v503_v28, %v502_v25  ;;  %v504_v32 = vld [vmem:[%s1036_s0 - $0x2a] ss:$16 sm:%s208_s30]   ;;  %s138_s16 = smov 3 }
   0xd   :  { %v79_v30 = vsel %vm56_vm2, %v473_v24, %v74_v27  ;;  %v499_v33 = vld [vmem:[%s1036_s0 + $0x2] ss:$16 sm:%s181_s7]   ;;  %s141_s17 = smov 12  ;;  %v505_v34 = vld [vmem:[%s1036_s0 - $0x2a] ss:$16 sm:%s213_s2]   ;;  %s146_s22 = smov 48  ;;  %v211_v39 = vsel %vm51_vm1, %v504_v32, %v206_v31 }
   0xe   :  { %130 = vrot.lane.b32.xlu1 %v129_v26, %s565_s6  ;;  %v500_v35 = vld [vmem:[%s1036_s0 + $0x2] ss:$16 sm:%s186_s10]   ;;  %s151_s23 = smov 192  ;;  %v184_v36 = vsel %vm46_vm0, %v499_v33, %v498_v29  ;;  %s275_s28 = smov 3  ;;  %v216_v49 = vsel %vm56_vm2, %v505_v34, %v211_v39 }
   0xf   :  { %v488_v37 = vld [vmem:[%s1036_s0 + $0xab] ss:$-156 sm:%s138_s16]   ;;  %s278_s29 = smov 12  ;;  %v501_v42 = vld [vmem:[%s1036_s0 + $0x2] ss:$16 sm:%s191_s11]   ;;  %s250_s8 = smov 3  ;;  %v189_v45 = vsel %vm51_vm1, %v500_v35, %v184_v36 }
  0x10   :  { %v489_v38 = vld [vmem:[%s1036_s0 - $0x1] ss:$16 sm:%s141_s17]   ;;  %80 = vrot.lane.b32.xlu0 %v79_v30, %s565_s6  ;;  %s253_s9 = smov 12  ;;  %s283_s14 = smov 48  ;;  %v194_v52 = vsel %vm56_vm2, %v501_v42, %v189_v45 }
  0x11   :  { %v144_v40 = vsel %vm46_vm0, %v489_v38, %v488_v37  ;;  %v490_v41 = vld [vmem:[%s1036_s0 - $0x1] ss:$16 sm:%s146_s22]   ;;  %v520_v47 = vld [vmem:[%s1036_s0 + $0xaa] ss:$-156 sm:%s275_s28]   ;;  %s163_s15 = smov 3  ;;  %s258_s20 = smov 48 }
  0x12   :  { %v149_v43 = vsel %vm51_vm1, %v490_v41, %v144_v40  ;;  %v491_v44 = vld [vmem:[%s1036_s0 - $0x1] ss:$16 sm:%s151_s23]   ;;  %v521_v48 = vld [vmem:[%s1036_s0 - $0x2] ss:$16 sm:%s278_s29]   ;;  %s166_s21 = smov 12  ;;  %s288_s24 = smov 192 }
  0x13   :  { %v154_v46 = vsel %vm56_vm2, %v491_v44, %v149_v43  ;;  %v514_v50 = vld [vmem:[%s1036_s0 + $0x8a] ss:$16 sm:%s250_s8]   ;;  %v281_v53 = vsel %vm46_vm0, %v521_v48, %v520_v47  ;;  %v522_v54 = vld [vmem:[%s1036_s0 - $0x2] ss:$16 sm:%s283_s14]   ;;  %s566_s25 = smov 64   ;;  %s263_s26 = smov 192 }
  0x14   :  { %155 = vrot.lane.b32.xlu2 %v154_v46, %s565_s6  ;;  %v515_v51 = vld [vmem:[%s1036_s0 + $0xa] ss:$16 sm:%s253_s9]   ;;  %s337_s4 = smov 3  ;;  %s340_s5 = smov 12  ;;  %v286_v59 = vsel %vm51_vm1, %v522_v54, %v281_v53  ;;  %v461_v53 = vld [vmem:[%s1036_s0 + $0x80] ss:$4 sm:$0xff]  }
  0x15   :  { %v494_v55 = vld [vmem:[%s1036_s0 + $0x8f] ss:$16 sm:%s163_s15]   ;;  %v256_v56 = vsel %vm46_vm0, %v515_v51, %v514_v50  ;;  %v516_v57 = vld [vmem:[%s1036_s0 + $0xa] ss:$16 sm:%s258_s20]   ;;  %s345_s9 = smov 48  ;;  %s315_s10 = smov 3 }
  0x16   :  { %217 = vrot.lane.b32.xlu1 %v216_v49, %s566_s25  ;;  %v495_v58 = vld [vmem:[%s1036_s0 + $0x10f] ss:$-48 sm:%s166_s21]   ;;  %s318_s13 = smov 12  ;;  %s225_s14 = smov 3  ;;  %v261_v63 = vsel %vm51_vm1, %v516_v57, %v256_v56  ;;  %v2_v50 = vld [vmem:[%s1036_s0] ss:$4 sm:$0xff]  }
  0x17   :  { %v523_v60 = vld [vmem:[%s1036_s0 - $0x2] ss:$16 sm:%s288_s24]   ;;  %v169_v61 = vsel %vm46_vm0, %v495_v58, %v494_v55  ;;  %v517_v62 = vld [vmem:[%s1036_s0 + $0xa] ss:$16 sm:%s263_s26]   ;;  %s228_s19 = smov 12  ;;  %s233_s20 = smov 48 }
  0x18   :  { %195 = vrot.lane.b32.xlu0 %v194_v52, %s566_s25  ;;  %v534_v0 = vld [vmem:[%s1036_s0 + $0x81] ss:$16 sm:%s337_s4]   ;;  %v291_v2 = vsel %vm56_vm2, %v523_v60, %v286_v59  ;;  %s238_s24 = smov 192  ;;  %s323_s28 = smov 48  ;;  %v266_v7 = vsel %vm56_vm2, %v517_v62, %v261_v63  ;;  %v458_v52 = vld [vmem:[%s1036_s0 + $0x60] ss:$4 sm:$0xff]  }
  0x19   :  { %v535_v1 = vld [vmem:[%s1036_s0 + $0x1d9] ss:$-156 sm:%s340_s5]   ;;  %v508_v6 = vld [vmem:[%s1036_s0 + $0x86] ss:$16 sm:%s225_s14]   ;;  %s350_s2 = smov 192  ;;  %s328_s8 = smov 192 }
  0x1a   :  { %v536_v3 = vld [vmem:[%s1036_s0 - $0x2b] ss:$16 sm:%s345_s9]   ;;  %v530_v4 = vld [vmem:[%s1036_s0 + $0x1] ss:$16 sm:%s315_s10]   ;;  %v343_v8 = vsel %vm46_vm0, %v535_v1, %v534_v0  ;;  %s415_s14 = smov 12  ;;  %s420_s17 = smov 48 }
  0x1b   :  { %v531_v5 = vld [vmem:[%s1036_s0 + $0x1] ss:$16 sm:%s318_s13]   ;;  %v509_v9 = vld [vmem:[%s1036_s0 + $0x146] ss:$-80 sm:%s228_s19]   ;;  %s412_s13 = smov 3  ;;  %v348_v16 = vsel %vm51_vm1, %v536_v3, %v343_v8  ;;  %s300_s26 = smov 3 }
  0x1c   :  { %170 = vrot.lane.b32.xlu2 %v169_v61, %s565_s6  ;;  %v510_v10 = vld [vmem:[%s1036_s0 + $0x26] ss:$16 sm:%s233_s20]   ;;  %v231_v11 = vsel %vm46_vm0, %v509_v9, %v508_v6  ;;  %v321_v13 = vsel %vm46_vm0, %v531_v5, %v530_v4  ;;  %s387_s20 = smov 3  ;;  %s390_s6 = smov 12  ;;  %v455_v54 = vld [vmem:[%s1036_s0 + $0x40] ss:$4 sm:$0xff]  }
  0x1d   :  { %v511_v12 = vld [vmem:[%s1036_s0 - $0x56] ss:$16 sm:%s238_s24]   ;;  %v532_v14 = vld [vmem:[%s1036_s0 + $0x1] ss:$16 sm:%s323_s28]   ;;  %v236_v15 = vsel %vm51_vm1, %v510_v10, %v231_v11  ;;  %s303_s27 = smov 12  ;;  %s395_s30 = smov 48 }
  0x1e   :  { %292 = vrot.lane.b32.xlu1 %v291_v2, %s566_s25  ;;  %v537_v17 = vld [vmem:[%s1036_s0 - $0x2b] ss:$16 sm:%s350_s2]   ;;  %v241_v18 = vsel %vm56_vm2, %v511_v12, %v236_v15  ;;  %v326_v20 = vsel %vm51_vm1, %v532_v14, %v321_v13  ;;  %s362_s7 = smov 3  ;;  %s425_s9 = smov 192  ;;  %v452_v55 = vld [vmem:[%s1036_s0 + $0x20] ss:$4 sm:$0xff]  }
  0x1f   :  { %v533_v19 = vld [vmem:[%s1036_s0 + $0x1] ss:$16 sm:%s328_s8]   ;;  %v553_v22 = vld [vmem:[%s1036_s0 - $0x3] ss:$16 sm:%s415_s14]   ;;  %v353_v23 = vsel %vm56_vm2, %v537_v17, %v348_v16  ;;  %s365_s8 = smov 12  ;;  %s567_s14 = smov 32  }
  0x20   :  { %267 = vrot.lane.b32.xlu0 %v266_v7, %s566_s25  ;;  %v552_v21 = vld [vmem:[%s1036_s0 + $0xa9] ss:$-156 sm:%s412_s13]   ;;  %v331_v27 = vsel %vm56_vm2, %v533_v19, %v326_v20  ;;  %s370_s21 = smov 48  ;;  %s375_s29 = smov 192 }
  0x21   :  { %v554_v24 = vld [vmem:[%s1036_s0 - $0x3] ss:$16 sm:%s420_s17]   ;;  %v546_v25 = vld [vmem:[%s1036_s0 + $0x89] ss:$16 sm:%s387_s20]   ;;  %v418_v28 = vsel %vm46_vm0, %v553_v22, %v552_v21  ;;  %s400_s17 = smov 192  ;;  %s437_s2 = smov 3 }
  0x22   :  { %v547_v26 = vld [vmem:[%s1036_s0 + $0x9] ss:$16 sm:%s390_s6]   ;;  %v526_v29 = vld [vmem:[%s1036_s0 + $0x8e] ss:$16 sm:%s300_s26]   ;;  %v423_v35 = vsel %vm51_vm1, %v554_v24, %v418_v28  ;;  %s440_s3 = smov 12 }
  0x23   :  { %v527_v30 = vld [vmem:[%s1036_s0 + $0x10e] ss:$-48 sm:%s303_s27]   ;;  %v548_v31 = vld [vmem:[%s1036_s0 + $0x9] ss:$16 sm:%s395_s30]   ;;  %v393_v32 = vsel %vm46_vm0, %v547_v26, %v546_v25 }
  0x24   :  { %242 = vrot.lane.b32.xlu2 %v241_v18, %s566_s25  ;;  %v540_v33 = vld [vmem:[%s1036_s0 + $0x85] ss:$16 sm:%s362_s7]   ;;  %v306_v37 = vsel %vm46_vm0, %v527_v30, %v526_v29  ;;  %v398_v38 = vsel %vm51_vm1, %v548_v31, %v393_v32  ;;  %v464_v51 = vld [vmem:[%s1036_s0 + $0xa0] ss:$4 sm:$0xf]  }
  0x25   :  { %v541_v34 = vld [vmem:[%s1036_s0 + $0x145] ss:$-80 sm:%s365_s8]   ;;  %v555_v36 = vld [vmem:[%s1036_s0 - $0x3] ss:$16 sm:%s425_s9]  }
  0x26   :  { %354 = vrot.lane.b32.xlu1 %v353_v23, %s567_s14  ;;  %v549_v39 = vld [vmem:[%s1036_s0 + $0x9] ss:$16 sm:%s400_s17]   ;;  %v368_v40 = vsel %vm46_vm0, %v541_v34, %v540_v33  ;;  %v428_v42 = vsel %vm56_vm2, %v555_v36, %v423_v35  ;;  %4 = vst.msk [vmem:[%s1037_s1] ss:$8 sm:$0xf] %vm3_vm3, %v2_v50  }
  0x27   :  { %v542_v41 = vld [vmem:[%s1036_s0 + $0x25] ss:$16 sm:%s370_s21]   ;;  %v403_v43 = vsel %vm56_vm2, %v549_v39, %v398_v38  ;;  %v543_v45 = vld [vmem:[%s1036_s0 - $0x57] ss:$16 sm:%s375_s29]  }
  0x28   :  { %332 = vrot.lane.b32.xlu0 %v331_v27, %s567_s14  ;;  %v373_v44 = vsel %vm51_vm1, %v542_v41, %v368_v40  ;;  %v558_v47 = vld [vmem:[%s1036_s0 + $0x8d] ss:$16 sm:%s437_s2]   ;;  %451 = vst.msk [vmem:[%s1037_s1 - $0x1f] ss:$8 sm:$0xf0] %vm3_vm3, %v2_v50  }
  0x29   :  { %v378_v46 = vsel %vm56_vm2, %v543_v45, %v373_v44  ;;  %v559_v48 = vld [vmem:[%s1036_s0 + $0x10d] ss:$-48 sm:%s440_s3]   ;;  %465 = vst.msk [vmem:[%s1037_s1 + $0x22] ss:$8 sm:$0xf] %vm3_vm3, %v464_v51  }
  0x2a   :  { %v443_v49 = vsel %vm46_vm0, %v559_v48, %v558_v47  ;;  %459 = vst.msk [vmem:[%s1037_s1 + $0x6] ss:$8 sm:$0xf] %vm3_vm3, %v458_v52  }
  0x2b   :  { %460 = vst.msk [vmem:[%s1037_s1 - $0x19] ss:$8 sm:$0xf0] %vm3_vm3, %v458_v52  }
  0x2c   :  { %307 = vrot.lane.b32.xlu2 %v306_v37, %s566_s25  ;;  %462 = vst.msk [vmem:[%s1037_s1 + $0x20] ss:$8 sm:$0xf] %vm3_vm3, %v461_v53  }
  0x2d   :  { %463 = vst.msk [vmem:[%s1037_s1 + $0x1] ss:$8 sm:$0xf0] %vm3_vm3, %v461_v53  }
  0x2e   :  { %429 = vrot.lane.b32.xlu1 %v428_v42, %s567_s14  ;;  %457 = vst.msk [vmem:[%s1037_s1 - $0x1b] ss:$8 sm:$0xf0] %vm3_vm3, %v455_v54  }
  0x2f   :  { %456 = vst.msk [vmem:[%s1037_s1 + $0x4] ss:$8 sm:$0xf] %vm3_vm3, %v455_v54  }
  0x30   :  { %404 = vrot.lane.b32.xlu0 %v403_v43, %s567_s14  ;;  %453 = vst.msk [vmem:[%s1037_s1 + $0x2] ss:$8 sm:$0xf] %vm3_vm3, %v452_v55  }
  0x31   :  { %454 = vst.msk [vmem:[%s1037_s1 - $0x1d] ss:$8 sm:$0xf0] %vm3_vm3, %v452_v55  }
  0x34   :  { %379 = vrot.lane.b32.xlu2 %v378_v46, %s567_s14 }
  0x3c   :  { %444 = vrot.lane.b32.xlu2 %v443_v49, %s567_s14 }
  0x6e   :  { %v156_v56 = vpop.permute.xlu2 %155  }
  0x6f   :  { %492 = vst.msk [vmem:[%s1037_s1 + $0x32] ss:$-26 sm:$0x3] %vm60_vm4, %v156_v56  }
  0x70   :  { %493 = vst.msk [vmem:[%s1037_s1 + $0x17] sm:$0xfc] %vm60_vm4, %v156_v56  }
  0x76   :  { %v171_v57 = vpop.permute.xlu2 %170  }
  0x77   :  { %497 = vst.msk [vmem:[%s1037_s1 + $0x1c] sm:$0x8] %vm60_vm4, %v171_v57  }
  0x78   :  { %496 = vst.msk [vmem:[%s1037_s1 + $0x38] sm:$0x7] %vm60_vm4, %v171_v57   ;;  %v106_v58 = vpop.permute.xlu1 %105  }
  0x79   :  { %480 = vst.msk [vmem:[%s1037_s1 + $0x28] sm:$0x7] %vm60_vm4, %v106_v58  }
  0x7a   :  { %v59_v59 = vpop.permute.xlu0 %58   ;;  %481 = vst.msk [vmem:[%s1037_s1 + $0xa] sm:$0xf8] %vm60_vm4, %v106_v58  }
  0x7b   :  { %61 = vst.msk [vmem:[%s1037_s1] sm:$0xff] %vm60_vm4, %v59_v59  }
  0x7e   :  { %v243_v60 = vpop.permute.xlu2 %242  }
  0x7f   :  { %512 = vst.msk [vmem:[%s1037_s1 + $0x28] sm:$0x7] %vm197_vm5, %v243_v60  }
  0x80   :  { %513 = vst.msk [vmem:[%s1037_s1 + $0xa] sm:$0xf8] %vm197_vm5, %v243_v60   ;;  %v131_v61 = vpop.permute.xlu1 %130  }
  0x81   :  { %486 = vst.msk [vmem:[%s1037_s1 + $0x30] sm:$0x3] %vm60_vm4, %v131_v61  }
  0x82   :  { %v81_v62 = vpop.permute.xlu0 %80   ;;  %487 = vst.msk [vmem:[%s1037_s1 + $0x10] sm:$0xfc] %vm60_vm4, %v131_v61  }
  0x83   :  { %474 = vst.msk [vmem:[%s1037_s1 + $0x20] sm:$0x7] %vm60_vm4, %v81_v62  }
  0x84   :  { %475 = vst.msk [vmem:[%s1037_s1 + $0x5] sm:$0xf8] %vm60_vm4, %v81_v62  }
  0x86   :  { %v308_v63 = vpop.permute.xlu2 %307  }
  0x87   :  { %528 = vst.msk [vmem:[%s1037_s1 + $0x38] sm:$0x7] %vm197_vm5, %v308_v63  }
  0x88   :  { %529 = vst.msk [vmem:[%s1037_s1 + $0x1c] sm:$0x8] %vm197_vm5, %v308_v63   ;;  %v218_v0 = vpop.permute.xlu1 %217  }
  0x89   :  { %506 = vst.msk [vmem:[%s1037_s1 + $0x20] sm:$0x7] %vm197_vm5, %v218_v0  }
  0x8a   :  { %507 = vst.msk [vmem:[%s1037_s1 + $0x5] sm:$0xf8] %vm197_vm5, %v218_v0   ;;  %v196_v1 = vpop.permute.xlu0 %195  }
  0x8b   :  { %198 = vst.msk [vmem:[%s1037_s1] sm:$0xff] %vm197_vm5, %v196_v1  }
  0x8e   :  { %v380_v2 = vpop.permute.xlu2 %379  }
  0x8f   :  { %544 = vst.msk [vmem:[%s1037_s1 + $0x28] sm:$0x7] %vm334_vm6, %v380_v2  }
  0x90   :  { %545 = vst.msk [vmem:[%s1037_s1 + $0xa] sm:$0xf8] %vm334_vm6, %v380_v2   ;;  %v293_v3 = vpop.permute.xlu1 %292  }
  0x91   :  { %524 = vst.msk [vmem:[%s1037_s1 + $0x32] ss:$-26 sm:$0x3] %vm197_vm5, %v293_v3  }
  0x92   :  { %525 = vst.msk [vmem:[%s1037_s1 + $0x17] sm:$0xfc] %vm197_vm5, %v293_v3   ;;  %v268_v4 = vpop.permute.xlu0 %267  }
  0x93   :  { %518 = vst.msk [vmem:[%s1037_s1 + $0x30] sm:$0x3] %vm197_vm5, %v268_v4  }
  0x94   :  { %519 = vst.msk [vmem:[%s1037_s1 + $0x10] sm:$0xfc] %vm197_vm5, %v268_v4  }
  0x96   :  { %v445_v5 = vpop.permute.xlu2 %444  }
  0x97   :  { %560 = vst.msk [vmem:[%s1037_s1 + $0x38] sm:$0x7] %vm334_vm6, %v445_v5  }
  0x98   :  { %561 = vst.msk [vmem:[%s1037_s1 + $0x1c] sm:$0x8] %vm334_vm6, %v445_v5   ;;  %v355_v6 = vpop.permute.xlu1 %354  }
  0x99   :  { %538 = vst.msk [vmem:[%s1037_s1 + $0x20] sm:$0x7] %vm334_vm6, %v355_v6  }
  0x9a   :  { %539 = vst.msk [vmem:[%s1037_s1 + $0x5] sm:$0xf8] %vm334_vm6, %v355_v6   ;;  %v333_v7 = vpop.permute.xlu0 %332  }
  0x9b   :  { %335 = vst.msk [vmem:[%s1037_s1] sm:$0xff] %vm334_vm6, %v333_v7  }
  0xa0   :  { %v430_v8 = vpop.permute.xlu1 %429  }
  0xa1   :  { %556 = vst.msk [vmem:[%s1037_s1 + $0x32] ss:$-26 sm:$0x3] %vm334_vm6, %v430_v8  }
  0xa2   :  { %557 = vst.msk [vmem:[%s1037_s1 + $0x17] sm:$0xfc] %vm334_vm6, %v430_v8   ;;  %v405_v9 = vpop.permute.xlu0 %404  }
  0xa3   :  { %550 = vst.msk [vmem:[%s1037_s1 + $0x30] sm:$0x3] %vm334_vm6, %v405_v9  }
  0xa4   :  { %551 = vst.msk [vmem:[%s1037_s1 + $0x10] sm:$0xfc] %vm334_vm6, %v405_v9  }

// kernel: caa_forward.1
= control target key start
LH: loop header
LB: loop body
LE: loop exit
PB: predicated region body
PF: predicated region fallthrough
CT: control target
= control target key end

     0   :  { %s6018_s30 = smov 0   ;;  %s9423_s0 = inlined_call_operand.vmem [shape: f32[2,16,512], index: 0, kind: input, shape index: {}]   ;;  %s9424_s1 = inlined_call_operand.vmem [shape: bf16[512,512], index: 1, kind: input, shape index: {}]   ;;  %s9425_s2 = inlined_call_operand.vmem [shape: f32[1,512], index: 2, kind: input, shape index: {}]   ;;  %s9426_s3 = inlined_call_operand.vmem [shape: f32[11,512], index: 3, kind: input, shape index: {}]   ;;  %s9427_s4 = inlined_call_operand.vmem [shape: f32[1,512], index: 4, kind: input, shape index: {}]   ;;  %s9428_s5 = inlined_call_operand.vmem [shape: f32[11,512], index: 5, kind: input, shape index: {}]   ;;  %s9429_s6 = inlined_call_operand.vmem [shape: f32[1,512], index: 6, kind: input, shape index: {}]   ;;  %s9430_s7 = inlined_call_operand.vmem [shape: bf16[512,512], index: 7, kind: input, shape index: {}]   ;;  %s9431_s8 = inlined_call_operand.vmem [shape: f32[1,512], index: 8, kind: input, shape index: {}]   ;;  %s9432_s9 = inlined_call_operand.vmem [shape: f32[2,16,512], index: 9, kind: output, shape index: {}]  }
   0x1 LB: > { %s4482_s10 = sadd.s32 4294967295, %s5962_s30   ;;  %p4486_p0 = scmp.ge.s32.totalorder %s5962_s30, 1  ;;  %s5962_s30 = sphi %s6018_s30, %s19_s30  }
   0x2   : > { %p287_p1 = scmp.lt.s32.totalorder %s5962_s30, 3 }
   0x4   : > { %p288_p2 = pnand %p4486_p0, %p287_p1 }
   0x6   : > { %291 = sbr.rel (%p288_p2) target bundleno = 1047 (0x417), region = 56 }
   0xb   : > { %p323_p3 = scmp.lt.s32.totalorder %s4482_s10, 1  ;;  %v5964_v0 = vmov 0.0   ;;  %s5965_s15 = smov 96   ;;  %v4861_v17 = vld [vmem:[%s9424_s1 + $0x2e0] sm:$0xf]  ;;  %vm580_vm3 = vcmask 1046528  }
   0xc   : > { %350 = vst [vmem:[#allocation2 + $0xd8] sm:$0xff] %v5964_v0  ;;  %s5966_s16 = smov 64   ;;  %s5967_s17 = smov 32   ;;  %v5613_v18 = vld [vmem:[%s9424_s1 + $0x2ec] sm:$0xf0]  ;;  %vm694_vm4 = vcmask 1044480  }
   0xd   : > { %s9518_s10 = smov (!%p323_p3, %s4482_s10), 1  ;;  %335 = vst [vmem:[#allocation2 + $0x68] sm:$0xff] %v5964_v0  ;;  %v4862_v20 = vor.u32 %v5613_v18, %v4861_v17  ;;  %v4845_v21 = vld [vmem:[%s9424_s1 + $0x2c0] sm:$0xf]  ;;  %v5609_v22 = vld [vmem:[%s9424_s1 + $0x2cc] sm:$0xf0] }
   0xe   : > { %s5517_s11 = sshll.u32 %s9518_s10, 6  ;;  %336 = vst [vmem:[#allocation2 + $0x18] sm:$0xff] %v5964_v0  ;;  %v4846_v23 = vor.u32 %v5609_v22, %v4845_v21  ;;  %v4605_v26 = vld [vmem:[%s9424_s1 + $0xe0] sm:$0xf]  ;;  %v5549_v27 = vld [vmem:[%s9424_s1 + $0xec] sm:$0xf0] }
   0xf   : > { %s6034_s14 = scalar_lea.vmem %s9423_s0, %s5517_s11  ;;  %337 = vst [vmem:[#allocation2 + $0xd0] sm:$0xff] %v5964_v0  ;;  %1801 = vmatpush.bf16.msra.mxu2 %v4862_v20  ;;  %v4606_v29 = vor.u32 %v5549_v27, %v4605_v26  ;;  %v4733_v30 = vld [vmem:[%s9424_s1 + $0x1e0] sm:$0xf]  ;;  %v5581_v31 = vld [vmem:[%s9424_s1 + $0x1ec] sm:$0xf0]  ;;  %vm641_vm5 = vcmask 1045504   ;;  %s9407_s18 = scalar_lea.vmem %s9432_s9, %s5517_s11 }
  0x10   : > { %v6037_v1 = vld [vmem:[%s6034_s14 + $0x10] sm:$0xff]  ;;  %v6040_v2 = vld [vmem:[%s6034_s14 + $0x8] sm:$0xff]  ;;  %338 = vst [vmem:[#allocation2 + $0xe8] sm:$0xff] %v5964_v0  ;;  %v6066_v5 = vld [vmem:[%s6034_s14 + $0x20] sm:$0xff]  ;;  %v4734_v33 = vor.u32 %v5581_v31, %v4733_v30  ;;  %v405_v31 = vlaneseq  ;;  %vm747_vm6 = vcmask 1043456   ;;  %vm808_vm7 = vcmask 1042432  }
  0x11   : > { %397 = vrot.lane.b32.xlu1 %v6037_v1, %s5965_s15  ;;  %424 = vrot.lane.b32.xlu2 %v6040_v2, %s5966_s16  ;;  %v6049_v3 = vld [vmem:[%s6034_s14 + $0x30] sm:$0xff]  ;;  %v6052_v4 = vld [vmem:[%s6034_s14 + $0x28] sm:$0xff]  ;;  %343 = vst [vmem:[#allocation2 + $0x98] sm:$0xff] %v5964_v0  ;;  %vm869_vm8 = vcmask 1041408   ;;  %vm1060_vm9 = vsmask.f32 5376 }
  0x12   : > { %393 = vrot.lane.b32.xlu0 %v6040_v2, %s5965_s15  ;;  %344 = vst [vmem:[#allocation2 + $0xb8] sm:$0xff] %v5964_v0  ;;  %v6069_v6 = vld [vmem:[%s6034_s14 + $0x18] sm:$0xff]  ;;  %v6072_v7 = vld [vmem:[%s6034_s14] sm:$0xff]  ;;  %v5605_v34 = vld [vmem:[%s9424_s1 + $0x2ac] sm:$0xf0]  ;;  %1773 = vmatpush.bf16.msra.mxu0 %v4606_v29  ;;  %vm2969_vm10 = vcmask 1040384  }
  0x13   : > { %345 = vst [vmem:[#allocation2 + $0xe0] sm:$0xff] %v5964_v0  ;;  %v6081_v8 = vld [vmem:[%s6034_s14 + $0x38] sm:$0xff]  ;;  %1802 = vmatpush.bf16.msra.mxu2 %v4846_v23  ;;  %v4829_v32 = vld [vmem:[%s9424_s1 + $0x2a0] sm:$0xf]  ;;  %1787 = vmatpush.bf16.msra.mxu1 %v4734_v33  ;;  %v5545_v37 = vld [vmem:[%s9424_s1 + $0xcc] sm:$0xf0] }
  0x14   : > { %346 = vst [vmem:[#allocation2 + $0xa0] sm:$0xff] %v5964_v0  ;;  %v4830_v35 = vor.u32 %v5605_v34, %v4829_v32  ;;  %v4589_v36 = vld [vmem:[%s9424_s1 + $0xc0] sm:$0xf]  ;;  %v5577_v40 = vld [vmem:[%s9424_s1 + $0x1cc] sm:$0xf0] }
  0x15   : > { %v4717_v38 = vld [vmem:[%s9424_s1 + $0x1c0] sm:$0xf]  ;;  %v4590_v39 = vor.u32 %v5545_v37, %v4589_v36  ;;  %v5601_v42 = vld [vmem:[%s9424_s1 + $0x28c] sm:$0xf0]  ;;  %vm3378_vm11 = vsmask.f32 6400 }
  0x16   : > { %v4813_v41 = vld [vmem:[%s9424_s1 + $0x280] sm:$0xf]  ;;  %v4718_v43 = vor.u32 %v5577_v40, %v4717_v38  ;;  %v5645_v46 = vld [vmem:[%s9424_s1 + $0x3ec] sm:$0xf0] }
  0x17   : > { %1803 = vmatpush.bf16.msra.mxu2 %v4830_v35  ;;  %v4814_v44 = vor.u32 %v5601_v42, %v4813_v41  ;;  %v4989_v45 = vld [vmem:[%s9424_s1 + $0x3e0] sm:$0xf]  ;;  %1774 = vmatpush.bf16.msra.mxu0 %v4590_v39  ;;  %v5541_v51 = vld [vmem:[%s9424_s1 + $0xac] sm:$0xf0] }
  0x18   : > { %v4990_v47 = vor.u32 %v5645_v46, %v4989_v45  ;;  %1788 = vmatpush.bf16.msra.mxu1 %v4718_v43  ;;  %v4573_v50 = vld [vmem:[%s9424_s1 + $0xa0] sm:$0xf]  ;;  %v5573_v55 = vld [vmem:[%s9424_s1 + $0x1ac] sm:$0xf0]  ;;  %v6276_v46 = vand.u32 127, %v405_v31 }
  0x19   : > { %399 = vrot.lane.b32.xlu1 %v6049_v3, %s5965_s15  ;;  %426 = vrot.lane.b32.xlu2 %v6052_v4, %s5966_s16  ;;  %v4701_v52 = vld [vmem:[%s9424_s1 + $0x1a0] sm:$0xf]  ;;  %v4574_v54 = vor.u32 %v5541_v51, %v4573_v50  ;;  %v5597_v57 = vld [vmem:[%s9424_s1 + $0x26c] sm:$0xf0] }
  0x1a   : > { %395 = vrot.lane.b32.xlu0 %v6052_v4, %s5965_s15  ;;  %1815 = vmatpush.bf16.msra.mxu3 %v4990_v47  ;;  %v4797_v56 = vld [vmem:[%s9424_s1 + $0x260] sm:$0xf]  ;;  %v4702_v58 = vor.u32 %v5573_v55, %v4701_v52  ;;  %v5641_v61 = vld [vmem:[%s9424_s1 + $0x3cc] sm:$0xf0]  ;;  %vm407_vm0 = vcmp.lt.s32.totalorder %v6276_v46, 96  ;;  %vm436_vm1 = vcmp.lt.s32.totalorder %v6276_v46, 64 }
  0x1b   : > { %1804 = vmatpush.bf16.msra.mxu2 %v4814_v44  ;;  %v4798_v59 = vor.u32 %v5597_v57, %v4797_v56  ;;  %v4973_v60 = vld [vmem:[%s9424_s1 + $0x3c0] sm:$0xf]  ;;  %1775 = vmatpush.bf16.msra.mxu0 %v4574_v54  ;;  %v5569_v20 = vld [vmem:[%s9424_s1 + $0x18c] sm:$0xf0]  ;;  %vm473_vm2 = vcmp.lt.s32.totalorder %v6276_v46, 32 }
  0x1c   : > { %v4974_v62 = vor.u32 %v5641_v61, %v4973_v60  ;;  %1789 = vmatpush.bf16.msra.mxu1 %v4702_v58  ;;  %v4557_v63 = vld [vmem:[%s9424_s1 + $0x80] sm:$0xf]  ;;  %v5593_v22 = vld [vmem:[%s9424_s1 + $0x24c] sm:$0xf0]  ;;  %v5611_v60 = vld [vmem:[%s9424_s1 + $0x2e4] sm:$0xf] }
  0x1d   : > { %v4685_v17 = vld [vmem:[%s9424_s1 + $0x180] sm:$0xf]  ;;  %v5637_v29 = vld [vmem:[%s9424_s1 + $0x3ac] sm:$0xf0]  ;;  %v4863_v61 = vld [vmem:[%s9424_s1 + $0x2f0] sm:$0xf0] }
  0x1e   : > { %1816 = vmatpush.bf16.msra.mxu3 %v4974_v62  ;;  %v4781_v21 = vld [vmem:[%s9424_s1 + $0x240] sm:$0xf]  ;;  %v4686_v23 = vor.u32 %v5569_v20, %v4685_v17  ;;  %v5533_v36 = vld [vmem:[%s9424_s1 + $0x6c] sm:$0xf0] }
  0x1f   : > { %1805 = vmatpush.bf16.msra.mxu2 %v4798_v59  ;;  %v4782_v26 = vor.u32 %v5593_v22, %v4781_v21  ;;  %v4957_v27 = vld [vmem:[%s9424_s1 + $0x3a0] sm:$0xf]  ;;  %v5565_v39 = vld [vmem:[%s9424_s1 + $0x16c] sm:$0xf0] }
  0x20   : > { %v4958_v30 = vor.u32 %v5637_v29, %v4957_v27  ;;  %1790 = vmatpush.bf16.msra.mxu1 %v4686_v23  ;;  %v4541_v35 = vld [vmem:[%s9424_s1 + $0x60] sm:$0xf]  ;;  %v5589_v41 = vld [vmem:[%s9424_s1 + $0x22c] sm:$0xf0] }
  0x21   : > { %430 = vrot.lane.b32.xlu1 %v6049_v3, %s5966_s16  ;;  %5788 = vrot.lane.b32.xlu2 %v5964_v0, %s5965_s15  ;;  %v4669_v37 = vld [vmem:[%s9424_s1 + $0x160] sm:$0xf]  ;;  %v4542_v38 = vor.u32 %v5533_v36, %v4541_v35  ;;  %v5633_v45 = vld [vmem:[%s9424_s1 + $0x38c] sm:$0xf0] }
  0x22   : > { %428 = vrot.lane.b32.xlu0 %v6037_v1, %s5966_s16  ;;  %1817 = vmatpush.bf16.msra.mxu3 %v4958_v30  ;;  %v4765_v40 = vld [vmem:[%s9424_s1 + $0x220] sm:$0xf]  ;;  %v4670_v42 = vor.u32 %v5565_v39, %v4669_v37  ;;  %v5529_v51 = vld [vmem:[%s9424_s1 + $0x4c] sm:$0xf0]  ;;  %v5607_v36 = vld [vmem:[%s9424_s1 + $0x2c4] sm:$0xf] }
  0x23   : > { %1806 = vmatpush.bf16.msra.mxu2 %v4782_v26  ;;  %v4766_v43 = vor.u32 %v5589_v41, %v4765_v40  ;;  %v4941_v44 = vld [vmem:[%s9424_s1 + $0x380] sm:$0xf]  ;;  %v5561_v55 = vld [vmem:[%s9424_s1 + $0x14c] sm:$0xf0]  ;;  %v4847_v37 = vld [vmem:[%s9424_s1 + $0x2d0] sm:$0xf0] }
  0x24   : > { %v4942_v47 = vor.u32 %v5633_v45, %v4941_v44  ;;  %1791 = vmatpush.bf16.msra.mxu1 %v4670_v42  ;;  %v4525_v50 = vld [vmem:[%s9424_s1 + $0x40] sm:$0xf]  ;;  %v5585_v57 = vld [vmem:[%s9424_s1 + $0x20c] sm:$0xf0]  ;;  %v4850_v41 = vor.u32 %v5607_v36, %v4847_v37 }
  0x25   : > { %v4653_v52 = vld [vmem:[%s9424_s1 + $0x140] sm:$0xf]  ;;  %v4526_v54 = vor.u32 %v5529_v51, %v4525_v50  ;;  %v5629_v17 = vld [vmem:[%s9424_s1 + $0x36c] sm:$0xf0]  ;;  %v6376_v50 = vld [vmem:[#allocation2 + $0xd0] sm:$0x80] }
  0x26   : > { %1818 = vmatpush.bf16.msra.mxu3 %v4942_v47  ;;  %v4749_v56 = vld [vmem:[%s9424_s1 + $0x200] sm:$0xf]  ;;  %v4654_v58 = vor.u32 %v5561_v55, %v4653_v52  ;;  %v5525_v23 = vld [vmem:[%s9424_s1 + $0x2c] sm:$0xf0]  ;;  %v6374_v47 = vld [vmem:[#allocation2 + $0xd0] sm:$0xc0] }
  0x27   : > { %1807 = vmatpush.bf16.msra.mxu2 %v4766_v43  ;;  %v4750_v59 = vor.u32 %v5585_v57, %v4749_v56  ;;  %v4925_v62 = vld [vmem:[%s9424_s1 + $0x360] sm:$0xf]  ;;  %v5625_v43 = vld [vmem:[%s9424_s1 + $0x34c] sm:$0xf0] }
  0x28   : > { %1792 = vmatpush.bf16.msra.mxu1 %v4654_v58  ;;  %v4926_v21 = vor.u32 %v5629_v17, %v4925_v62  ;;  %v4509_v22 = vld [vmem:[%s9424_s1 + $0x20] sm:$0xf]  ;;  %v5521_v56 = vld [vmem:[%s9424_s1 + $0xc] sm:$0xf0] }
  0x29   : > { %391 = vrot.lane.b32.xlu1 %v6066_v5, %s5965_s15  ;;  %401 = vrot.lane.b32.xlu2 %v6069_v6, %s5965_s15  ;;  %v4637_v26 = vld [vmem:[%s9424_s1 + $0x120] sm:$0xf]  ;;  %v4510_v35 = vor.u32 %v5525_v23, %v4509_v22 }
  0x2a   : > { %389 = vrot.lane.b32.xlu0 %v6072_v7, %s5965_s15  ;;  %1819 = vmatpush.bf16.msra.mxu3 %v4926_v21  ;;  %v4909_v42 = vld [vmem:[%s9424_s1 + $0x340] sm:$0xf]  ;;  %v4735_v21 = vld [vmem:[%s9424_s1 + $0x1f0] sm:$0xf0] }
  0x2b   : > { %1808 = vmatpush.bf16.msra.mxu2 %v4750_v59  ;;  %v4910_v45 = vor.u32 %v5625_v43, %v4909_v42  ;;  %v8362_v46 = vld [vmem:[%s9429_s6] sm:$0xf] }
  0x2e   : > { %1820 = vmatpush.bf16.msra.mxu3 %v4910_v45 }
  0x31   : > { %5793 = vrot.lane.b32.xlu1 %v5964_v0, %s5966_s16  ;;  %420 = vrot.lane.b32.xlu2 %v6072_v7, %s5966_s16 }
  0x32   : > { %403 = vrot.lane.b32.xlu0 %v6081_v8, %s5965_s15 }
  0x39   : > { %432 = vrot.lane.b32.xlu1 %v6069_v6, %s5966_s16  ;;  %434 = vrot.lane.b32.xlu2 %v6081_v8, %s5966_s16 }
  0x3a   : > { %422 = vrot.lane.b32.xlu0 %v6066_v5, %s5966_s16 }
  0x41   : > { %463 = vrot.lane.b32.xlu1 %v6052_v4, %s5967_s17  ;;  %465 = vrot.lane.b32.xlu2 %v6037_v1, %s5967_s17 }
  0x42   : > { %461 = vrot.lane.b32.xlu0 %v6040_v2, %s5967_s17 }
  0x49   : > { %5798 = vrot.lane.b32.xlu1 %v5964_v0, %s5967_s17  ;;  %457 = vrot.lane.b32.xlu2 %v6072_v7, %s5967_s17 }
  0x4a   : > { %467 = vrot.lane.b32.xlu0 %v6049_v3, %s5967_s17 }
  0x51   : > { %469 = vrot.lane.b32.xlu1 %v6069_v6, %s5967_s17  ;;  %471 = vrot.lane.b32.xlu2 %v6081_v8, %s5967_s17 }
  0x52   : > { %459 = vrot.lane.b32.xlu0 %v6066_v5, %s5967_s17 }
  0x59   : > { %5808 = vrot.lane.b32.xlu1 %v5964_v0, %s5966_s16  ;;  %5813 = vrot.lane.b32.xlu2 %v5964_v0, %s5967_s17 }
  0x5a   : > { %5803 = vrot.lane.b32.xlu0 %v5964_v0, %s5965_s15  ;;  %v5537_v0 = vld [vmem:[%s9424_s1 + $0x8c] sm:$0xf0] }
  0x5b   : > { %v4558_v18 = vor.u32 %v5537_v0, %v4557_v63  ;;  %v4866_v0 = vor.u32 %v5611_v60, %v4863_v61  ;;  %v5553_v60 = vld [vmem:[%s9424_s1 + $0x10c] sm:$0xf0]  ;;  %v5547_v61 = vld [vmem:[%s9424_s1 + $0xe4] sm:$0xf] }
  0x5d   : > { %1776 = vmatpush.bf16.msra.mxu0 %v4558_v18  ;;  %1857 = vmatpush.bf16.msrb.mxu2 %v4866_v0 }
  0x61   : > { %1777 = vmatpush.bf16.msra.mxu0 %v4542_v38  ;;  %1858 = vmatpush.bf16.msrb.mxu2 %v4850_v41  ;;  %v648_v41 = vrot.slane %v6376_v50, 2 }
  0x65   : > { %1778 = vmatpush.bf16.msra.mxu0 %v4526_v54 }
  0x69   : > { %1779 = vmatpush.bf16.msra.mxu0 %v4510_v35  ;;  %v4831_v35 = vld [vmem:[%s9424_s1 + $0x2b0] sm:$0xf0] }
  0x6b   : > { %v6114_v9 = vpop.permute.xlu2 %424 }
  0x73   : > { %v6116_v10 = vpop.permute.xlu2 %426 }
  0x7b   : > { %v6118_v11 = vpop.permute.xlu2 %5788 }
  0x7c   : > { %v5791_v18 = vunpack.i.h.bf16 %v6118_v11  ;;  %v5790_v27 = vunpack.i.l.bf16 %v6118_v11  ;;  %v5557_v11 = vld [vmem:[%s9424_s1 + $0x12c] sm:$0xf0] }
  0x7d   : > { %v4638_v40 = vor.u32 %v5557_v11, %v4637_v26  ;;  %v4893_v11 = vld [vmem:[%s9424_s1 + $0x320] sm:$0xf] }
  0x7f   : > { %1793 = vmatpush.bf16.msra.mxu1 %v4638_v40  ;;  %v587_v40 = vrot.slane %v6374_v47, 1 }
  0x83   : > { %v6120_v12 = vpop.permute.xlu1 %397  ;;  %v6122_v13 = vpop.permute.xlu2 %401 }
  0x84   : > { %v6124_v14 = vpop.permute.xlu0 %393  ;;  %v6329_v29 = vsel %vm407_vm0, %v6120_v12, %v6122_v13 }
  0x85   : > { %v6352_v38 = vsel %vm407_vm0, %v6124_v14, %v6120_v12 }
  0x8b   : > { %v6126_v15 = vpop.permute.xlu1 %399  ;;  %v6128_v16 = vpop.permute.xlu2 %420 }
  0x8c   : > { %v6136_v19 = vpop.permute.xlu0 %395  ;;  %v6382_v51 = vsel %vm436_vm1, %v6128_v16, %v6114_v9 }
  0x8d   : > { %v6370_v12 = vsel %vm407_vm0, %v6136_v19, %v6126_v15 }
  0x93   : > { %v6144_v24 = vpop.permute.xlu1 %430  ;;  %v6146_v25 = vpop.permute.xlu2 %434 }
  0x94   : > { %v6154_v28 = vpop.permute.xlu0 %428  ;;  %v6335_v30 = vsel %vm436_vm1, %v6116_v10, %v6144_v24  ;;  %v6392_v54 = vsel %vm436_vm1, %v6144_v24, %v6146_v25  ;;  %v4621_v24 = vld [vmem:[%s9424_s1 + $0x100] sm:$0xf] }
  0x95   : > { %v6358_v39 = vsel %vm436_vm1, %v6114_v9, %v6154_v28  ;;  %v6386_v52 = vadd.f32 %v6335_v30, %v6370_v12  ;;  %v4493_v9 = vld [vmem:[%s9424_s1] sm:$0xf]  ;;  %v4622_v0 = vor.u32 %v5553_v60, %v4621_v24 }
  0x96   : > { %v447_v57 = vadd.f32 %v6358_v39, %v6352_v38  ;;  %v4494_v59 = vor.u32 %v5521_v56, %v4493_v9  ;;  %v5543_v9 = vld [vmem:[%s9424_s1 + $0xc4] sm:$0xf] }
  0x97   : > { %1794 = vmatpush.bf16.msra.mxu1 %v4622_v0  ;;  %v5575_v56 = vld [vmem:[%s9424_s1 + $0x1c4] sm:$0xf]  ;;  %v4815_v0 = vld [vmem:[%s9424_s1 + $0x290] sm:$0xf0] }
  0x98   : > { %1780 = vmatpush.bf16.msra.mxu0 %v4494_v59 }
  0x9b   : > { %v6192_v48 = vpop.permute.xlu1 %391  ;;  %v6194_v49 = vpop.permute.xlu2 %465 }
  0x9c   : > { %v6205_v53 = vpop.permute.xlu0 %389  ;;  %v6420_v58 = vsel %vm407_vm0, %v5791_v18, %v6192_v48  ;;  %v5579_v18 = vld [vmem:[%s9424_s1 + $0x1e4] sm:$0xf] }
  0x9d   : > { %v6398_v55 = vsel %vm407_vm0, %v6205_v53, %v6124_v14  ;;  %v6415_v14 = vsel %vm407_vm0, %v6192_v48, %v6136_v19  ;;  %v4607_v19 = vld [vmem:[%s9424_s1 + $0xf0] sm:$0xf0]  ;;  %v414_v62 = vsel %vm407_vm0, %v5790_v27, %v6205_v53  ;;  %v5603_v53 = vld [vmem:[%s9424_s1 + $0x2a4] sm:$0xf]  ;;  %v4738_v27 = vor.u32 %v5579_v18, %v4735_v21 }
  0x9e   : > { %v4610_v17 = vor.u32 %v5547_v61, %v4607_v19  ;;  %v446_v22 = vadd.f32 %v6382_v51, %v6398_v55  ;;  %v4719_v61 = vld [vmem:[%s9424_s1 + $0x1d0] sm:$0xf0]  ;;  %v5599_v19 = vld [vmem:[%s9424_s1 + $0x284] sm:$0xf] }
  0x9f   : > { %1843 = vmatpush.bf16.msrb.mxu1 %v4738_v27  ;;  %v4722_v18 = vor.u32 %v5575_v56, %v4719_v61  ;;  %v4818_v21 = vor.u32 %v5599_v19, %v4815_v0  ;;  %v5643_v27 = vld [vmem:[%s9424_s1 + $0x3e4] sm:$0xf]  ;;  %v4975_v19 = vld [vmem:[%s9424_s1 + $0x3d0] sm:$0xf0] }
  0xa0   : > { %1829 = vmatpush.bf16.msrb.mxu0 %v4610_v17  ;;  %v5595_v56 = vld [vmem:[%s9424_s1 + $0x264] sm:$0xf] }
  0xa1   : > { %v5639_v61 = vld [vmem:[%s9424_s1 + $0x3c4] sm:$0xf] }
  0xa3   : > { %v6246_v32 = vpop.permute.xlu1 %5793  ;;  %v6248_v33 = vpop.permute.xlu2 %457  ;;  %1844 = vmatpush.bf16.msrb.mxu1 %v4722_v18 }
  0xa4   : > { %v6250_v34 = vpop.permute.xlu0 %403  ;;  %v5795_v44 = vunpack.i.l.bf16 %v6246_v32 }
  0xa5   : > { %v6438_v48 = vsel %vm407_vm0, %v6126_v15, %v6250_v34  ;;  %v5796_v15 = vunpack.i.h.bf16 %v6246_v32  ;;  %v5621_v32 = vld [vmem:[%s9424_s1 + $0x32c] sm:$0xf0] }
  0xa6   : > { %v443_v23 = vsel %vm436_vm1, %v5795_v44, %v6128_v16  ;;  %v4834_v16 = vor.u32 %v5603_v53, %v4831_v35  ;;  %v4894_v37 = vor.u32 %v5621_v32, %v4893_v11  ;;  %v6470_v42 = vadd.f32 %v6392_v54, %v6438_v48  ;;  %v4877_v53 = vld [vmem:[%s9424_s1 + $0x300] sm:$0xf]  ;;  %v4991_v32 = vld [vmem:[%s9424_s1 + $0x3f0] sm:$0xf0] }
  0xa8   : > { %1859 = vmatpush.bf16.msrb.mxu2 %v4834_v16  ;;  %1821 = vmatpush.bf16.msra.mxu3 %v4894_v37  ;;  %v4575_v16 = vld [vmem:[%s9424_s1 + $0xb0] sm:$0xf0]  ;;  %v445_v37 = vadd.f32 %v443_v23, %v414_v62 }
  0xab   : > { %v6307_v63 = vpop.permute.xlu1 %432  ;;  %v6337_v31 = vpop.permute.xlu2 %471 }
  0xac   : > { %v6313_v20 = vpop.permute.xlu0 %422  ;;  %v6476_v43 = vsel %vm436_vm1, %v6154_v28, %v6307_v63  ;;  %v4591_v28 = vld [vmem:[%s9424_s1 + $0xd0] sm:$0xf0]  ;;  %1860 = vmatpush.bf16.msrb.mxu2 %v4818_v21  ;;  %v4978_v21 = vor.u32 %v5639_v61, %v4975_v19 }
  0xad   : > { %v6501_v24 = vsel %vm436_vm1, %v6313_v20, %v6116_v10  ;;  %v444_v10 = vsel %vm436_vm1, %v5796_v15, %v6313_v20 }
  0xae   : > { %v6564_v0 = vadd.f32 %v444_v10, %v6420_v58  ;;  %v5567_v58 = vld [vmem:[%s9424_s1 + $0x184] sm:$0xf] }
  0xb3   : > { %v6455_v26 = vpop.permute.xlu1 %463  ;;  %v6517_v17 = vpop.permute.xlu2 %5813 }
  0xb4   : > { %v462_v36 = vpop.permute.xlu0 %461  ;;  %v5816_v15 = vunpack.i.h.bf16 %v6517_v17 }
  0xb5   : > { %v6481_v44 = vsel %vm473_vm2, %v462_v36, %v6194_v49  ;;  %v6486_v45 = vsel %vm473_vm2, %v6248_v33, %v462_v36  ;;  %v5539_v36 = vld [vmem:[%s9424_s1 + $0xa4] sm:$0xf] }
  0xb6   : > { %v483_v59 = vadd.f32 %v6486_v45, %v446_v22  ;;  %v484_v60 = vadd.f32 %v6481_v44, %v447_v57  ;;  %v4594_v57 = vor.u32 %v5543_v9, %v4591_v28  ;;  %v5617_v22 = vld [vmem:[%s9424_s1 + $0x30c] sm:$0xf0]  ;;  %v5571_v9 = vld [vmem:[%s9424_s1 + $0x1a4] sm:$0xf]  ;;  %v4703_v28 = vld [vmem:[%s9424_s1 + $0x1b0] sm:$0xf0] }
  0xb7   : > { %v4878_v11 = vor.u32 %v5617_v22, %v4877_v53  ;;  %v4706_v23 = vor.u32 %v5571_v9, %v4703_v28  ;;  %v5535_v53 = vld [vmem:[%s9424_s1 + $0x84] sm:$0xf]  ;;  %v4559_v22 = vld [vmem:[%s9424_s1 + $0x90] sm:$0xf0] }
  0xb8   : > { %v491_v35 = vadd.f32 %v483_v59, %v6040_v2  ;;  %v492_v20 = vadd.f32 %v484_v60, %v6037_v1  ;;  %1830 = vmatpush.bf16.msrb.mxu0 %v4594_v57  ;;  %v4994_v2 = vor.u32 %v5643_v27, %v4991_v32  ;;  %v4578_v1 = vor.u32 %v5539_v36, %v4575_v16  ;;  %v4799_v60 = vld [vmem:[%s9424_s1 + $0x270] sm:$0xf0]  ;;  %v5591_v16 = vld [vmem:[%s9424_s1 + $0x244] sm:$0xf] }
  0xb9   : > { %v6551_v59 = vadd.f32 %v6476_v43, %v6329_v29  ;;  %1822 = vmatpush.bf16.msra.mxu3 %v4878_v11  ;;  %v4802_v18 = vor.u32 %v5595_v56, %v4799_v60  ;;  %v6587_v32 = vsel %vm473_vm2, %v6337_v31, %v5816_v15  ;;  %v4687_v36 = vld [vmem:[%s9424_s1 + $0x190] sm:$0xf0]  ;;  %v5815_v15 = vunpack.i.l.bf16 %v6517_v17  ;;  %1845 = vmatpush.bf16.msrb.mxu1 %v4706_v23  ;;  %v5635_v9 = vld [vmem:[%s9424_s1 + $0x3a4] sm:$0xf] }
  0xba   : > { %v505_v62 = vadd.f32 %v491_v35, %v6352_v38  ;;  %v6568_v38 = vadd.f32 %v6501_v24, %v6415_v14  ;;  %v506_v11 = vadd.f32 %v492_v20, %v6329_v29  ;;  %v4959_v28 = vld [vmem:[%s9424_s1 + $0x3b0] sm:$0xf0] }
  0xbb   : > { %v6570_v57 = vpop.permute.xlu1 %5798  ;;  %1861 = vmatpush.bf16.msrb.mxu2 %v4802_v18  ;;  %v4543_v23 = vld [vmem:[%s9424_s1 + $0x70] sm:$0xf0]  ;;  %v5587_v18 = vld [vmem:[%s9424_s1 + $0x224] sm:$0xf] }
  0xbc   : > { %v519_v10 = vadd.f32 %v505_v62, %v6358_v39  ;;  %v5800_v27 = vunpack.i.l.bf16 %v6570_v57  ;;  %v468_v35 = vpop.permute.xlu0 %467  ;;  %v4783_v39 = vld [vmem:[%s9424_s1 + $0x250] sm:$0xf0]  ;;  %1831 = vmatpush.bf16.msrb.mxu0 %v4578_v1 }
  0xbd   : > { %1871 = vmatpush.bf16.msrb.mxu3 %v4994_v2  ;;  %v6601_v29 = vsel %vm473_vm2, %v468_v35, %v6337_v31  ;;  %v6606_v20 = vsel %vm473_vm2, %v6455_v26, %v468_v35  ;;  %v4562_v2 = vor.u32 %v5535_v53, %v4559_v22  ;;  %v5531_v31 = vld [vmem:[%s9424_s1 + $0x64] sm:$0xf]  ;;  %v4671_v60 = vld [vmem:[%s9424_s1 + $0x170] sm:$0xf0]  ;;  %v4786_v19 = vor.u32 %v5591_v16, %v4783_v39 }
  0xbe   : > { %v6619_v56 = vadd.f32 %v519_v10, %v6481_v44  ;;  %v480_v17 = vsel %vm473_vm2, %v5800_v27, %v6248_v33  ;;  %v488_v1 = vadd.f32 %v6606_v20, %v6386_v52  ;;  %v489_v62 = vadd.f32 %v6601_v29, %v6470_v42  ;;  %v5563_v44 = vld [vmem:[%s9424_s1 + $0x164] sm:$0xf]  ;;  %v6637_v33 = vld [vmem:[#allocation2 + $0xe0] sm:$0x1]  ;;  %v4767_v53 = vld [vmem:[%s9424_s1 + $0x230] sm:$0xf0] }
  0xbf   : > { %v482_v61 = vadd.f32 %v480_v17, %v445_v37  ;;  %v4690_v52 = vor.u32 %v5567_v58, %v4687_v36  ;;  %v4962_v42 = vor.u32 %v5635_v9, %v4959_v28  ;;  %v5631_v22 = vld [vmem:[%s9424_s1 + $0x384] sm:$0xf]  ;;  %v520_v58 = vadd.f32 %v506_v11, %v6476_v43  ;;  %v4943_v27 = vld [vmem:[%s9424_s1 + $0x390] sm:$0xf0]  ;;  %1862 = vmatpush.bf16.msrb.mxu2 %v4786_v19 }
  0xc0   : > { %541 = vst [vmem:[#allocation2 + $0x60] sm:$0xff] %v6619_v56  ;;  %v496_v37 = vadd.f32 %v488_v1, %v6049_v3  ;;  %v4546_v10 = vor.u32 %v5531_v31, %v4543_v23  ;;  %v5527_v35 = vld [vmem:[%s9424_s1 + $0x44] sm:$0xf]  ;;  %v5801_v36 = vunpack.i.h.bf16 %v6570_v57  ;;  %1832 = vmatpush.bf16.msrb.mxu0 %v4562_v2  ;;  %v4770_v16 = vor.u32 %v5587_v18, %v4767_v53  ;;  %v4527_v43 = vld [vmem:[%s9424_s1 + $0x50] sm:$0xf0] }
  0xc1   : > { %1872 = vmatpush.bf16.msrb.mxu3 %v4978_v21  ;;  %v6651_v21 = vadd.f32 %v489_v62, %v6081_v8  ;;  %v490_v3 = vadd.f32 %v482_v61, %v6072_v7  ;;  %1846 = vmatpush.bf16.msrb.mxu1 %v4690_v52  ;;  %v4674_v8 = vor.u32 %v5563_v44, %v4671_v60  ;;  %v5559_v11 = vld [vmem:[%s9424_s1 + $0x144] sm:$0xf]  ;;  %v4655_v39 = vld [vmem:[%s9424_s1 + $0x150] sm:$0xf0]  ;;  %v6680_v23 = vld [vmem:[#allocation2 + $0xe0] sm:$0x3] }
  0xc2   : > { %v510_v57 = vadd.f32 %v496_v37, %v6438_v48  ;;  %v4946_v7 = vor.u32 %v5631_v22, %v4943_v27  ;;  %v4530_v2 = vor.u32 %v5527_v35, %v4527_v43  ;;  %v4658_v9 = vor.u32 %v5559_v11, %v4655_v39  ;;  %v5583_v28 = vld [vmem:[%s9424_s1 + $0x204] sm:$0xf]  ;;  %v4751_v31 = vld [vmem:[%s9424_s1 + $0x210] sm:$0xf0]  ;;  %v859_v35 = vld [vmem:[#allocation2 + $0xe0] sm:$0x7] }
  0xc3   : > { %v504_v17 = vadd.f32 %v490_v3, %v6398_v55  ;;  %v470_v1 = vpop.permute.xlu1 %469  ;;  %v4754_v62 = vor.u32 %v5583_v28, %v4751_v31  ;;  %v764_v48 = vrot.slane %v6637_v33, 4  ;;  %1863 = vmatpush.bf16.msrb.mxu2 %v4770_v16  ;;  %v550_v18 = vld [vmem:[#allocation2 + $0xd0] sm:$0xe0] }
  0xc4   : > { %v524_v44 = vadd.f32 %v510_v57, %v6392_v54  ;;  %v474_v60 = vsel %vm473_vm2, %v6194_v49, %v470_v1  ;;  %v6688_v61 = vsel %vm473_vm2, %v470_v1, %v5815_v15  ;;  %v460_v52 = vpop.permute.xlu0 %459  ;;  %1833 = vmatpush.bf16.msrb.mxu0 %v4546_v10  ;;  %v886_v57 = vrot.slane %v859_v35, 6  ;;  %v6812_v35 = vld [vmem:[%s9424_s1 + $0x2c8] sm:$0xf] }
  0xc5   : > { %1873 = vmatpush.bf16.msrb.mxu3 %v4962_v42  ;;  %v518_v55 = vadd.f32 %v504_v17, %v6382_v51  ;;  %v485_v19 = vadd.f32 %v474_v60, %v6551_v59  ;;  %v6692_v42 = vadd.f32 %v520_v58, %v474_v60  ;;  %v479_v54 = vsel %vm473_vm2, %v460_v52, %v6455_v26 }
  0xc6   : > { %v6698_v33 = vadd.f32 %v524_v44, %v6601_v29  ;;  %v481_v49 = vsel %vm473_vm2, %v5801_v36, %v460_v52  ;;  %v487_v15 = vadd.f32 %v479_v54, %v6568_v38  ;;  %1847 = vmatpush.bf16.msrb.mxu1 %v4674_v8  ;;  %v825_v51 = vrot.slane %v6680_v23, 5  ;;  %v6770_v52 = vld [vmem:[%s9424_s1 + $0x2e8] sm:$0xf] }
  0xc7   : > { %v6705_v59 = vadd.f32 %v518_v55, %v6486_v45  ;;  %542 = vst [vmem:[#allocation2 + $0x10] sm:$0xff] %v6692_v42  ;;  %v486_v26 = vadd.f32 %v481_v49, %v6564_v0  ;;  %v588_v29 = vrot.slane %v6692_v42, 1  ;;  %v649_v53 = vrot.slane %v6692_v42, 2  ;;  %1864 = vmatpush.bf16.msrb.mxu2 %v4754_v62  ;;  %v5627_v49 = vld [vmem:[%s9424_s1 + $0x364] sm:$0xf] }
  0xc8   : > { %546 = vst [vmem:[#allocation2 + $0x20] sm:$0xff] %v6698_v33  ;;  %v495_v38 = vadd.f32 %v487_v15, %v6052_v4  ;;  %v697_v22 = vrot.slane %v6692_v42, 3  ;;  %v703_v45 = vrot.slane %v6698_v33, 3  ;;  %v493_v37 = vadd.f32 %v485_v19, %v6069_v6  ;;  %1834 = vmatpush.bf16.msrb.mxu0 %v4530_v2  ;;  %v4927_v15 = vld [vmem:[%s9424_s1 + $0x370] sm:$0xf0] }
  0xc9   : > { %1874 = vmatpush.bf16.msrb.mxu3 %v4946_v7  ;;  %540 = vst [vmem:[#allocation2 + $0x78] sm:$0xff] %v6705_v59  ;;  %v494_v0 = vadd.f32 %v486_v26, %v6066_v5  ;;  %v589_v58 = vsel %vm580_vm3, %v587_v40, %v588_v29  ;;  %v756_v4 = vrot.slane %v6698_v33, 4  ;;  %v650_v5 = vsel %vm641_vm5, %v648_v41, %v649_v53 }
  0xca   : > { %v509_v10 = vadd.f32 %v495_v38, %v6370_v12  ;;  %1848 = vmatpush.bf16.msrb.mxu1 %v4658_v9  ;;  %v615_v27 = vadd.f32 %v589_v58, %v550_v18  ;;  %v817_v6 = vrot.slane %v6698_v33, 5  ;;  %v6735_v40 = vsel %vm694_vm4, %v697_v22, %v703_v45 }
  0xcb   : > { %v508_v47 = vadd.f32 %v494_v0, %v6415_v14  ;;  %v5809_v36 = vpop.permute.xlu1 %5808  ;;  %v6738_v12 = vsel %vm747_vm6, %v756_v4, %v764_v48  ;;  %v878_v3 = vrot.slane %v6698_v33, 6  ;;  %v5555_v0 = vld [vmem:[%s9424_s1 + $0x124] sm:$0xf] }
  0xcc   : > { %v523_v50 = vadd.f32 %v509_v10, %v6335_v30  ;;  %v5811_v8 = vunpack.i.h.bf16 %v5809_v36  ;;  %v5810_v41 = vunpack.i.l.bf16 %v5809_v36  ;;  %v5804_v16 = vpop.permute.xlu0 %5803  ;;  %v676_v43 = vadd.f32 %v650_v5, %v615_v27  ;;  %v4639_v5 = vld [vmem:[%s9424_s1 + $0x130] sm:$0xf0] }
  0xcd   : > { %v522_v11 = vadd.f32 %v508_v47, %v6501_v24  ;;  %v5806_v14 = vunpack.i.h.bf16 %v5804_v16  ;;  %v5805_v39 = vunpack.i.l.bf16 %v5804_v16  ;;  %v6755_v24 = vsel %vm808_vm7, %v817_v6, %v825_v51  ;;  %v6817_v47 = vld [vmem:[%s9424_s1 + $0x2d4] sm:$0xf0] }
  0xce   : > { %v6744_v7 = vadd.f32 %v523_v50, %v6606_v20  ;;  %v516_v2 = vsel %vm436_vm1, %v6307_v63, %v5810_v41  ;;  %v517_v30 = vsel %vm436_vm1, %v6146_v25, %v5811_v8  ;;  %v733_v9 = vld [vmem:[#allocation2 + $0x10] sm:$0xfe]  ;;  %v721_v62 = vadd.f32 %v697_v22, %v676_v43  ;;  %v5523_v22 = vld [vmem:[%s9424_s1 + $0x24] sm:$0xf] }
  0xcf   : > { %v794_v28 = vld [vmem:[#allocation2 + $0x10] sm:$0xfc]  ;;  %v6757_v17 = vadd.f32 %v522_v11, %v479_v54  ;;  %v503_v20 = vsel %vm407_vm0, %v6250_v34, %v5806_v14  ;;  %v502_v63 = vsel %vm407_vm0, %v6122_v13, %v5805_v39  ;;  %v566_v1 = vld [vmem:[#allocation2 + $0x20] sm:$0x3f]  ;;  %v6775_v34 = vld [vmem:[%s9424_s1 + $0x2f4] sm:$0xf0] }
  0xd0   : > { %v855_v31 = vld [vmem:[#allocation2 + $0x10] sm:$0xf8]  ;;  %v631_v25 = vld [vmem:[#allocation2 + $0x20] sm:$0x7f]  ;;  %545 = vst [vmem:[#allocation2 + $0xa8] sm:$0xff] %v6744_v7  ;;  %v511_v48 = vadd.f32 %v503_v20, %v6651_v21  ;;  %v507_v23 = vadd.f32 %v502_v63, %v493_v37  ;;  %v597_v44 = vrot.slane %v566_v1, 1  ;;  %v6781_v21 = vsel %vm869_vm8, %v878_v3, %v886_v57 }
  0xd1   : > { %v658_v60 = vrot.slane %v631_v25, 2  ;;  %544 = vst [vmem:[#allocation2 + $0x70] sm:$0xff] %v6757_v17  ;;  %v558_v13 = vld [vmem:[#allocation2 + $0x20] sm:$0x1f]  ;;  %v750_v55 = vrot.slane %v733_v9, 4  ;;  %v811_v19 = vrot.slane %v794_v28, 5  ;;  %v4930_v57 = vor.u32 %v5627_v49, %v4927_v15 }
  0xd2   : > { %v872_v54 = vrot.slane %v855_v31, 6  ;;  %v525_v51 = vadd.f32 %v517_v30, %v511_v48  ;;  %v521_v26 = vadd.f32 %v516_v2, %v507_v23  ;;  %v598_v18 = vsel %vm580_vm3, %v588_v29, %v597_v44  ;;  %v4511_v37 = vld [vmem:[%s9424_s1 + $0x30] sm:$0xf0]  ;;  %v5623_v8 = vld [vmem:[%s9424_s1 + $0x344] sm:$0xf] }
  0xd3   : > { %v623_v38 = vadd.f32 %v597_v44, %v558_v13  ;;  %v619_v58 = vadd.f32 %v598_v18, %v6692_v42  ;;  %v659_v10 = vsel %vm641_vm5, %v649_v53, %v658_v60  ;;  %v757_v29 = vsel %vm747_vm6, %v750_v55, %v756_v4  ;;  %v560_v42 = vld [vmem:[#allocation2 + $0x68] sm:$0xc0]  ;;  %v4911_v41 = vld [vmem:[%s9424_s1 + $0x350] sm:$0xf0]  ;;  %v5551_v14 = vld [vmem:[%s9424_s1 + $0x104] sm:$0xf]  ;;  %1875 = vmatpush.bf16.msrb.mxu3 %v4930_v57 }
  0xd4   : > { %v782_v27 = vadd.f32 %v750_v55, %v721_v62  ;;  %v6820_v53 = vadd.f32 %v6587_v32, %v525_v51  ;;  %v6823_v4 = vadd.f32 %v6688_v61, %v521_v26  ;;  %v818_v50 = vsel %vm808_vm7, %v811_v19, %v817_v6  ;;  %v5519_v32 = vld [vmem:[%s9424_s1 + $0x4] sm:$0xf]  ;;  %v4495_v11 = vld [vmem:[%s9424_s1 + $0x10] sm:$0xf0]  ;;  %v625_v9 = vld [vmem:[#allocation2 + $0x68] sm:$0x80] }
  0xd5   : > { %v684_v36 = vadd.f32 %v658_v60, %v623_v38  ;;  %v680_v16 = vadd.f32 %v659_v10, %v619_v58  ;;  %v879_v43 = vsel %vm869_vm8, %v872_v54, %v878_v3  ;;  %v4870_v6 = vor.u32 %v6775_v34, %v6770_v52  ;;  %v4623_v39 = vld [vmem:[%s9424_s1 + $0x110] sm:$0xf0] }
  0xd6   : > { %v843_v61 = vadd.f32 %v811_v19, %v782_v27  ;;  %547 = vst [vmem:[#allocation2 + $0x88] sm:$0xff] %v6820_v53  ;;  %v4514_v2 = vor.u32 %v5523_v22, %v4511_v37  ;;  %v4642_v30 = vor.u32 %v5555_v0, %v4639_v5  ;;  %v4854_v20 = vor.u32 %v6817_v47, %v6812_v35  ;;  %v731_v0 = vld [vmem:[#allocation2 + $0x78] sm:$0xfe] }
  0xd7   : > { %v729_v3 = vadd.f32 %v703_v45, %v684_v36  ;;  %543 = vst [vmem:[#allocation2 + $0x28] sm:$0xff] %v6823_v4  ;;  %v725_v28 = vadd.f32 %v6735_v40, %v680_v16  ;;  %v4914_v63 = vor.u32 %v5623_v8, %v4911_v41  ;;  %v4498_v25 = vor.u32 %v5519_v32, %v4495_v11  ;;  %v548_v45 = vld [vmem:[#allocation2 + $0x68] sm:$0xe0] }
  0xd8   : > { %v904_v31 = vadd.f32 %v872_v54, %v843_v61  ;;  %1835 = vmatpush.bf16.msrb.mxu0 %v4514_v2  ;;  %v4626_v33 = vor.u32 %v5551_v14, %v4623_v39  ;;  %v564_v62 = vld [vmem:[#allocation2 + $0x70] sm:$0x3f]  ;;  %v581_v48 = vrot.slane %v560_v42, 1  ;;  %1849 = vmatpush.bf16.msrb.mxu1 %v4642_v30  ;;  %v582_v44 = vrot.slane %v6705_v59, 1  ;;  %v792_v14 = vld [vmem:[#allocation2 + $0x78] sm:$0xfc] }
  0xd9   : > { %v790_v1 = vadd.f32 %v6738_v12, %v729_v3  ;;  %v786_v23 = vadd.f32 %v757_v29, %v725_v28  ;;  %v593_v60 = vrot.slane %v564_v62, 1  ;;  %v629_v40 = vld [vmem:[#allocation2 + $0x70] sm:$0x7f]  ;;  %v642_v13 = vrot.slane %v625_v9, 2  ;;  %1876 = vmatpush.bf16.msrb.mxu3 %v4914_v63  ;;  %v796_v30 = vld [vmem:[#allocation2 + $0x98] sm:$0x3] }
  0xda   : > { %v556_v19 = vld [vmem:[#allocation2 + $0x70] sm:$0x1f]  ;;  %v643_v54 = vrot.slane %v6705_v59, 2  ;;  %v654_v12 = vrot.slane %v629_v40, 2  ;;  %v695_v49 = vrot.slane %v6705_v59, 3  ;;  %v583_v51 = vsel %vm580_vm3, %v581_v48, %v582_v44 }
  0xdb   : > { %v851_v55 = vadd.f32 %v6755_v24, %v790_v1  ;;  %v847_v15 = vadd.f32 %v818_v50, %v786_v23  ;;  %v594_v26 = vsel %vm580_vm3, %v582_v44, %v593_v60  ;;  %v621_v18 = vadd.f32 %v593_v60, %v556_v19  ;;  %v735_v50 = vld [vmem:[#allocation2 + $0x98] sm:$0x1]  ;;  %v561_v23 = vld [vmem:[#allocation2 + $0x18] sm:$0xc0] }
  0xdc   : > { %1836 = vmatpush.bf16.msrb.mxu0 %v4498_v25  ;;  %v613_v22 = vadd.f32 %v583_v51, %v548_v45  ;;  %v617_v24 = vadd.f32 %v594_v26, %v6705_v59  ;;  %v699_v37 = vrot.slane %v6757_v17, 3  ;;  %1850 = vmatpush.bf16.msrb.mxu1 %v4626_v33  ;;  %v644_v10 = vsel %vm641_vm5, %v642_v13, %v643_v54  ;;  %v857_v25 = vld [vmem:[#allocation2 + $0x98] sm:$0x7] }
  0xdd   : > { %v912_v38 = vadd.f32 %v6781_v21, %v851_v55  ;;  %v908_v58 = vadd.f32 %v879_v43, %v847_v15  ;;  %v655_v29 = vsel %vm641_vm5, %v643_v54, %v654_v12  ;;  %v682_v27 = vadd.f32 %v654_v12, %v621_v18 }
  0xde   : > { %v674_v42 = vadd.f32 %v644_v10, %v613_v22  ;;  %v678_v36 = vadd.f32 %v655_v29, %v617_v24  ;;  %v700_v21 = vsel %vm694_vm4, %v695_v49, %v699_v37  ;;  %v748_v32 = vrot.slane %v731_v0, 4  ;;  %v549_v29 = vld [vmem:[#allocation2 + $0x18] sm:$0xe0] }
  0xdf   : > { %v920_v5 = vpack.c.bf16 %v912_v38, %v912_v38  ;;  %v916_v8 = vpack.c.bf16 %v908_v58, %v904_v31  ;;  %v727_v41 = vadd.f32 %v699_v37, %v682_v27  ;;  %v752_v59 = vrot.slane %v6757_v17, 4  ;;  %v853_v31 = vld [vmem:[#allocation2 + $0x78] sm:$0xf8]  ;;  %v630_v58 = vld [vmem:[#allocation2 + $0xa8] sm:$0x7f] }
  0xe0   : > { %v719_v43 = vadd.f32 %v695_v49, %v674_v42  ;;  %v723_v11 = vadd.f32 %v700_v21, %v678_v36  ;;  %v760_v2 = vrot.slane %v735_v50, 4  ;;  %v809_v48 = vrot.slane %v792_v14, 5  ;;  %v565_v49 = vld [vmem:[#allocation2 + $0xa8] sm:$0x3f]  ;;  %v626_v38 = vld [vmem:[#allocation2 + $0x18] sm:$0x80] }
  0xe1   : > { %v1104_v16 = vshrl.u32 %v920_v5, 16  ;;  %v1107_v61 = vshll.u32 %v920_v5, 16  ;;  %v1096_v39 = vshrl.u32 %v916_v8, 16  ;;  %v1099_v3 = vshll.u32 %v916_v8, 16  ;;  %v557_v21 = vld [vmem:[#allocation2 + $0xa8] sm:$0x1f] }
  0xe2   : > { %v753_v57 = vsel %vm747_vm6, %v748_v32, %v752_v59  ;;  %v780_v63 = vadd.f32 %v748_v32, %v719_v43  ;;  %v761_v62 = vsel %vm747_vm6, %v752_v59, %v760_v2  ;;  %v813_v40 = vrot.slane %v6757_v17, 5 }
  0xe3   : > { %v1106_v9 = vrot.slane %v1104_v16, 2  ;;  %v1109_v28 = vrot.slane %v1107_v61, 3  ;;  %v784_v1 = vadd.f32 %v753_v57, %v723_v11  ;;  %v1098_v33 = vrot.slane %v1096_v39, 2  ;;  %v732_v39 = vld [vmem:[#allocation2 + $0x60] sm:$0xfe] }
  0xe4   : > { %v1101_v45 = vrot.slane %v1099_v3, 3  ;;  %v788_v60 = vadd.f32 %v761_v62, %v727_v41  ;;  %v821_v13 = vrot.slane %v796_v30, 5  ;;  %v841_v19 = vadd.f32 %v809_v48, %v780_v63 }
  0xe5   : > { %v1110_v44 = vor.u32 %v1109_v28, %v1106_v9  ;;  %v870_v54 = vrot.slane %v853_v31, 6  ;;  %v874_v12 = vrot.slane %v6757_v17, 6  ;;  %v814_v15 = vsel %vm808_vm7, %v809_v48, %v813_v40  ;;  %v736_v31 = vld [vmem:[#allocation2 + $0xb8] sm:$0x1] }
  0xe6   : > { %v1102_v55 = vor.u32 %v1101_v45, %v1098_v33  ;;  %v822_v51 = vsel %vm808_vm7, %v813_v40, %v821_v13  ;;  %v882_v26 = vrot.slane %v857_v25, 6  ;;  %v584_v18 = vrot.slane %v561_v23, 1  ;;  %v793_v33 = vld [vmem:[#allocation2 + $0x60] sm:$0xfc]  ;;  %v858_v40 = vld [vmem:[#allocation2 + $0xb8] sm:$0x7] }
  0xe7   : > { %v845_v24 = vadd.f32 %v814_v15, %v784_v1  ;;  %v849_v37 = vadd.f32 %v822_v51, %v788_v60  ;;  %v875_v0 = vsel %vm869_vm8, %v870_v54, %v874_v12  ;;  %v902_v10 = vadd.f32 %v870_v54, %v841_v19  ;;  %v854_v60 = vld [vmem:[#allocation2 + $0x60] sm:$0xf8]  ;;  %v6910_v15 = vld [vmem:[%s9424_s1 + $0x1e8] sm:$0xf]  ;;  %v6915_v51 = vld [vmem:[%s9424_s1 + $0x1f4] sm:$0xf0] }
  0xe8   : > { %v6879_v22 = vsel %vm1060_vm9, %v1102_v55, %v1110_v44  ;;  %v883_v17 = vsel %vm869_vm8, %v874_v12, %v882_v26  ;;  %v585_v27 = vrot.slane %v6619_v56, 1  ;;  %v595_v5 = vrot.slane %v565_v49, 1  ;;  %v4613_v12 = vld [vmem:[%s9424_s1 + $0xe8] sm:$0xf]  ;;  %v5550_v49 = vld [vmem:[%s9424_s1 + $0xf4] sm:$0xf0] }
  0xe9   : > { %1809 = vmatmul.bf16.vlgmr.msra.gmra.mxu2 %v6879_v22  ;;  %v906_v42 = vadd.f32 %v875_v0, %v845_v24  ;;  %v910_v36 = vadd.f32 %v883_v17, %v849_v37  ;;  %v645_v50 = vrot.slane %v626_v38, 2  ;;  %v646_v8 = vrot.slane %v6619_v56, 2  ;;  %v4837_v37 = vld [vmem:[%s9424_s1 + $0x2a8] sm:$0xf]  ;;  %v5606_v0 = vld [vmem:[%s9424_s1 + $0x2b4] sm:$0xf0] }
  0xea   : > { %1913 = vmatpush.bf16.msra.mxu2 %v4870_v6  ;;  %v586_v41 = vsel %vm580_vm3, %v584_v18, %v585_v27  ;;  %v596_v32 = vsel %vm580_vm3, %v585_v27, %v595_v5  ;;  %v622_v59 = vadd.f32 %v595_v5, %v557_v21  ;;  %v656_v16 = vrot.slane %v630_v58, 2  ;;  %v5619_v58 = vld [vmem:[%s9424_s1 + $0x324] sm:$0xf]  ;;  %v4895_v5 = vld [vmem:[%s9424_s1 + $0x330] sm:$0xf0] }
  0xeb   : > { %v914_v61 = vpack.c.bf16 %v906_v42, %v902_v10  ;;  %v918_v43 = vpack.c.bf16 %v910_v36, %v910_v36  ;;  %v614_v11 = vadd.f32 %v586_v41, %v549_v29  ;;  %v618_v14 = vadd.f32 %v596_v32, %v6619_v56  ;;  %v4597_v42 = vld [vmem:[%s9424_s1 + $0xc8] sm:$0xf]  ;;  %v5546_v41 = vld [vmem:[%s9424_s1 + $0xd4] sm:$0xf0] }
  0xec   : > { %v647_v52 = vsel %vm641_vm5, %v645_v50, %v646_v8  ;;  %v657_v34 = vsel %vm641_vm5, %v646_v8, %v656_v16  ;;  %v683_v6 = vadd.f32 %v656_v16, %v622_v59  ;;  %v696_v3 = vrot.slane %v6619_v56, 3  ;;  %v797_v56 = vld [vmem:[#allocation2 + $0xb8] sm:$0x3]  ;;  %v6946_v32 = vld [vmem:[%s9424_s1 + $0x1c8] sm:$0xf] }
  0xed   : > { %v1062_v57 = vshrl.u32 %v914_v61, 16  ;;  %v1065_v2 = vshll.u32 %v914_v61, 16  ;;  %v1070_v30 = vshrl.u32 %v918_v43, 16  ;;  %v1073_v9 = vshll.u32 %v918_v43, 16  ;;  %v563_v59 = vld [vmem:[#allocation2 + $0xe8] sm:$0xc0] }
  0xee   : > { %1914 = vmatpush.bf16.msra.mxu2 %v4854_v20  ;;  %v675_v28 = vadd.f32 %v647_v52, %v614_v11  ;;  %v679_v63 = vadd.f32 %v657_v34, %v618_v14  ;;  %v701_v1 = vrot.slane %v6744_v7, 3  ;;  %v749_v25 = vrot.slane %v732_v39, 4  ;;  %v6953_v14 = vld [vmem:[%s9424_s1 + $0x1d4] sm:$0xf0]  ;;  %v4821_v39 = vld [vmem:[%s9424_s1 + $0x288] sm:$0xf] }
  0xef   : > { %v1064_v45 = vrot.slane %v1062_v57, 2  ;;  %v1067_v62 = vrot.slane %v1065_v2, 3  ;;  %v1072_v48 = vrot.slane %v1070_v30, 2  ;;  %v1075_v23 = vrot.slane %v1073_v9, 3  ;;  %v5615_v57 = vld [vmem:[%s9424_s1 + $0x304] sm:$0xf] }
  0xf0   : > { %v702_v44 = vsel %vm694_vm4, %v696_v3, %v701_v1  ;;  %v720_v35 = vadd.f32 %v696_v3, %v675_v28  ;;  %v728_v47 = vadd.f32 %v701_v1, %v683_v6  ;;  %v754_v20 = vrot.slane %v6744_v7, 4  ;;  %v4879_v2 = vld [vmem:[%s9424_s1 + $0x310] sm:$0xf0]  ;;  %v567_v1 = vld [vmem:[#allocation2 + $0x88] sm:$0x3f] }
  0xf1   : > { %v1068_v13 = vor.u32 %v1067_v62, %v1064_v45  ;;  %v1076_v55 = vor.u32 %v1075_v23, %v1072_v48  ;;  %v724_v19 = vadd.f32 %v702_v44, %v679_v63  ;;  %v762_v54 = vrot.slane %v736_v31, 4  ;;  %v628_v31 = vld [vmem:[#allocation2 + $0xe8] sm:$0x80]  ;;  %v632_v48 = vld [vmem:[#allocation2 + $0x88] sm:$0x7f] }
  0xf2   : > { %v755_v26 = vsel %vm747_vm6, %v749_v25, %v754_v20  ;;  %v781_v18 = vadd.f32 %v749_v25, %v720_v35  ;;  %v810_v38 = vrot.slane %v793_v33, 5  ;;  %v815_v24 = vrot.slane %v6744_v7, 5 }
  0xf3   : > { %v6929_v17 = vsel %vm1060_vm9, %v1068_v13, %v1076_v55  ;;  %v763_v10 = vsel %vm747_vm6, %v754_v20, %v762_v54  ;;  %v785_v29 = vadd.f32 %v755_v26, %v724_v19  ;;  %v823_v27 = vrot.slane %v797_v56, 5 }
  0xf4   : > { %1781 = vmatmul.bf16.vlgmr.msra.gmra.mxu0 %v6929_v17  ;;  %v789_v36 = vadd.f32 %v763_v10, %v728_v47  ;;  %v816_v21 = vsel %vm808_vm7, %v810_v38, %v815_v24  ;;  %v842_v50 = vadd.f32 %v810_v38, %v781_v18  ;;  %v871_v8 = vrot.slane %v854_v60, 6  ;;  %v551_v60 = vld [vmem:[#allocation2 + $0xe8] sm:$0xe0] }
  0xf5   : > { %v824_v16 = vsel %vm808_vm7, %v815_v24, %v823_v27  ;;  %v846_v61 = vadd.f32 %v816_v21, %v785_v29  ;;  %v876_v43 = vrot.slane %v6744_v7, 6  ;;  %v884_v11 = vrot.slane %v858_v40, 6  ;;  %v5602_v7 = vld [vmem:[%s9424_s1 + $0x294] sm:$0xf0]  ;;  %v559_v24 = vld [vmem:[#allocation2 + $0x88] sm:$0x1f] }
  0xf6   : > { %v850_v52 = vadd.f32 %v824_v16, %v789_v36  ;;  %v903_v34 = vadd.f32 %v871_v8, %v842_v50  ;;  %v4614_v6 = vor.u32 %v5550_v49, %v4613_v12  ;;  %v4742_v3 = vor.u32 %v6915_v51, %v6910_v15  ;;  %v734_v36 = vld [vmem:[#allocation2 + $0x28] sm:$0xfe]  ;;  %v5574_v15 = vld [vmem:[%s9424_s1 + $0x1b4] sm:$0xf0] }
  0xf7   : > { %v877_v30 = vsel %vm869_vm8, %v871_v8, %v876_v43  ;;  %v885_v9 = vsel %vm869_vm8, %v876_v43, %v884_v11  ;;  %v4838_v28 = vor.u32 %v5606_v0, %v4837_v37  ;;  %v4898_v63 = vor.u32 %v5619_v58, %v4895_v5  ;;  %v795_v16 = vld [vmem:[#allocation2 + $0x28] sm:$0xfc]  ;;  %v5598_v51 = vld [vmem:[%s9424_s1 + $0x274] sm:$0xf0] }
  0xf8   : > { %v907_v25 = vadd.f32 %v877_v30, %v846_v61  ;;  %v911_v33 = vadd.f32 %v885_v9, %v850_v52  ;;  %1885 = vmatpush.bf16.msra.mxu0 %v4614_v6  ;;  %v4598_v45 = vor.u32 %v5546_v41, %v4597_v42  ;;  %v4726_v62 = vor.u32 %v6953_v14, %v6946_v32  ;;  %v799_v52 = vld [vmem:[#allocation2 + $0xa0] sm:$0x3]  ;;  %v5570_v32 = vld [vmem:[%s9424_s1 + $0x194] sm:$0xf0]  ;;  %v4549_v14 = vld [vmem:[%s9424_s1 + $0x68] sm:$0xf] }
  0xf9   : > { %1915 = vmatpush.bf16.msra.mxu2 %v4838_v28  ;;  %1877 = vmatpush.bf16.msrb.mxu3 %v4898_v63  ;;  %v4822_v23 = vor.u32 %v5602_v7, %v4821_v39  ;;  %v4882_v56 = vor.u32 %v5615_v57, %v4879_v2  ;;  %v590_v44 = vrot.slane %v563_v59, 1  ;;  %v591_v35 = vrot.slane %v6823_v4, 1  ;;  %v738_v59 = vld [vmem:[#allocation2 + $0xa0] sm:$0x1]  ;;  %v856_v2 = vld [vmem:[#allocation2 + $0x28] sm:$0xf8] }
  0xfa   : > { %v915_v47 = vpack.c.bf16 %v907_v25, %v903_v34  ;;  %v919_v20 = vpack.c.bf16 %v911_v33, %v911_v33  ;;  %v599_v40 = vrot.slane %v567_v1, 1  ;;  %v651_v13 = vrot.slane %v628_v31, 2  ;;  %1865 = vmatmul.bf16.vlgmr.msrb.gmra.mxu2 %v6879_v22  ;;  %v860_v33 = vld [vmem:[#allocation2 + $0xa0] sm:$0x7] }
  0xfb   : > { %v592_v55 = vsel %vm580_vm3, %v590_v44, %v591_v35  ;;  %v652_v19 = vrot.slane %v6823_v4, 2  ;;  %v660_v54 = vrot.slane %v632_v48, 2  ;;  %v698_v12 = vrot.slane %v6823_v4, 3 }
  0xfc   : > { %v1079_v49 = vshrl.u32 %v915_v47, 16  ;;  %v1082_v26 = vshll.u32 %v915_v47, 16  ;;  %v1087_v18 = vshrl.u32 %v919_v20, 16  ;;  %v1090_v38 = vshll.u32 %v919_v20, 16  ;;  %1886 = vmatpush.bf16.msra.mxu0 %v4598_v45  ;;  %v4581_v45 = vld [vmem:[%s9424_s1 + $0xa8] sm:$0xf] }
  0xfd   : > { %1916 = vmatpush.bf16.msra.mxu2 %v4822_v23  ;;  %1878 = vmatpush.bf16.msrb.mxu3 %v4882_v56  ;;  %v600_v37 = vsel %vm580_vm3, %v591_v35, %v599_v40  ;;  %v616_v0 = vadd.f32 %v592_v55, %v551_v60  ;;  %v624_v58 = vadd.f32 %v599_v40, %v559_v24  ;;  %v705_v10 = vrot.slane %v6820_v53, 3  ;;  %v5542_v35 = vld [vmem:[%s9424_s1 + $0xb4] sm:$0xf0]  ;;  %v4709_v47 = vld [vmem:[%s9424_s1 + $0x1a8] sm:$0xf] }
  0xfe   : > { %v1081_v29 = vrot.slane %v1079_v49, 2  ;;  %v1084_v27 = vrot.slane %v1082_v26, 3  ;;  %v1089_v5 = vrot.slane %v1087_v18, 2  ;;  %v1092_v42 = vrot.slane %v1090_v38, 3  ;;  %v4789_v18 = vld [vmem:[%s9424_s1 + $0x248] sm:$0xf] }
  0xff   : > { %v620_v21 = vadd.f32 %v600_v37, %v6823_v4  ;;  %v653_v50 = vsel %vm641_vm5, %v651_v13, %v652_v19  ;;  %v661_v8 = vsel %vm641_vm5, %v652_v19, %v660_v54  ;;  %v685_v41 = vadd.f32 %v660_v54, %v624_v58  ;;  %v4565_v19 = vld [vmem:[%s9424_s1 + $0x88] sm:$0xf]  ;;  %v5538_v54 = vld [vmem:[%s9424_s1 + $0x94] sm:$0xf0] }
 0x100   : > { %v1085_v61 = vor.u32 %v1084_v27, %v1081_v29  ;;  %v1093_v43 = vor.u32 %v1092_v42, %v1089_v5  ;;  %v677_v11 = vadd.f32 %v653_v50, %v616_v0  ;;  %v706_v39 = vsel %vm694_vm4, %v698_v12, %v705_v10  ;;  %v5594_v38 = vld [vmem:[%s9424_s1 + $0x254] sm:$0xf0] }
 0x101   : > { %v681_v34 = vadd.f32 %v661_v8, %v620_v21  ;;  %v730_v6 = vadd.f32 %v705_v10, %v685_v41  ;;  %v751_v7 = vrot.slane %v734_v36, 4  ;;  %v758_v57 = vrot.slane %v6820_v53, 4  ;;  %v4693_v10 = vld [vmem:[%s9424_s1 + $0x188] sm:$0xf]  ;;  %v5590_v41 = vld [vmem:[%s9424_s1 + $0x234] sm:$0xf0] }
 0x102   : > { %v6986_v4 = vsel %vm1060_vm9, %v1085_v61, %v1093_v43  ;;  %v722_v30 = vadd.f32 %v698_v12, %v677_v11  ;;  %v766_v9 = vrot.slane %v738_v59, 4  ;;  %v812_v28 = vrot.slane %v795_v16, 5  ;;  %v4773_v8 = vld [vmem:[%s9424_s1 + $0x228] sm:$0xf]  ;;  %v5646_v16 = vld [vmem:[%s9424_s1 + $0x3f4] sm:$0xf0] }
 0x103   : > { %1795 = vmatmul.bf16.vlgmr.msra.gmra.mxu1 %v6986_v4  ;;  %v726_v63 = vadd.f32 %v706_v39, %v681_v34  ;;  %v759_v1 = vsel %vm747_vm6, %v751_v7, %v758_v57  ;;  %v819_v31 = vrot.slane %v6820_v53, 5  ;;  %v827_v25 = vrot.slane %v799_v52, 5  ;;  %v4997_v59 = vld [vmem:[%s9424_s1 + $0x3e8] sm:$0xf] }
 0x104   : > { %1899 = vmatpush.bf16.msra.mxu1 %v4742_v3  ;;  %v767_v48 = vsel %vm747_vm6, %v758_v57, %v766_v9  ;;  %v783_v23 = vadd.f32 %v751_v7, %v722_v30  ;;  %v873_v56 = vrot.slane %v856_v2, 6  ;;  %v880_v44 = vrot.slane %v6820_v53, 6  ;;  %1837 = vmatmul.bf16.vlgmr.msrb.gmra.mxu0 %v6929_v17  ;;  %v4805_v53 = vld [vmem:[%s9424_s1 + $0x268] sm:$0xf]  ;;  %v5566_v7 = vld [vmem:[%s9424_s1 + $0x174] sm:$0xf0] }
 0x105   : > { %v787_v20 = vadd.f32 %v759_v1, %v726_v63  ;;  %v791_v60 = vadd.f32 %v767_v48, %v730_v6  ;;  %v820_v3 = vsel %vm808_vm7, %v812_v28, %v819_v31  ;;  %v828_v40 = vsel %vm808_vm7, %v819_v31, %v827_v25  ;;  %v4677_v11 = vld [vmem:[%s9424_s1 + $0x168] sm:$0xf]  ;;  %v5530_v30 = vld [vmem:[%s9424_s1 + $0x54] sm:$0xf0]  ;;  %v4871_v48 = vld [vmem:[%s9424_s1 + $0x2f8] sm:$0xf0] }
 0x106   : > { %v844_v13 = vadd.f32 %v812_v28, %v783_v23  ;;  %v888_v55 = vrot.slane %v860_v33, 6  ;;  %v4582_v26 = vor.u32 %v5542_v35, %v4581_v45  ;;  %v881_v24 = vsel %vm869_vm8, %v873_v56, %v880_v44  ;;  %v4533_v2 = vld [vmem:[%s9424_s1 + $0x48] sm:$0xf]  ;;  %v5586_v25 = vld [vmem:[%s9424_s1 + $0x214] sm:$0xf0] }
 0x107   : > { %v848_v12 = vadd.f32 %v820_v3, %v787_v20  ;;  %v852_v49 = vadd.f32 %v828_v40, %v791_v60  ;;  %v4710_v0 = vor.u32 %v5574_v15, %v4709_v47  ;;  %v4806_v58 = vor.u32 %v5598_v51, %v4805_v53  ;;  %v4757_v9 = vld [vmem:[%s9424_s1 + $0x208] sm:$0xf]  ;;  %v5612_v45 = vld [vmem:[%s9424_s1 + $0x2ec] sm:$0xf]  ;;  %v5562_v60 = vld [vmem:[%s9424_s1 + $0x154] sm:$0xf0] }
 0x108   : > { %1900 = vmatpush.bf16.msra.mxu1 %v4726_v62  ;;  %v889_v37 = vsel %vm869_vm8, %v880_v44, %v888_v55  ;;  %v905_v29 = vadd.f32 %v873_v56, %v844_v13  ;;  %1887 = vmatpush.bf16.msra.mxu0 %v4582_v26  ;;  %v4566_v42 = vor.u32 %v5538_v54, %v4565_v19  ;;  %v5534_v62 = vld [vmem:[%s9424_s1 + $0x74] sm:$0xf0]  ;;  %v4981_v35 = vld [vmem:[%s9424_s1 + $0x3c8] sm:$0xf]  ;;  %v5608_v19 = vld [vmem:[%s9424_s1 + $0x2cc] sm:$0xf] }
 0x109   : > { %v909_v27 = vadd.f32 %v881_v24, %v848_v12  ;;  %v913_v5 = vadd.f32 %v889_v37, %v852_v49  ;;  %1917 = vmatpush.bf16.msra.mxu2 %v4806_v58  ;;  %v4790_v36 = vor.u32 %v5594_v38, %v4789_v18  ;;  %v4694_v61 = vor.u32 %v5570_v32, %v4693_v10  ;;  %v4661_v20 = vld [vmem:[%s9424_s1 + $0x148] sm:$0xf]  ;;  %v5642_v15 = vld [vmem:[%s9424_s1 + $0x3d4] sm:$0xf0]  ;;  %v4855_v54 = vld [vmem:[%s9424_s1 + $0x2d8] sm:$0xf0] }
 0x10a   : > { %v4550_v43 = vor.u32 %v5534_v62, %v4549_v14  ;;  %v4774_v57 = vor.u32 %v5590_v41, %v4773_v8  ;;  %v4678_v33 = vor.u32 %v5566_v7, %v4677_v11  ;;  %v4998_v44 = vor.u32 %v5646_v16, %v4997_v59  ;;  %v4517_v51 = vld [vmem:[%s9424_s1 + $0x28] sm:$0xf]  ;;  %v5526_v3 = vld [vmem:[%s9424_s1 + $0x34] sm:$0xf0]  ;;  %v5548_v10 = vld [vmem:[%s9424_s1 + $0xec] sm:$0xf] }
 0x10b   : > { %v917_v21 = vpack.c.bf16 %v909_v27, %v905_v29  ;;  %v921_v50 = vpack.c.bf16 %v913_v5, %v913_v5  ;;  %v4534_v47 = vor.u32 %v5530_v30, %v4533_v2  ;;  %v4758_v53 = vor.u32 %v5586_v25, %v4757_v9  ;;  %v4965_v49 = vld [vmem:[%s9424_s1 + $0x3a8] sm:$0xf]  ;;  %v5558_v38 = vld [vmem:[%s9424_s1 + $0x134] sm:$0xf0]  ;;  %v4615_v29 = vld [vmem:[%s9424_s1 + $0xf8] sm:$0xf0] }
 0x10c   : > { %1901 = vmatpush.bf16.msra.mxu1 %v4710_v0  ;;  %1888 = vmatpush.bf16.msra.mxu0 %v4566_v42  ;;  %v4874_v13 = vor.u32 %v5612_v45, %v4871_v48  ;;  %v4662_v55 = vor.u32 %v5562_v60, %v4661_v20  ;;  %v4982_v12 = vor.u32 %v5642_v15, %v4981_v35  ;;  %v4645_v18 = vld [vmem:[%s9424_s1 + $0x128] sm:$0xf]  ;;  %v5638_v24 = vld [vmem:[%s9424_s1 + $0x3b4] sm:$0xf0]  ;;  %v5604_v5 = vld [vmem:[%s9424_s1 + $0x2ac] sm:$0xf] }
 0x10d   : > { %v1113_v39 = vshrl.u32 %v917_v21, 16  ;;  %v1116_v52 = vshll.u32 %v917_v21, 16  ;;  %v1121_v34 = vshrl.u32 %v921_v50, 16  ;;  %v1124_v6 = vshll.u32 %v921_v50, 16  ;;  %1918 = vmatpush.bf16.msra.mxu2 %v4790_v36  ;;  %v4501_v37 = vld [vmem:[%s9424_s1 + $0x8] sm:$0xf] }
 0x10e   : > { %v4518_v26 = vor.u32 %v5526_v3, %v4517_v51  ;;  %v5522_v0 = vld [vmem:[%s9424_s1 + $0x14] sm:$0xf0]  ;;  %v4858_v58 = vor.u32 %v5608_v19, %v4855_v54  ;;  %v4646_v27 = vor.u32 %v5558_v38, %v4645_v18  ;;  %v4839_v42 = vld [vmem:[%s9424_s1 + $0x2b8] sm:$0xf0]  ;;  %v4966_v32 = vor.u32 %v5638_v24, %v4965_v49  ;;  %v4949_v14 = vld [vmem:[%s9424_s1 + $0x388] sm:$0xf] }
 0x10f   : > { %v1115_v28 = vrot.slane %v1113_v39, 2  ;;  %v1118_v63 = vrot.slane %v1116_v52, 3  ;;  %v1123_v1 = vrot.slane %v1121_v34, 2  ;;  %v1126_v31 = vrot.slane %v1124_v6, 3  ;;  %v4629_v36 = vld [vmem:[%s9424_s1 + $0x108] sm:$0xf] }
 0x110   : > { %1902 = vmatpush.bf16.msra.mxu1 %v4694_v61  ;;  %1889 = vmatpush.bf16.msra.mxu0 %v4550_v43  ;;  %v4502_v62 = vor.u32 %v5522_v0, %v4501_v37  ;;  %v5554_v21 = vld [vmem:[%s9424_s1 + $0x114] sm:$0xf0]  ;;  %v4618_v8 = vor.u32 %v5548_v10, %v4615_v29  ;;  %v5580_v41 = vld [vmem:[%s9424_s1 + $0x1ec] sm:$0xf]  ;;  %v4743_v59 = vld [vmem:[%s9424_s1 + $0x1f8] sm:$0xf0]  ;;  %v4842_v16 = vor.u32 %v5604_v5, %v4839_v42 }
 0x111   : > { %v1119_v23 = vor.u32 %v1118_v63, %v1115_v28  ;;  %v1127_v56 = vor.u32 %v1126_v31, %v1123_v1  ;;  %1919 = vmatpush.bf16.msra.mxu2 %v4774_v57  ;;  %v5634_v50 = vld [vmem:[%s9424_s1 + $0x394] sm:$0xf0]  ;;  %v5544_v61 = vld [vmem:[%s9424_s1 + $0xcc] sm:$0xf]  ;;  %v4599_v43 = vld [vmem:[%s9424_s1 + $0xd8] sm:$0xf0]  ;;  %v4630_v11 = vor.u32 %v5554_v21, %v4629_v36  ;;  %v4746_v7 = vor.u32 %v5580_v41, %v4743_v59 }
 0x112   : > { %v5600_v39 = vld [vmem:[%s9424_s1 + $0x28c] sm:$0xf]  ;;  %v4823_v52 = vld [vmem:[%s9424_s1 + $0x298] sm:$0xf0]  ;;  %v4950_v34 = vor.u32 %v5634_v50, %v4949_v14  ;;  %v4933_v6 = vld [vmem:[%s9424_s1 + $0x368] sm:$0xf]  ;;  %v4602_v2 = vor.u32 %v5544_v61, %v4599_v43 }
 0x113   : > { %v7101_v40 = vsel %vm1060_vm9, %v1119_v23, %v1127_v56  ;;  %1851 = vmatmul.bf16.vlgmr.msrb.gmra.mxu1 %v6986_v4  ;;  %v5630_v57 = vld [vmem:[%s9424_s1 + $0x374] sm:$0xf0]  ;;  %v5576_v30 = vld [vmem:[%s9424_s1 + $0x1cc] sm:$0xf]  ;;  %v4727_v9 = vld [vmem:[%s9424_s1 + $0x1d8] sm:$0xf0]  ;;  %v4826_v28 = vor.u32 %v5600_v39, %v4823_v52 }
 0x114   : > { %1823 = vmatmul.bf16.vlgmr.msra.gmra.mxu3 %v7101_v40  ;;  %1903 = vmatpush.bf16.msra.mxu1 %v4678_v33  ;;  %v5540_v63 = vld [vmem:[%s9424_s1 + $0xac] sm:$0xf]  ;;  %v4583_v1 = vld [vmem:[%s9424_s1 + $0xb8] sm:$0xf0]  ;;  %v4934_v33 = vor.u32 %v5630_v57, %v4933_v6  ;;  %v4917_v45 = vld [vmem:[%s9424_s1 + $0x348] sm:$0xf]  ;;  %v4730_v48 = vor.u32 %v5576_v30, %v4727_v9 }
 0x115   : > { %1927 = vmatpush.bf16.msra.mxu3 %v4998_v44  ;;  %1890 = vmatpush.bf16.msra.mxu0 %v4534_v47  ;;  %v5596_v31 = vld [vmem:[%s9424_s1 + $0x26c] sm:$0xf]  ;;  %v4807_v25 = vld [vmem:[%s9424_s1 + $0x278] sm:$0xf0]  ;;  %v5626_v23 = vld [vmem:[%s9424_s1 + $0x354] sm:$0xf0]  ;;  %v4586_v56 = vor.u32 %v5540_v63, %v4583_v1 }
 0x116   : > { %1920 = vmatpush.bf16.msra.mxu2 %v4758_v53  ;;  %v5572_v44 = vld [vmem:[%s9424_s1 + $0x1ac] sm:$0xf]  ;;  %v4711_v35 = vld [vmem:[%s9424_s1 + $0x1b8] sm:$0xf0]  ;;  %v4810_v47 = vor.u32 %v5596_v31, %v4807_v25  ;;  %v4918_v51 = vor.u32 %v5626_v23, %v4917_v45  ;;  %v4901_v3 = vld [vmem:[%s9424_s1 + $0x328] sm:$0xf] }
 0x117   : > { %v5536_v20 = vld [vmem:[%s9424_s1 + $0x8c] sm:$0xf]  ;;  %v4567_v60 = vld [vmem:[%s9424_s1 + $0x98] sm:$0xf0]  ;;  %v4885_v0 = vld [vmem:[%s9424_s1 + $0x308] sm:$0xf] }
 0x118   : > { %1904 = vmatpush.bf16.msra.mxu1 %v4662_v55  ;;  %v5592_v15 = vld [vmem:[%s9424_s1 + $0x24c] sm:$0xf]  ;;  %v4791_v53 = vld [vmem:[%s9424_s1 + $0x258] sm:$0xf0]  ;;  %v5622_v55 = vld [vmem:[%s9424_s1 + $0x334] sm:$0xf0]  ;;  %v4570_v19 = vor.u32 %v5536_v20, %v4567_v60 }
 0x119   : > { %1928 = vmatpush.bf16.msra.mxu3 %v4982_v12  ;;  %1891 = vmatpush.bf16.msra.mxu0 %v4518_v26  ;;  %v5568_v54 = vld [vmem:[%s9424_s1 + $0x18c] sm:$0xf]  ;;  %v4695_v12 = vld [vmem:[%s9424_s1 + $0x198] sm:$0xf0]  ;;  %v4794_v49 = vor.u32 %v5592_v15, %v4791_v53  ;;  %v4902_v37 = vor.u32 %v5622_v55, %v4901_v3 }
 0x11a   : > { %1969 = vmatpush.bf16.msrb.mxu2 %v4874_v13  ;;  %v4714_v13 = vor.u32 %v5572_v44, %v4711_v35  ;;  %v5532_v26 = vld [vmem:[%s9424_s1 + $0x6c] sm:$0xf]  ;;  %v4551_v18 = vld [vmem:[%s9424_s1 + $0x78] sm:$0xf0]  ;;  %v4698_v10 = vor.u32 %v5568_v54, %v4695_v12  ;;  %v7357_v12 = vld [vmem:[%s9425_s2] sm:$0xf] }
 0x11b   : > { %1921 = vmatmul.bf16.vlgmr.msra.gmra.mxu2 %v6879_v22  ;;  %v5588_v38 = vld [vmem:[%s9424_s1 + $0x22c] sm:$0xf]  ;;  %v4775_v24 = vld [vmem:[%s9424_s1 + $0x238] sm:$0xf0] }
 0x11c   : > { %1905 = vmatpush.bf16.msra.mxu1 %v4646_v27  ;;  %v5644_v29 = vld [vmem:[%s9424_s1 + $0x3ec] sm:$0xf]  ;;  %v4554_v27 = vor.u32 %v5532_v26, %v4551_v18  ;;  %v4679_v42 = vld [vmem:[%s9424_s1 + $0x178] sm:$0xf0]  ;;  %v4778_v14 = vor.u32 %v5588_v38, %v4775_v24  ;;  %v1052_v18 = vperm.slane %v7357_v12, 0 }
 0x11d   : > { %1929 = vmatpush.bf16.msra.mxu3 %v4966_v32  ;;  %1892 = vmatpush.bf16.msra.mxu0 %v4502_v62  ;;  %v5564_v5 = vld [vmem:[%s9424_s1 + $0x16c] sm:$0xf]  ;;  %v4999_v32 = vld [vmem:[%s9424_s1 + $0x3f8] sm:$0xf0] }
 0x11e   : > { %1970 = vmatpush.bf16.msrb.mxu2 %v4858_v58  ;;  %v5618_v58 = vld [vmem:[%s9424_s1 + $0x314] sm:$0xf0]  ;;  %v5528_v62 = vld [vmem:[%s9424_s1 + $0x4c] sm:$0xf]  ;;  %v4535_v36 = vld [vmem:[%s9424_s1 + $0x58] sm:$0xf0]  ;;  %v4682_v41 = vor.u32 %v5564_v5, %v4679_v42  ;;  %v5002_v59 = vor.u32 %v5644_v29, %v4999_v32 }
 0x11f   : > { %v5584_v21 = vld [vmem:[%s9424_s1 + $0x20c] sm:$0xf]  ;;  %v4759_v50 = vld [vmem:[%s9424_s1 + $0x218] sm:$0xf0] }
 0x120   : > { %1906 = vmatpush.bf16.msra.mxu1 %v4630_v11  ;;  %1893 = vmatmul.bf16.vlgmr.msra.gmra.mxu0 %v6929_v17  ;;  %v5560_v61 = vld [vmem:[%s9424_s1 + $0x14c] sm:$0xf]  ;;  %v4663_v43 = vld [vmem:[%s9424_s1 + $0x158] sm:$0xf0]  ;;  %v4762_v52 = vor.u32 %v5584_v21, %v4759_v50 }
 0x121   : > { %1941 = vmatpush.bf16.msrb.mxu0 %v4618_v8  ;;  %1930 = vmatpush.bf16.msra.mxu3 %v4950_v34  ;;  %v4886_v8 = vor.u32 %v5618_v58, %v4885_v0  ;;  %v5640_v11 = vld [vmem:[%s9424_s1 + $0x3cc] sm:$0xf]  ;;  %v4983_v39 = vld [vmem:[%s9424_s1 + $0x3d8] sm:$0xf0] }
 0x122   : > { %1971 = vmatpush.bf16.msrb.mxu2 %v4842_v16  ;;  %v4538_v16 = vor.u32 %v5528_v62, %v4535_v36  ;;  %v5524_v34 = vld [vmem:[%s9424_s1 + $0x2c] sm:$0xf]  ;;  %v4519_v6 = vld [vmem:[%s9424_s1 + $0x38] sm:$0xf0]  ;;  %v4986_v57 = vor.u32 %v5640_v11, %v4983_v39  ;;  %v1053_v36 = vperm.slane %v7357_v12, 1 }
 0x123   : > { %1907 = vmatmul.bf16.vlgmr.msra.gmra.mxu1 %v6986_v4  ;;  %v4647_v30 = vld [vmem:[%s9424_s1 + $0x138] sm:$0xf0]  ;;  %v5636_v9 = vld [vmem:[%s9424_s1 + $0x3ac] sm:$0xf]  ;;  %v4522_v63 = vor.u32 %v5524_v34, %v4519_v6 }
 0x124   : > { %1955 = vmatpush.bf16.msrb.mxu1 %v4746_v7  ;;  %1879 = vmatmul.bf16.vlgmr.msrb.gmra.mxu3 %v7101_v40  ;;  %v4666_v7 = vor.u32 %v5560_v61, %v4663_v43  ;;  %v5520_v1 = vld [vmem:[%s9424_s1 + $0xc] sm:$0xf]  ;;  %v4503_v31 = vld [vmem:[%s9424_s1 + $0x18] sm:$0xf0] }
 0x125   : > { %1942 = vmatpush.bf16.msrb.mxu0 %v4602_v2  ;;  %1931 = vmatpush.bf16.msra.mxu3 %v4934_v33  ;;  %v5556_v2 = vld [vmem:[%s9424_s1 + $0x12c] sm:$0xf]  ;;  %v4506_v44 = vor.u32 %v5520_v1, %v4503_v31  ;;  %v4935_v20 = vld [vmem:[%s9424_s1 + $0x378] sm:$0xf0] }
 0x126   : > { %1972 = vmatpush.bf16.msrb.mxu2 %v4826_v28  ;;  %v4967_v28 = vld [vmem:[%s9424_s1 + $0x3b8] sm:$0xf0]  ;;  %v4650_v25 = vor.u32 %v5556_v2, %v4647_v30  ;;  %v5552_v45 = vld [vmem:[%s9424_s1 + $0x10c] sm:$0xf] }
 0x127   : > { %v4970_v33 = vor.u32 %v5636_v9, %v4967_v28  ;;  %v5632_v23 = vld [vmem:[%s9424_s1 + $0x38c] sm:$0xf]  ;;  %v4919_v53 = vld [vmem:[%s9424_s1 + $0x358] sm:$0xf0] }
 0x128   : > { %1956 = vmatpush.bf16.msrb.mxu1 %v4730_v48  ;;  %v4631_v48 = vld [vmem:[%s9424_s1 + $0x118] sm:$0xf0]  ;;  %v5624_v15 = vld [vmem:[%s9424_s1 + $0x34c] sm:$0xf] }
 0x129   : > { %1943 = vmatpush.bf16.msrb.mxu0 %v4586_v56  ;;  %1932 = vmatpush.bf16.msra.mxu3 %v4918_v51  ;;  %v4951_v56 = vld [vmem:[%s9424_s1 + $0x398] sm:$0xf0]  ;;  %v4922_v51 = vor.u32 %v5624_v15, %v4919_v53  ;;  %v5620_v3 = vld [vmem:[%s9424_s1 + $0x32c] sm:$0xf] }
 0x12a   : > { %1973 = vmatpush.bf16.msrb.mxu2 %v4810_v47  ;;  %v4954_v35 = vor.u32 %v5632_v23, %v4951_v56  ;;  %v5628_v47 = vld [vmem:[%s9424_s1 + $0x36c] sm:$0xf] }
 0x12b   : > { %v4938_v60 = vor.u32 %v5628_v47, %v4935_v20  ;;  %v5616_v55 = vld [vmem:[%s9424_s1 + $0x30c] sm:$0xf] }
 0x12c   : > { %1957 = vmatpush.bf16.msrb.mxu1 %v4714_v13 }
 0x12d   : > { %1944 = vmatpush.bf16.msrb.mxu0 %v4570_v19  ;;  %1933 = vmatpush.bf16.msra.mxu3 %v4902_v37  ;;  %v7360_v37 = vld [vmem:[#allocation2 + $0xd8] sm:$0xff] }
 0x12e   : > { %1974 = vmatpush.bf16.msrb.mxu2 %v4794_v49  ;;  %v7364_v0 = vpack.i.bf16 %v7360_v37, %v7360_v37 }
 0x130   : > { %1958 = vmatpush.bf16.msrb.mxu1 %v4698_v10  ;;  %5818 = vrot.lane.b32.xlu1 %v7364_v0, %s5967_s17 }
 0x131   : > { %1945 = vmatpush.bf16.msrb.mxu0 %v4554_v27  ;;  %1934 = vmatpush.bf16.msra.mxu3 %v4886_v8 }
 0x132   : > { %1975 = vmatpush.bf16.msrb.mxu2 %v4778_v14  ;;  %5828 = vrot.lane.b32.xlu0 %v7364_v0, %s5965_s15 }
 0x133   : > { %5823 = vrot.lane.b32.xlu2 %v7364_v0, %s5967_s17 }
 0x134   : > { %1959 = vmatpush.bf16.msrb.mxu1 %v4682_v41  ;;  %1935 = vmatmul.bf16.vlgmr.msra.gmra.mxu3 %v7101_v40 }
 0x135   : > { %1983 = vmatpush.bf16.msrb.mxu3 %v5002_v59  ;;  %1946 = vmatpush.bf16.msrb.mxu0 %v4538_v16 }
 0x136   : > { %1976 = vmatpush.bf16.msrb.mxu2 %v4762_v52 }
 0x138   : > { %1960 = vmatpush.bf16.msrb.mxu1 %v4666_v7 }
 0x139   : > { %1984 = vmatpush.bf16.msrb.mxu3 %v4986_v57  ;;  %1977 = vmatmul.bf16.vlgmr.msrb.gmra.mxu2 %v6879_v22  ;;  %v4634_v22 = vor.u32 %v5552_v45, %v4631_v48  ;;  %v1054_v45 = vperm.slane %v7357_v12, 2 }
 0x13a   : > { %1947 = vmatpush.bf16.msrb.mxu0 %v4522_v63  ;;  %5833 = vrot.lane.b32.xlu0 %v7364_v0, %s5966_s16 }
 0x13c   : > { %1961 = vmatpush.bf16.msrb.mxu1 %v4650_v25 }
 0x13d   : > { %1985 = vmatpush.bf16.msrb.mxu3 %v4970_v33 }
 0x13e   : > { %1948 = vmatpush.bf16.msrb.mxu0 %v4506_v44 }
 0x140   : > { %1962 = vmatpush.bf16.msrb.mxu1 %v4634_v22 }
 0x141   : > { %1986 = vmatpush.bf16.msrb.mxu3 %v4954_v35  ;;  %1949 = vmatmul.bf16.vlgmr.msrb.gmra.mxu0 %v6929_v17  ;;  %v4903_v17 = vld [vmem:[%s9424_s1 + $0x338] sm:$0xf0] }
 0x142   : > { %v4906_v13 = vor.u32 %v5620_v3, %v4903_v17 }
 0x143   : > { %1963 = vmatmul.bf16.vlgmr.msrb.gmra.mxu1 %v6986_v4  ;;  %v4887_v4 = vld [vmem:[%s9424_s1 + $0x318] sm:$0xf0] }
 0x144   : > { %v4890_v19 = vor.u32 %v5616_v55, %v4887_v4 }
 0x145   : > { %1987 = vmatpush.bf16.msrb.mxu3 %v4938_v60 }
 0x149   : > { %1988 = vmatpush.bf16.msrb.mxu3 %v4922_v51 }
 0x14d   : > { %1989 = vmatpush.bf16.msrb.mxu3 %v4906_v13 }
 0x151   : > { %1990 = vmatpush.bf16.msrb.mxu3 %v4890_v19 }
 0x154   : > { %1991 = vmatmul.bf16.vlgmr.msrb.gmra.mxu3 %v7101_v40 }
 0x16c   : > { %v1810_v26 = vpop.f32.mrf.mxu2 }
 0x171   : > { %v1782_v54 = vpop.f32.mrf.mxu0 }
 0x172   : > { %v1783_v24 = vadd.f32 %v1782_v54, %v1052_v18 }
 0x174   : > { %v1812_v10 = vpop.f32.mrf.mxu2 }
 0x179   : > { %v1784_v38 = vpop.f32.mrf.mxu0 }
 0x17a   : > { %v1785_v27 = vadd.f32 %v1784_v38, %v1052_v18 }
 0x17d   : > { %v1866_v41 = vpop.f32.mrf.mxu2 }
 0x180   : > { %v1796_v49 = vpop.f32.mrf.mxu1 }
 0x181   : > { %v1797_v58 = vadd.f32 %v1796_v49, %v1783_v24  ;;  %v1838_v29 = vpop.f32.mrf.mxu0 }
 0x182   : > { %v1839_v59 = vadd.f32 %v1838_v29, %v1053_v36 }
 0x183   : > { %v1811_v5 = vadd.f32 %v1810_v26, %v1797_v58 }
 0x185   : > { %v1868_v1 = vpop.f32.mrf.mxu2 }
 0x188   : > { %v1798_v40 = vpop.f32.mrf.mxu1 }
 0x189   : > { %v1799_v14 = vadd.f32 %v1798_v40, %v1785_v27  ;;  %v1840_v43 = vpop.f32.mrf.mxu0 }
 0x18a   : > { %v1841_v2 = vadd.f32 %v1840_v43, %v1053_v36 }
 0x18b   : > { %v1813_v16 = vadd.f32 %v1812_v10, %v1799_v14 }
 0x190   : > { %v1852_v21 = vpop.f32.mrf.mxu1 }
 0x191   : > { %v1853_v39 = vadd.f32 %v1852_v21, %v1839_v59 }
 0x193   : > { %v1867_v30 = vadd.f32 %v1866_v41, %v1853_v39  ;;  %v1055_v39 = vperm.slane %v7357_v12, 3 }
 0x197   : > { %v1824_v42 = vpop.f32.mrf.mxu3 }
 0x198   : > { %v1825_v32 = vadd.f32 %v1824_v42, %v1811_v5  ;;  %v1854_v6 = vpop.f32.mrf.mxu1 }
 0x199   : > { %v1855_v25 = vadd.f32 %v1854_v6, %v1841_v2 }
 0x19a   : > { %v1997_v62 = vsub.f32 0.0, %v1825_v32 }
 0x19b   : > { %v1869_v22 = vadd.f32 %v1868_v1, %v1855_v25 }
 0x19c   : > { %v2005_v50 = vmin.f32 %v1997_v62, 80.0 }
 0x19d   : > { %v1894_v31 = vpop.f32.mrf.mxu0 }
 0x19e   : > { %v2013_v8 = vmul.f32 1.442695, %v2005_v50  ;;  %v1895_v44 = vadd.f32 %v1894_v31, %v1054_v45  ;;  %v1922_v17 = vpop.f32.mrf.mxu2 }
 0x19f   : > { %v1826_v61 = vpop.f32.mrf.mxu3 }
 0x1a0   : > { %5857 = vpow2.f32 %v2013_v8  ;;  %v1827_v11 = vadd.f32 %v1826_v61, %v1813_v16  ;;  %v1908_v20 = vpop.f32.mrf.mxu1 }
 0x1a1   : > { %v1909_v51 = vadd.f32 %v1908_v20, %v1895_v44 }
 0x1a2   : > { %v2001_v52 = vsub.f32 0.0, %v1827_v11 }
 0x1a3   : > { %v1923_v54 = vadd.f32 %v1922_v17, %v1909_v51 }
 0x1a4   : > { %v2009_v34 = vmin.f32 %v2001_v52, 80.0 }
 0x1a5   : > { %v1896_v13 = vpop.f32.mrf.mxu0 }
 0x1a6   : > { %v5858_v7 = vpop.eup %5857  ;;  %v2021_v57 = vmul.f32 1.442695, %v2009_v34  ;;  %v1897_v19 = vadd.f32 %v1896_v13, %v1054_v45  ;;  %v1924_v5 = vpop.f32.mrf.mxu2 }
 0x1a7   : > { %v2029_v9 = vadd.f32 1.0, %v5858_v7  ;;  %v1880_v28 = vpop.f32.mrf.mxu3 }
 0x1a8   : > { %5859 = vpow2.f32 %v2021_v57  ;;  %v7375_v63 = vadd.f32 %v1880_v28, %v1867_v30  ;;  %v1910_v40 = vpop.f32.mrf.mxu1 }
 0x1a9   : > { %5861 = vrcp.f32 %v2029_v9  ;;  %v1911_v58 = vadd.f32 %v1910_v40, %v1897_v19 }
 0x1aa   : > { %v1998_v33 = vsub.f32 0.0, %v7375_v63 }
 0x1ab   : > { %v1925_v14 = vadd.f32 %v1924_v5, %v1911_v58  ;;  %v7457_v58 = vpop.permute.xlu0 %5828 }
 0x1ac   : > { %v2006_v48 = vmin.f32 %v1998_v33, 80.0 }
 0x1ae   : > { %v5860_v23 = vpop.eup %5859  ;;  %v2015_v56 = vmul.f32 1.442695, %v2006_v48 }
 0x1af   : > { %v5862_v35 = vpop.eup %5861  ;;  %v2033_v47 = vadd.f32 1.0, %v5860_v23  ;;  %v1882_v60 = vpop.f32.mrf.mxu3 }
 0x1b0   : > { %v7379_v15 = vmul.f32 %v5862_v35, %v1825_v32  ;;  %v1883_v53 = vadd.f32 %v1882_v60, %v1869_v22 }
 0x1b1   : > { %5863 = vrcp.f32 %v2033_v47 }
 0x1b2   : > { %5865 = vpow2.f32 %v2015_v56  ;;  %v2002_v3 = vsub.f32 0.0, %v1883_v53  ;;  %2149 = vrot.lane.b32.xlu1 %v7379_v15, %s5965_s15  ;;  %2093 = vrot.lane.b32.xlu0 %v7379_v15, %s5967_s17 }
 0x1b4   : > { %v2010_v55 = vmin.f32 %v2002_v3, 80.0 }
 0x1b6   : > { %v2023_v4 = vmul.f32 1.442695, %v2010_v55 }
 0x1b7   : > { %v5864_v49 = vpop.eup %5863  ;;  %v1936_v26 = vpop.f32.mrf.mxu3 }
 0x1b8   : > { %v5866_v18 = vpop.eup %5865  ;;  %v7385_v38 = vmul.f32 %v5864_v49, %v1827_v11  ;;  %5867 = vpow2.f32 %v2023_v4  ;;  %v1937_v24 = vadd.f32 %v1936_v26, %v1923_v54 }
 0x1b9   : > { %v2030_v29 = vadd.f32 1.0, %v5866_v18 }
 0x1ba   : > { %v1999_v10 = vsub.f32 0.0, %v1937_v24  ;;  %2151 = vrot.lane.b32.xlu2 %v7385_v38, %s5965_s15  ;;  %2197 = vrot.lane.b32.xlu1 %v7379_v15, %s5966_s16 }
 0x1bb   : > { %5869 = vrcp.f32 %v2030_v29 }
 0x1bc   : > { %v2007_v27 = vmin.f32 %v1999_v10, 80.0  ;;  %v1978_v12 = vpop.f32.mrf.mxu2  ;;  %v5819_v10 = vpop.permute.xlu1 %5818 }
 0x1bd   : > { %v5820_v5 = vunpack.i.l.bf16 %v5819_v10 }
 0x1be   : > { %v5868_v42 = vpop.eup %5867  ;;  %v2017_v32 = vmul.f32 1.442695, %v2007_v27  ;;  %v1950_v61 = vpop.f32.mrf.mxu0 }
 0x1bf   : > { %v2034_v62 = vadd.f32 1.0, %v5868_v42  ;;  %v1938_v36 = vpop.f32.mrf.mxu3  ;;  %v1951_v6 = vadd.f32 %v1950_v61, %v1055_v39  ;;  %v7465_v42 = vld [vmem:[%s9426_s3] sm:$0xff] }
 0x1c0   : > { %5871 = vpow2.f32 %v2017_v32  ;;  %v1939_v21 = vadd.f32 %v1938_v36, %v1925_v14  ;;  %v1964_v7 = vpop.f32.mrf.mxu1  ;;  %v7467_v32 = vpop.permute.xlu0 %5833  ;;  %v7480_v36 = vld [vmem:[%s9426_s3 + $0x10] sm:$0xff]  ;;  %v2267_v61 = vperm.slane %v7465_v42, 5 }
 0x1c1   : > { %5873 = vrcp.f32 %v2034_v62  ;;  %v5870_v41 = vpop.eup %5869  ;;  %v1965_v2 = vadd.f32 %v1964_v7, %v1951_v6  ;;  %v5830_v62 = vunpack.i.l.bf16 %v7457_v58 }
 0x1c2   : > { %v2003_v50 = vsub.f32 0.0, %v1939_v21  ;;  %2199 = vrot.lane.b32.xlu2 %v7385_v38, %s5966_s16  ;;  %2095 = vrot.lane.b32.xlu1 %v7385_v38, %s5967_s17  ;;  %v7397_v52 = vmul.f32 %v5870_v41, %v7375_v63 }
 0x1c3   : > { %v1979_v31 = vadd.f32 %v1978_v12, %v1965_v2  ;;  %v5821_v2 = vunpack.i.h.bf16 %v5819_v10  ;;  %v2173_v12 = vperm.slane %v7465_v42, 2 }
 0x1c4   : > { %v2011_v8 = vmin.f32 %v2003_v50, 80.0  ;;  %v1980_v44 = vpop.f32.mrf.mxu2  ;;  %v2125_v50 = vperm.slane %v7465_v42, 1 }
 0x1c6   : > { %v5872_v59 = vpop.eup %5871  ;;  %v2025_v16 = vmul.f32 1.442695, %v2011_v8  ;;  %v1952_v28 = vpop.f32.mrf.mxu0 }
 0x1c7   : > { %v5874_v43 = vpop.eup %5873  ;;  %v2031_v11 = vadd.f32 1.0, %v5872_v59  ;;  %v1953_v1 = vadd.f32 %v1952_v28, %v1055_v39  ;;  %v7489_v59 = vld [vmem:[%s9426_s3 + $0x20] sm:$0x7]  ;;  %v7504_v28 = vld [vmem:[%s9426_s3 + $0x18] sm:$0xff] }
 0x1c8   : > { %v7399_v34 = vmul.f32 %v5874_v43, %v1883_v53  ;;  %v1966_v45 = vpop.f32.mrf.mxu1  ;;  %v2365_v6 = vperm.slane %v7489_v59, 1 }
 0x1c9   : > { %5875 = vrcp.f32 %v2031_v11  ;;  %v1967_v48 = vadd.f32 %v1966_v45, %v1953_v1  ;;  %v2127_v11 = vperm.slane %v7480_v36, 1 }
 0x1ca   : > { %5877 = vpow2.f32 %v2025_v16  ;;  %2097 = vrot.lane.b32.xlu2 %v7397_v52, %s5967_s17  ;;  %2099 = vrot.lane.b32.xlu0 %v7399_v34, %s5967_s17 }
 0x1cb   : > { %v1981_v35 = vadd.f32 %v1980_v44, %v1967_v48  ;;  %v2221_v44 = vperm.slane %v7465_v42, 3 }
 0x1cf   : > { %v5876_v57 = vpop.eup %5875 }
 0x1d0   : > { %v5878_v30 = vpop.eup %5877  ;;  %v7405_v9 = vmul.f32 %v5876_v57, %v1937_v24  ;;  %v7451_v24 = vpop.permute.xlu2 %5823 }
 0x1d1   : > { %v2035_v63 = vadd.f32 1.0, %v5878_v30  ;;  %v5825_v27 = vunpack.i.l.bf16 %v7451_v24  ;;  %v5826_v57 = vunpack.i.h.bf16 %v7451_v24  ;;  %v2133_v30 = vmul.f32 %v7360_v37, %v2125_v50 }
 0x1d2   : > { %2153 = vrot.lane.b32.xlu2 %v7397_v52, %s5965_s15  ;;  %2157 = vrot.lane.b32.xlu1 %v7405_v9, %s5965_s15  ;;  %v7513_v37 = vmul.f32 %v2127_v11, %v7397_v52 }
 0x1d3   : > { %2155 = vrot.lane.b32.xlu0 %v7399_v34, %s5965_s15  ;;  %5879 = vrcp.f32 %v2035_v63  ;;  %v2111_v14 = vsel %vm473_vm2, %v5820_v5, %v5825_v27  ;;  %v5835_v63 = vunpack.i.l.bf16 %v7467_v32 }
 0x1d7   : > { %v1992_v25 = vpop.f32.mrf.mxu3 }
 0x1d8   : > { %v1993_v33 = vadd.f32 %v1992_v25, %v1979_v31  ;;  %v2271_v31 = vmul.f32 %v2267_v61, %v7379_v15 }
 0x1d9   : > { %v5880_v20 = vpop.eup %5879 }
 0x1da   : > { %v2000_v23 = vsub.f32 0.0, %v1993_v33  ;;  %2201 = vrot.lane.b32.xlu2 %v7397_v52, %s5966_s16  ;;  %2205 = vrot.lane.b32.xlu1 %v7405_v9, %s5966_s16  ;;  %v7419_v51 = vmul.f32 %v5880_v20, %v1939_v21  ;;  %v2113_v21 = vperm.slane %v7465_v42, 0 }
 0x1db   : > { %2203 = vrot.lane.b32.xlu0 %v7399_v34, %s5966_s16 }
 0x1dc   : > { %v2008_v56 = vmin.f32 %v2000_v23, 80.0  ;;  %v2117_v43 = vmul.f32 %v2113_v21, %v2111_v14  ;;  %v7516_v23 = vmul.f32 %v2267_v61, %v7385_v38  ;;  %v9436_v14 = vperm.slane %v7465_v42, 6 }
 0x1de   : > { %v2019_v22 = vmul.f32 1.442695, %v2008_v56  ;;  %v7521_v56 = vld [vmem:[%s9426_s3 + $0x28] sm:$0x7] }
 0x1df   : > { %v1994_v47 = vpop.f32.mrf.mxu3 }
 0x1e0   : > { %5881 = vpow2.f32 %v2019_v22  ;;  %v1995_v60 = vadd.f32 %v1994_v47, %v1981_v35  ;;  %v7528_v22 = vmul.f32 %v2365_v6, %v7397_v52  ;;  %v2128_v35 = vperm.slane %v7504_v28, 1 }
 0x1e1   : > { %v5831_v47 = vunpack.i.h.bf16 %v7457_v58 }
 0x1e2   : > { %v2004_v53 = vsub.f32 0.0, %v1995_v60  ;;  %2159 = vrot.lane.b32.xlu2 %v7419_v51, %s5965_s15  ;;  %2103 = vrot.lane.b32.xlu1 %v7419_v51, %s5967_s17 }
 0x1e3   : > { %2101 = vrot.lane.b32.xlu0 %v7405_v9, %s5967_s17 }
 0x1e4   : > { %v2012_v3 = vmin.f32 %v2004_v53, 80.0 }
 0x1e6   : > { %v5882_v17 = vpop.eup %5881  ;;  %v2027_v13 = vmul.f32 1.442695, %v2012_v3 }
 0x1e7   : > { %v2032_v55 = vadd.f32 1.0, %v5882_v17  ;;  %v5677_v17 = vld [vmem:[%s9430_s7 + $0xec] sm:$0xf0] }
 0x1e8   : > { %5883 = vpow2.f32 %v2027_v13 }
 0x1e9   : > { %5885 = vrcp.f32 %v2032_v55 }
 0x1ea   : > { %2207 = vrot.lane.b32.xlu2 %v7419_v51, %s5966_s16 }
 0x1ee   : > { %v5884_v4 = vpop.eup %5883 }
 0x1ef   : > { %v5886_v19 = vpop.eup %5885  ;;  %v2036_v54 = vadd.f32 1.0, %v5884_v4 }
 0x1f0   : > { %v7429_v49 = vmul.f32 %v5886_v19, %v1993_v33  ;;  %v2137_v33 = vadd.f32 %v2133_v30, %v2117_v43  ;;  %v2366_v19 = vperm.slane %v7521_v56, 1  ;;  %v7565_v43 = vmul.f32 %v2127_v11, %v7399_v34 }
 0x1f1   : > { %5887 = vrcp.f32 %v2036_v54  ;;  %v5836_v54 = vunpack.i.h.bf16 %v7467_v32 }
 0x1f2   : > { %2161 = vrot.lane.b32.xlu0 %v7429_v49, %s5965_s15  ;;  %2241 = vrot.lane.b32.xlu2 %v7429_v49, %s5967_s17 }
 0x1f7   : > { %v5888_v26 = vpop.eup %5887 }
 0x1f8   : > { %v7435_v18 = vmul.f32 %v5888_v26, %v1995_v60  ;;  %v2247_v60 = vperm.slane %v7465_v42, 4 }
 0x1fa   : > { %2163 = vrot.lane.b32.xlu1 %v7435_v18, %s5965_s15  ;;  %2209 = vrot.lane.b32.xlu0 %v7429_v49, %s5966_s16 }
 0x1fb   : > { %5843 = vrot.lane.b32.xlu2 %v7364_v0, %s5966_s16 }
 0x202   : > { %2211 = vrot.lane.b32.xlu1 %v7435_v18, %s5966_s16  ;;  %2243 = vrot.lane.b32.xlu0 %v7435_v18, %s5967_s17 }
 0x20a   : > { %5838 = vrot.lane.b32.xlu1 %v7364_v0, %s5965_s15  ;;  %5848 = vrot.lane.b32.xlu0 %v7364_v0, %s5967_s17 }
 0x212   : > { %5853 = vrot.lane.b32.xlu1 %v7364_v0, %s5965_s15  ;;  %v7472_v0 = vld [vmem:[%s9426_s3 + $0x8] sm:$0xff] }
 0x213   : > { %v2126_v16 = vperm.slane %v7472_v0, 1  ;;  %v2268_v7 = vperm.slane %v7472_v0, 5  ;;  %v2114_v20 = vperm.slane %v7472_v0, 0  ;;  %v2174_v58 = vperm.slane %v7472_v0, 2 }
 0x214   : > { %v7455_v40 = vpop.permute.xlu2 %2151  ;;  %v2248_v11 = vperm.slane %v7472_v0, 4 }
 0x215   : > { %v2130_v1 = vmul.f32 %v2126_v16, %v7379_v15  ;;  %v7510_v25 = vmul.f32 %v2126_v16, %v7385_v38  ;;  %v7525_v15 = vmul.f32 %v2268_v7, %v7397_v52  ;;  %v2112_v38 = vsel %vm473_vm2, %v5821_v2, %v5826_v57  ;;  %v5117_v52 = vld [vmem:[%s9430_s7 + $0xe0] sm:$0xf] }
 0x216   : > { %v5118_v4 = vor.u32 %v5677_v17, %v5117_v52  ;;  %v2121_v5 = vmul.f32 %v2113_v21, %v2112_v38  ;;  %v2172_v50 = vsel %vm407_vm0, %v5831_v47, %v7455_v40  ;;  %v9434_v21 = vperm.slane %v7472_v0, 3 }
 0x217   : > { %v2181_v47 = vmul.f32 %v2173_v12, %v2172_v50 }
 0x218   : > { %4091 = vmatpush.bf16.msra.mxu0 %v5118_v4  ;;  %v2141_v38 = vadd.f32 %v2133_v30, %v2121_v5 }
 0x21a   : > { %v2189_v24 = vadd.f32 %v2181_v47, %v2141_v38 }
 0x21c   : > { %v7459_v29 = vpop.permute.xlu2 %2199 }
 0x21d   : > { %v2220_v2 = vsel %vm436_vm1, %v5836_v54, %v7459_v29 }
 0x21e   : > { %v2229_v4 = vmul.f32 %v2221_v44, %v2220_v2  ;;  %v7622_v2 = vmul.f32 %v2366_v19, %v7405_v9 }
 0x224   : > { %v7484_v8 = vpop.permute.xlu2 %2097  ;;  %v2150_v41 = vpop.permute.xlu1 %2149 }
 0x225   : > { %v2171_v39 = vsel %vm407_vm0, %v5830_v62, %v2150_v41  ;;  %v2094_v48 = vpop.permute.xlu0 %2093 }
 0x226   : > { %v2177_v45 = vmul.f32 %v2173_v12, %v2171_v39  ;;  %v2109_v13 = vsel %vm473_vm2, %v5825_v27, %v2094_v48  ;;  %v2269_v27 = vperm.slane %v7480_v36, 5  ;;  %v7568_v39 = vmul.f32 %v2268_v7, %v7399_v34 }
 0x227   : > { %v2118_v32 = vmul.f32 %v2114_v20, %v2109_v13  ;;  %v2251_v16 = vmul.f32 %v2247_v60, %v2109_v13  ;;  %v2345_v7 = vperm.slane %v7489_v59, 0 }
 0x228   : > { %v2185_v26 = vadd.f32 %v2177_v45, %v2137_v33  ;;  %v9433_v45 = vperm.slane %v7465_v42, 7 }
 0x22c   : > { %v7538_v53 = vpop.permute.xlu2 %2153  ;;  %v2198_v3 = vpop.permute.xlu1 %2197 }
 0x22d   : > { %v2219_v55 = vsel %vm436_vm1, %v5835_v63, %v2198_v3  ;;  %v2169_v62 = vsel %vm407_vm0, %v2150_v41, %v7538_v53  ;;  %v7571_v41 = vmul.f32 %v2365_v6, %v7399_v34  ;;  %v2107_v34 = vsel %vm473_vm2, %v2094_v48, %v7484_v8 }
 0x22e   : > { %v2225_v10 = vmul.f32 %v2221_v44, %v2219_v55  ;;  %v2178_v63 = vmul.f32 %v2174_v58, %v2169_v62  ;;  %v2138_v6 = vadd.f32 %v2130_v1, %v2118_v32  ;;  %v2297_v52 = vmul.f32 %v9436_v14, %v2169_v62  ;;  %v7605_v44 = vld [vmem:[%s9426_s3 + $0x30] sm:$0x7] }
 0x22f   : > { %v7596_v48 = vmul.f32 %v2128_v35, %v7405_v9  ;;  %v2349_v5 = vmul.f32 %v2345_v7, %v2107_v34 }
 0x230   : > { %v2233_v61 = vadd.f32 %v2225_v10, %v2185_v26  ;;  %v2186_v1 = vadd.f32 %v2178_v63, %v2138_v6  ;;  %v7611_v10 = vmul.f32 %v2269_v27, %v7405_v9  ;;  %v2270_v63 = vperm.slane %v7504_v28, 5  ;;  %v5101_v9 = vld [vmem:[%s9430_s7 + $0xc0] sm:$0xf] }
 0x231   : > { %v2175_v6 = vperm.slane %v7480_v36, 2 }
 0x232   : > { %v2259_v33 = vadd.f32 %v2251_v16, %v2233_v61  ;;  %v7616_v16 = vmul.f32 %v2128_v35, %v7419_v51  ;;  %v2367_v61 = vperm.slane %v7605_v44, 1 }
 0x234   : > { %v7586_v17 = vpop.permute.xlu2 %2201  ;;  %v2279_v13 = vadd.f32 %v2271_v31, %v2259_v33  ;;  %v2096_v55 = vpop.permute.xlu1 %2095  ;;  %v2237_v33 = vadd.f32 %v2229_v4, %v2189_v24  ;;  %v5085_v4 = vld [vmem:[%s9430_s7 + $0xa0] sm:$0xf] }
 0x235   : > { %v2217_v30 = vsel %vm436_vm1, %v2198_v3, %v7586_v17  ;;  %v2110_v12 = vsel %vm473_vm2, %v5826_v57, %v2096_v55  ;;  %v2115_v3 = vperm.slane %v7480_v36, 0  ;;  %v2252_v57 = vmul.f32 %v2248_v11, %v2107_v34 }
 0x236   : > { %v2226_v54 = vmul.f32 %v9434_v21, %v2217_v30  ;;  %v2305_v26 = vadd.f32 %v2297_v52, %v2279_v13  ;;  %v2323_v31 = vmul.f32 %v9433_v45, %v2217_v30  ;;  %v2255_v32 = vmul.f32 %v2247_v60, %v2110_v12  ;;  %v7629_v60 = vld [vmem:[%s9427_s4] sm:$0xf]  ;;  %v5673_v13 = vld [vmem:[%s9430_s7 + $0xcc] sm:$0xf0]  ;;  %v2633_v21 = vld [vmem:[#allocation2 + $0x68] sm:$0xc0] }
 0x237   : > { %v2119_v35 = vmul.f32 %v2115_v3, %v2107_v34  ;;  %v2122_v52 = vmul.f32 %v2114_v20, %v2110_v12  ;;  %v7643_v30 = vmul.f32 %v2269_v27, %v7419_v51  ;;  %v7648_v34 = vmul.f32 %v2366_v19, %v7419_v51  ;;  %v5669_v27 = vld [vmem:[%s9430_s7 + $0xac] sm:$0xf0] }
 0x238   : > { %v2234_v62 = vadd.f32 %v2226_v54, %v2186_v1  ;;  %v2331_v50 = vadd.f32 %v2323_v31, %v2305_v26  ;;  %v2263_v20 = vadd.f32 %v2255_v32, %v2237_v33  ;;  %v5102_v26 = vor.u32 %v5673_v13, %v5101_v9  ;;  %v5069_v32 = vld [vmem:[%s9430_s7 + $0x80] sm:$0xf]  ;;  %v5665_v33 = vld [vmem:[%s9430_s7 + $0x8c] sm:$0xf0] }
 0x239   : > { %v9437_v51 = vperm.slane %v7472_v0, 6  ;;  %v9435_v19 = vperm.slane %v7489_v59, 2  ;;  %v7692_v9 = vmul.f32 %v2367_v61, %v7429_v49  ;;  %v7698_v13 = vadd.f32 %v7513_v37, %v2119_v35  ;;  %v7717_v37 = vld [vmem:[%s9430_s7 + $0x4c] sm:$0xf0] }
 0x23a   : > { %v2260_v38 = vadd.f32 %v2252_v57, %v2234_v62  ;;  %v2357_v47 = vadd.f32 %v2349_v5, %v2331_v50  ;;  %4092 = vmatpush.bf16.msra.mxu0 %v5102_v26  ;;  %v5086_v57 = vor.u32 %v5669_v27, %v5085_v4  ;;  %v7673_v62 = vld [vmem:[%s9428_s5] sm:$0xff]  ;;  %v7701_v4 = vadd.f32 %v7510_v25, %v2122_v52  ;;  %v5661_v27 = vld [vmem:[%s9430_s7 + $0x6c] sm:$0xf0]  ;;  %v2473_v52 = vld [vmem:[#allocation2 + $0x68] sm:$0xf0] }
 0x23b   : > { %9450 = vst [vmem:[#allocation4_spill] sm:$0xff] %v7692_v9  ;;  %v7704_v26 = vadd.f32 %v7516_v23, %v2263_v20  ;;  %v7720_v25 = vmul.f32 %v2367_v61, %v7435_v18  ;;  %v7729_v20 = vperm.slane %v7673_v62, 1  ;;  %v5070_v45 = vor.u32 %v5665_v33, %v5069_v32  ;;  %v2713_v33 = vld [vmem:[#allocation2 + $0x68] sm:$0x80] }
 0x23c   : > { %v7650_v12 = vpop.permute.xlu0 %2099  ;;  %v7653_v1 = vadd.f32 %v7525_v15, %v2260_v38  ;;  %v7656_v54 = vadd.f32 %v7528_v22, %v2357_v47  ;;  %v7686_v38 = vld [vmem:[%s9430_s7 + $0x60] sm:$0xf]  ;;  %v7689_v47 = vmul.f32 %v2270_v63, %v7429_v49  ;;  %v7750_v32 = vperm.slane %v7673_v62, 2 }
 0x23d   : > { %v2108_v31 = vsel %vm473_vm2, %v2096_v55, %v7650_v12  ;;  %v7675_v55 = vpop.permute.xlu2 %2159  ;;  %v7712_v49 = vld [vmem:[%s9430_s7 + $0x40] sm:$0xf]  ;;  %9452 = vst [vmem:[#allocation6_spill] sm:$0xff] %v7720_v25  ;;  %v9457_v9 = vperm.slane %v7489_v59, 2 }
 0x23e   : > { %v2123_v50 = vmul.f32 %v2115_v3, %v2108_v31  ;;  %9449 = vst [vmem:[#allocation3_spill] sm:$0xff] %v7689_v47  ;;  %v7695_v3 = vmul.f32 %v2270_v63, %v7435_v18  ;;  %v7724_v23 = vmul.f32 %v2248_v11, %v2108_v31  ;;  %v7733_v5 = vmul.f32 %v2345_v7, %v2108_v31 }
 0x23f   : > { %4093 = vmatpush.bf16.msra.mxu0 %v5086_v57  ;;  %v5054_v63 = vor.u32 %v5661_v27, %v7686_v38  ;;  %v2445_v57 = vld [vmem:[#allocation2 + $0x68] sm:$0xf8]  ;;  %v7747_v18 = vmul.f32 %v7729_v20, %v2473_v52  ;;  %v7758_v27 = vperm.slane %v7673_v62, 3  ;;  %v7761_v31 = vperm.slane %v7673_v62, 4 }
 0x240   : > { %9451 = vst [vmem:[#allocation5_spill] sm:$0xff] %v7695_v3  ;;  %v2143_v11 = vadd.f32 %v7565_v43, %v2123_v50  ;;  %v2553_v38 = vld [vmem:[#allocation2 + $0x68] sm:$0xe0] }
 0x241   : > { %v7786_v25 = vmul.f32 %v7750_v32, %v2553_v38  ;;  %v9455_v38 = vperm.slane %v7629_v60, 0 }
 0x243   : > { %4094 = vmatpush.bf16.msra.mxu0 %v5070_v45 }
 0x244   : > { %v7742_v22 = vpop.permute.xlu1 %2157 }
 0x245   : > { %v2167_v43 = vsel %vm407_vm0, %v7538_v53, %v7742_v22  ;;  %v2156_v50 = vpop.permute.xlu0 %2155  ;;  %v7769_v53 = vperm.slane %v7673_v62, 0  ;;  %v7788_v3 = vpop.permute.xlu2 %2207 }
 0x246   : > { %v2395_v52 = vmul.f32 %v9435_v19, %v2167_v43  ;;  %v2168_v7 = vsel %vm407_vm0, %v2156_v50, %v7675_v55  ;;  %v2179_v35 = vmul.f32 %v2175_v6, %v2167_v43  ;;  %v2298_v15 = vmul.f32 %v9437_v51, %v2167_v43  ;;  %9453 = vst [vmem:[#allocation7_spill] sm:$0xff] %v7788_v3 }
 0x247   : > { %v2170_v19 = vsel %vm407_vm0, %v7455_v40, %v2156_v50  ;;  %v2183_v45 = vmul.f32 %v2175_v6, %v2168_v7  ;;  %v9454_v43 = vperm.slane %v7465_v42, 6  ;;  %v5245_v40 = vld [vmem:[%s9430_s7 + $0x1e0] sm:$0xf]  ;;  %v5709_v6 = vld [vmem:[%s9430_s7 + $0x1ec] sm:$0xf0]  ;;  %v7805_v50 = vmul.f32 %v7758_v27, %v2633_v21  ;;  %4095 = vmatpush.bf16.msra.mxu0 %v5054_v63 }
 0x248   : > { %v2403_v24 = vadd.f32 %v2395_v52, %v7656_v54  ;;  %v2182_v14 = vmul.f32 %v2174_v58, %v2170_v19  ;;  %v5021_v58 = vld [vmem:[%s9430_s7 + $0x20] sm:$0xf]  ;;  %v7802_v54 = vmul.f32 %v7769_v53, %v2445_v57  ;;  %v7820_v47 = vmul.f32 %v9457_v9, %v2168_v7  ;;  %v5653_v21 = vld [vmem:[%s9430_s7 + $0x2c] sm:$0xf0] }
 0x249   : > { %v2301_v51 = vmul.f32 %v9454_v43, %v2170_v19  ;;  %v7808_v19 = vmul.f32 %v7761_v31, %v2713_v33  ;;  %v9456_v43 = vperm.slane %v7472_v0, 6  ;;  %v5246_v57 = vor.u32 %v5709_v6, %v5245_v40  ;;  %v5229_v33 = vld [vmem:[%s9430_s7 + $0x1c0] sm:$0xf] }
 0x24a   : > { %v7812_v52 = vadd.f32 %v9455_v38, %v2403_v24  ;;  %v5705_v24 = vld [vmem:[%s9430_s7 + $0x1cc] sm:$0xf0]  ;;  %v2187_v38 = vadd.f32 %v2179_v35, %v7698_v13  ;;  %v2306_v59 = vadd.f32 %v2298_v15, %v7653_v1  ;;  %v2190_v9 = vadd.f32 %v2182_v14, %v7701_v4 }
 0x24b   : > { %v7816_v61 = vmul.f32 %v9456_v43, %v2168_v7  ;;  %v2191_v63 = vadd.f32 %v2183_v45, %v2143_v11  ;;  %v2309_v7 = vadd.f32 %v2301_v51, %v7704_v26  ;;  %4105 = vmatpush.bf16.msra.mxu1 %v5246_v57  ;;  %v5230_v6 = vor.u32 %v5705_v24, %v5229_v33  ;;  %v5005_v43 = vld [vmem:[%s9430_s7] sm:$0xf]  ;;  %v5649_v13 = vld [vmem:[%s9430_s7 + $0xc] sm:$0xf0] }
 0x24c   : > { %2429 = vst [vmem:[#allocation2 + $0x78] sm:$0xff] %v7812_v52  ;;  %v7836_v40 = vpop.permute.xlu1 %2205  ;;  %v7846_v14 = vmul.f32 %v7729_v20, %v7812_v52  ;;  %v2589_v1 = vrot.slane %v7786_v25, 2  ;;  %v5022_v4 = vor.u32 %v5653_v21, %v5021_v58  ;;  %v7855_v26 = vmul.f32 %v7750_v32, %v7812_v52 }
 0x24d   : > { %9458 = vst [vmem:[#allocation8_spill] sm:$0xff] %v7836_v40  ;;  %v2215_v51 = vsel %vm436_vm1, %v7586_v17, %v7836_v40  ;;  %v2204_v15 = vpop.permute.xlu0 %2203  ;;  %v9459_v11 = vperm.slane %v7480_v36, 3  ;;  %v9460_v57 = vperm.slane %v7472_v0, 7  ;;  %v9461_v58 = vor.u32 %v7717_v37, %v7712_v49 }
 0x24e   : > { %v2216_v25 = vsel %vm436_vm1, %v2204_v15, %v7788_v3  ;;  %v2218_v17 = vsel %vm436_vm1, %v7459_v29, %v2204_v15  ;;  %v9462_v21 = vperm.slane %v7472_v0, 3  ;;  %v5006_v40 = vor.u32 %v5649_v13, %v5005_v43 }
 0x24f   : > { %v2227_v45 = vmul.f32 %v9459_v11, %v2215_v51  ;;  %v2324_v33 = vmul.f32 %v9460_v57, %v2215_v51  ;;  %4096 = vmatpush.bf16.msra.mxu0 %v9461_v58  ;;  %v2231_v35 = vmul.f32 %v9459_v11, %v2216_v25  ;;  %v9463_v51 = vperm.slane %v7465_v42, 7  ;;  %4106 = vmatpush.bf16.msra.mxu1 %v5230_v6 }
 0x250   : > { %v2230_v24 = vmul.f32 %v9462_v21, %v2218_v17  ;;  %v7879_v3 = vmul.f32 %v7769_v53, %v7812_v52  ;;  %v9441_v29 = vrot.slane %v7846_v14, 1  ;;  %v7884_v49 = vmul.f32 %v7758_v27, %v7812_v52 }
 0x251   : > { %v2327_v57 = vmul.f32 %v9463_v51, %v2218_v17  ;;  %v2749_v37 = vrot.slane %v7808_v19, 4  ;;  %v9440_v21 = vrot.slane %v7855_v26, 2  ;;  %v7890_v42 = vmul.f32 %v7761_v31, %v7812_v52  ;;  %v5675_v51 = vld [vmem:[%s9430_s7 + $0xe4] sm:$0xf]  ;;  %v8086_v19 = vld [vmem:[%s9426_s3 + $0x38] sm:$0x7] }
 0x252   : > { %v2238_v15 = vadd.f32 %v2230_v24, %v2190_v9  ;;  %v2235_v6 = vadd.f32 %v2227_v45, %v2187_v38  ;;  %v2332_v43 = vadd.f32 %v2324_v33, %v2306_v59  ;;  %v2239_v13 = vadd.f32 %v2231_v35, %v2191_v63  ;;  %v5119_v9 = vld [vmem:[%s9430_s7 + $0xf0] sm:$0xf0]  ;;  %v5701_v63 = vld [vmem:[%s9430_s7 + $0x1ac] sm:$0xf0] }
 0x253   : > { %v2335_v58 = vadd.f32 %v2327_v57, %v2309_v7  ;;  %v9464_v17 = vperm.slane %v7472_v0, 7  ;;  %4097 = vmatpush.bf16.msra.mxu0 %v5022_v4  ;;  %v7900_v7 = vpop.permute.xlu2 %2241  ;;  %v5122_v59 = vor.u32 %v5675_v51, %v5119_v9  ;;  %v5213_v0 = vld [vmem:[%s9430_s7 + $0x1a0] sm:$0xf]  ;;  %v9465_v4 = vrot.slane %v7747_v18, 1 }
 0x254   : > { %v2264_v24 = vadd.f32 %v7724_v23, %v2238_v15  ;;  %v7915_v45 = vpop.permute.xlu1 %2103  ;;  %v9446_v23 = vperm.slane %v7504_v28, 3  ;;  %v9466_v51 = vperm.slane %v7504_v28, 0 }
 0x255   : > { %v2328_v11 = vmul.f32 %v9464_v17, %v2216_v25  ;;  %v2361_v38 = vadd.f32 %v7733_v5, %v2335_v58  ;;  %v2511_v35 = vsel %vm580_vm3, %v9465_v4, %v9441_v29  ;;  %v5214_v25 = vor.u32 %v5701_v63, %v5213_v0  ;;  %v2102_v58 = vpop.permute.xlu0 %2101 }
 0x256   : > { %v2284_v57 = vadd.f32 %v7568_v39, %v2264_v24  ;;  %v2106_v18 = vsel %vm473_vm2, %v7650_v12, %v7915_v45  ;;  %v2591_v17 = vsel %vm641_vm5, %v2589_v1, %v9440_v21  ;;  %v9467_v4 = vperm.slane %v7480_v36, 4 }
 0x257   : > { %v2381_v15 = vadd.f32 %v7571_v41, %v2361_v38  ;;  %v2124_v9 = vmul.f32 %v9466_v51, %v2106_v18  ;;  %v2105_v39 = vsel %vm473_vm2, %v7484_v8, %v2102_v58  ;;  %4098 = vmatpush.bf16.msra.mxu0 %v5006_v40  ;;  %v2541_v41 = vadd.f32 %v2511_v35, %v7802_v54 }
 0x258   : > { %v2257_v0 = vmul.f32 %v9467_v4, %v2106_v18  ;;  %v2310_v12 = vadd.f32 %v7816_v61, %v2284_v57  ;;  %v9468_v38 = vmov %v9466_v51  ;;  %v2245_v63 = vsel %vm473_vm2, %v2102_v58, %v7900_v7  ;;  %v5671_v51 = vld [vmem:[%s9430_s7 + $0xc4] sm:$0xf]  ;;  %4107 = vmatpush.bf16.msra.mxu1 %v5214_v25  ;;  %v5697_v57 = vld [vmem:[%s9430_s7 + $0x18c] sm:$0xf0] }
 0x259   : > { %v2407_v24 = vadd.f32 %v7820_v47, %v2381_v15  ;;  %v2120_v1 = vmul.f32 %v9468_v38, %v2105_v39  ;;  %v9469_v40 = vperm.slane %v7521_v56, 0  ;;  %v9470_v61 = vmov %v9467_v4  ;;  %v5103_v47 = vld [vmem:[%s9430_s7 + $0xd0] sm:$0xf0] }
 0x25a   : > { %v2265_v8 = vadd.f32 %v2257_v0, %v2239_v13  ;;  %v2253_v35 = vmul.f32 %v9470_v61, %v2105_v39  ;;  %v9471_v13 = vperm.slane %v7673_v62, 5  ;;  %v9472_v25 = vperm.slane %v7629_v60, 0  ;;  %v5693_v61 = vld [vmem:[%s9430_s7 + $0x16c] sm:$0xf0] }
 0x25b   : > { %4147 = vmatpush.bf16.msrb.mxu0 %v5122_v59  ;;  %v2354_v54 = vmul.f32 %v9469_v40, %v2106_v18  ;;  %v5197_v59 = vld [vmem:[%s9430_s7 + $0x180] sm:$0xf]  ;;  %v2336_v18 = vadd.f32 %v2328_v11, %v2310_v12  ;;  %v7970_v4 = vadd.f32 %v7616_v16, %v2124_v9  ;;  %v9473_v0 = vmov %v9469_v40  ;;  %v5667_v40 = vld [vmem:[%s9430_s7 + $0xa4] sm:$0xf] }
 0x25c   : > { %v7963_v15 = vmul.f32 %v9471_v13, %v7812_v52  ;;  %v7967_v58 = vadd.f32 %v9472_v25, %v2407_v24  ;;  %v2350_v38 = vmul.f32 %v9473_v0, %v2105_v39  ;;  %v5087_v52 = vld [vmem:[%s9430_s7 + $0xb0] sm:$0xf0]  ;;  %v5181_v11 = vld [vmem:[%s9430_s7 + $0x160] sm:$0xf]  ;;  %v7984_v12 = vadd.f32 %v7596_v48, %v2120_v1  ;;  %v5741_v48 = vld [vmem:[%s9430_s7 + $0x2ec] sm:$0xf0] }
 0x25d   : > { %v9474_v16 = vperm.slane %v7504_v28, 4  ;;  %v2261_v39 = vadd.f32 %v2253_v35, %v2235_v6  ;;  %v7991_v24 = vadd.f32 %v7643_v30, %v2265_v8  ;;  %v5373_v13 = vld [vmem:[%s9430_s7 + $0x2e0] sm:$0xf]  ;;  %v2362_v1 = vadd.f32 %v2354_v54, %v2336_v18  ;;  %v8003_v6 = vpop.permute.xlu2 %5843  ;;  %v5663_v35 = vld [vmem:[%s9430_s7 + $0x84] sm:$0xf] }
 0x25e   : > { %2433 = vst [vmem:[#allocation2 + $0x70] sm:$0xff] %v7967_v58  ;;  %v2358_v25 = vadd.f32 %v2350_v38, %v2332_v43  ;;  %v5106_v30 = vor.u32 %v5671_v51, %v5103_v47  ;;  %v5198_v8 = vor.u32 %v5697_v57, %v5197_v59  ;;  %v5071_v0 = vld [vmem:[%s9430_s7 + $0x90] sm:$0xf0]  ;;  %v5090_v43 = vor.u32 %v5667_v40, %v5087_v52  ;;  %v5357_v51 = vld [vmem:[%s9430_s7 + $0x2c0] sm:$0xf] }
 0x25f   : > { %v7988_v9 = vmul.f32 %v9474_v16, %v2245_v63  ;;  %v9475_v16 = vperm.slane %v7605_v44, 0  ;;  %v8016_v29 = vadd.f32 %v7611_v10, %v2261_v39  ;;  %v5374_v54 = vor.u32 %v5741_v48, %v5373_v13  ;;  %v5689_v10 = vld [vmem:[%s9430_s7 + $0x14c] sm:$0xf0]  ;;  %v2853_v48 = vld [vmem:[#allocation2 + $0x78] sm:$0xfe] }
 0x260   : > { %v2378_v47 = vadd.f32 %v7622_v2, %v2358_v25  ;;  %v8023_v59 = vadd.f32 %v7648_v34, %v2362_v1  ;;  %4148 = vmatpush.bf16.msrb.mxu0 %v5106_v30  ;;  %4108 = vmatpush.bf16.msra.mxu1 %v5198_v8  ;;  %v5182_v57 = vor.u32 %v5693_v61, %v5181_v11  ;;  %v5737_v18 = vld [vmem:[%s9430_s7 + $0x2cc] sm:$0xf0]  ;;  %v5845_v2 = vunpack.i.l.bf16 %v8003_v6 }
 0x261   : > { %v8013_v21 = vmul.f32 %v9475_v16, %v2245_v63  ;;  %v5165_v63 = vld [vmem:[%s9430_s7 + $0x140] sm:$0xf]  ;;  %4119 = vmatpush.bf16.msra.mxu2 %v5374_v54  ;;  %v5074_v34 = vor.u32 %v5663_v35, %v5071_v0  ;;  %v5358_v38 = vor.u32 %v5737_v18, %v5357_v51  ;;  %v2621_v52 = vadd.f32 %v2591_v17, %v2541_v41 }
 0x262   : > { %v9442_v11 = vrot.slane %v7884_v49, 3  ;;  %v9443_v39 = vrot.slane %v7890_v42, 4  ;;  %v9476_v61 = vperm.slane %v7673_v62, 5  ;;  %v5166_v1 = vor.u32 %v5689_v10, %v5165_v63  ;;  %v8051_v17 = vld [vmem:[%s9428_s5 + $0x20] sm:$0x7] }
 0x263   : > { %v2861_v8 = vperm.slane %v7673_v62, 6  ;;  %v9477_v41 = vrot.slane %v7805_v50, 3  ;;  %v9445_v16 = vrot.slane %v7963_v15, 5  ;;  %v8061_v51 = vperm.slane %v7673_v62, 7 }
 0x264   : > { %v8041_v13 = vmul.f32 %v9476_v61, %v7967_v58  ;;  %v8046_v35 = vpop.permute.xlu0 %2161  ;;  %4149 = vmatpush.bf16.msrb.mxu0 %v5090_v43  ;;  %4109 = vmatpush.bf16.msra.mxu1 %v5182_v57  ;;  %v2751_v50 = vsel %vm747_vm6, %v2749_v37, %v9443_v39  ;;  %v9478_v62 = vperm.slane %v7504_v28, 2  ;;  %v9479_v30 = vperm.slane %v7480_v36, 6  ;;  %v5659_v37 = vld [vmem:[%s9430_s7 + $0x64] sm:$0xf]  ;;  %v2933_v39 = vld [vmem:[#allocation2 + $0x78] sm:$0xfc] }
 0x265   : > { %v2671_v0 = vsel %vm694_vm4, %v9477_v41, %v9442_v11  ;;  %v2165_v43 = vsel %vm407_vm0, %v7742_v22, %v8046_v35  ;;  %4120 = vmatpush.bf16.msra.mxu2 %v5358_v38  ;;  %v2453_v57 = vld [vmem:[#allocation2 + $0x70] sm:$0x7]  ;;  %v8072_v61 = vmul.f32 %v2861_v8, %v2853_v48  ;;  %v9480_v22 = vperm.slane %v7521_v56, 2  ;;  %v5055_v48 = vld [vmem:[%s9430_s7 + $0x70] sm:$0xf0] }
 0x266   : > { %v9444_v54 = vrot.slane %v8041_v13, 5  ;;  %v2477_v63 = vld [vmem:[#allocation2 + $0x70] sm:$0xf]  ;;  %v2701_v18 = vadd.f32 %v2671_v0, %v2621_v52  ;;  %v2180_v41 = vmul.f32 %v9478_v62, %v2165_v43  ;;  %v2299_v25 = vmul.f32 %v9479_v30, %v2165_v43  ;;  %v2857_v52 = vld [vmem:[#allocation2 + $0x98] sm:$0x1] }
 0x267   : > { %v2557_v10 = vld [vmem:[#allocation2 + $0x70] sm:$0x1f]  ;;  %v2396_v38 = vmul.f32 %v9480_v22, %v2165_v43  ;;  %v8081_v0 = vmul.f32 %v2861_v8, %v7967_v58  ;;  %v8095_v30 = vmul.f32 %v7769_v53, %v2453_v57  ;;  %v8098_v43 = vmul.f32 %v7729_v20, %v2477_v63  ;;  %v5149_v53 = vld [vmem:[%s9430_s7 + $0x120] sm:$0xf] }
 0x268   : > { %v2637_v40 = vld [vmem:[#allocation2 + $0x70] sm:$0x3f]  ;;  %v8101_v62 = vmul.f32 %v7750_v32, %v2557_v10  ;;  %v8107_v33 = vadd.f32 %v2180_v41, %v7984_v12  ;;  %4150 = vmatpush.bf16.msrb.mxu0 %v5074_v34  ;;  %4110 = vmatpush.bf16.msra.mxu1 %v5166_v1  ;;  %v5058_v34 = vor.u32 %v5659_v37, %v5055_v48  ;;  %v5341_v1 = vld [vmem:[%s9430_s7 + $0x2a0] sm:$0xf]  ;;  %v5655_v37 = vld [vmem:[%s9430_s7 + $0x44] sm:$0xf] }
 0x269   : > { %v2717_v11 = vld [vmem:[#allocation2 + $0x70] sm:$0x7f]  ;;  %v8104_v22 = vmul.f32 %v7758_v27, %v2637_v40  ;;  %v2404_v5 = vadd.f32 %v2396_v38, %v2378_v47  ;;  %v8119_v27 = vperm.slane %v8051_v17, 0  ;;  %v2368_v47 = vperm.slane %v8086_v19, 1  ;;  %v5501_v41 = vld [vmem:[%s9430_s7 + $0x3e0] sm:$0xf] }
 0x26a   : > { %v5685_v20 = vld [vmem:[%s9430_s7 + $0x12c] sm:$0xf0]  ;;  %v8116_v32 = vmul.f32 %v7761_v31, %v2717_v11  ;;  %v2307_v31 = vadd.f32 %v2299_v25, %v8016_v29  ;;  %v9481_v11 = vperm.slane %v7629_v60, 1  ;;  %v8148_v29 = vsel %vm808_vm7, %v9445_v16, %v9444_v54  ;;  %v5039_v25 = vld [vmem:[%s9430_s7 + $0x50] sm:$0xf0] }
 0x26b   : > { %v5150_v40 = vor.u32 %v5685_v20, %v5149_v53  ;;  %v5733_v57 = vld [vmem:[%s9430_s7 + $0x2ac] sm:$0xf0]  ;;  %v5133_v48 = vld [vmem:[%s9430_s7 + $0x100] sm:$0xf]  ;;  %v5954_v20 = vld [vmem:[#allocation2 + $0xd8] sm:$0xff]  ;;  %v5042_v54 = vor.u32 %v5655_v37, %v5039_v25  ;;  %v9484_v37 = vperm.slane %v7504_v28, 2 }
 0x26c   : > { %v8132_v63 = vadd.f32 %v9481_v11, %v2404_v5  ;;  %v5342_v10 = vor.u32 %v5733_v57, %v5341_v1  ;;  %v5773_v38 = vld [vmem:[%s9430_s7 + $0x3ec] sm:$0xf0]  ;;  %v8159_v1 = vmul.f32 %v5954_v20, %v2368_v47  ;;  %v8161_v57 = vadd.f32 %v2751_v50, %v2701_v18  ;;  %4151 = vmatpush.bf16.msrb.mxu0 %v5058_v34  ;;  %v5707_v16 = vld [vmem:[%s9430_s7 + $0x1e4] sm:$0xf]  ;;  %v5247_v18 = vld [vmem:[%s9430_s7 + $0x1f0] sm:$0xf0] }
 0x26d   : > { %v5502_v5 = vor.u32 %v5773_v38, %v5501_v41  ;;  %v5681_v53 = vld [vmem:[%s9430_s7 + $0x10c] sm:$0xf0]  ;;  %v8163_v11 = vmul.f32 %v2861_v8, %v2857_v52  ;;  %v8166_v41 = vpop.permute.xlu1 %2163  ;;  %v2210_v38 = vpop.permute.xlu0 %2209  ;;  %4111 = vmatpush.bf16.msra.mxu1 %v5150_v40  ;;  %v8175_v8 = vmul.f32 %v8061_v51, %v2933_v39  ;;  %v9483_v52 = vld [vmem:[#allocation8_spill] sm:$0xff]  ;;  %v5325_v39 = vld [vmem:[%s9430_s7 + $0x280] sm:$0xf] }
 0x26e   : > { %9482 = vst [vmem:[#allocation9_spill] sm:$0xff] %v8132_v63  ;;  %v5134_v12 = vor.u32 %v5681_v53, %v5133_v48  ;;  %v2166_v50 = vsel %vm407_vm0, %v7675_v55, %v8166_v41  ;;  %v2213_v47 = vsel %vm436_vm1, %v9483_v52, %v2210_v38  ;;  %v2317_v34 = vsel %vm436_vm1, %v2210_v38, %v5845_v2  ;;  %v5729_v40 = vld [vmem:[%s9430_s7 + $0x28c] sm:$0xf0]  ;;  %v5485_v20 = vld [vmem:[%s9430_s7 + $0x3c0] sm:$0xf] }
 0x26f   : > { %2430 = vst [vmem:[#allocation2 + $0x60] sm:$0xff] %v8132_v63  ;;  %4121 = vmatpush.bf16.msra.mxu2 %v5342_v10  ;;  %4133 = vmatpush.bf16.msra.mxu3 %v5502_v5  ;;  %v2184_v25 = vmul.f32 %v9484_v37, %v2166_v50  ;;  %v9485_v48 = vperm.slane %v7480_v36, 6  ;;  %v9486_v2 = vperm.slane %v7521_v56, 2  ;;  %v2228_v5 = vmul.f32 %v9446_v23, %v2213_v47  ;;  %v5769_v38 = vld [vmem:[%s9430_s7 + $0x3cc] sm:$0xf0] }
 0x270   : > { %v9487_v52 = vperm.slane %v7480_v36, 7  ;;  %v9488_v55 = vperm.slane %v7504_v28, 7  ;;  %v5250_v56 = vor.u32 %v5707_v16, %v5247_v18  ;;  %v5023_v23 = vld [vmem:[%s9430_s7 + $0x30] sm:$0xf0]  ;;  %v5703_v63 = vld [vmem:[%s9430_s7 + $0x1c4] sm:$0xf]  ;;  %4152 = vmatpush.bf16.msrb.mxu0 %v5042_v54 }
 0x271   : > { %v2303_v53 = vmul.f32 %v9485_v48, %v2166_v50  ;;  %v2400_v10 = vmul.f32 %v9486_v2, %v2166_v50  ;;  %v5326_v50 = vor.u32 %v5729_v40, %v5325_v39  ;;  %v5651_v2 = vld [vmem:[%s9430_s7 + $0x24] sm:$0xf]  ;;  %v2236_v16 = vadd.f32 %v2228_v5, %v8107_v33  ;;  %v5231_v18 = vld [vmem:[%s9430_s7 + $0x1d0] sm:$0xf0]  ;;  %v5309_v39 = vld [vmem:[%s9430_s7 + $0x260] sm:$0xf]  ;;  %4112 = vmatpush.bf16.msra.mxu1 %v5134_v12 }
 0x272   : > { %v2325_v37 = vmul.f32 %v9487_v52, %v2213_v47  ;;  %v8213_v48 = vmul.f32 %v9488_v55, %v2317_v34  ;;  %v2192_v47 = vadd.f32 %v2184_v25, %v7970_v4  ;;  %v5725_v40 = vld [vmem:[%s9430_s7 + $0x26c] sm:$0xf0]  ;;  %v5846_v4 = vunpack.i.h.bf16 %v8003_v6  ;;  %v5469_v54 = vld [vmem:[%s9430_s7 + $0x3a0] sm:$0xf]  ;;  %v5647_v25 = vld [vmem:[%s9430_s7 + $0x4] sm:$0xf] }
 0x273   : > { %v2311_v52 = vadd.f32 %v2303_v53, %v7991_v24  ;;  %v2408_v34 = vadd.f32 %v2400_v10, %v8023_v59  ;;  %4122 = vmatpush.bf16.msra.mxu2 %v5326_v50  ;;  %v5486_v59 = vor.u32 %v5769_v38, %v5485_v20  ;;  %v5026_v33 = vor.u32 %v5651_v2, %v5023_v23  ;;  %v5765_v55 = vld [vmem:[%s9430_s7 + $0x3ac] sm:$0xf0]  ;;  %v5007_v10 = vld [vmem:[%s9430_s7 + $0x10] sm:$0xf0]  ;;  %v9490_v50 = vld [vmem:[#allocation3_spill] sm:$0xff] }
 0x274   : > { %v2333_v24 = vadd.f32 %v2325_v37, %v2307_v31  ;;  %v9489_v53 = vperm.slane %v7629_v60, 1  ;;  %v2262_v12 = vadd.f32 %v7988_v9, %v2236_v16  ;;  %v5234_v23 = vor.u32 %v5703_v63, %v5231_v18 }
 0x275   : > { %4161 = vmatpush.bf16.msrb.mxu1 %v5250_v56  ;;  %v5310_v31 = vor.u32 %v5725_v40, %v5309_v39  ;;  %4134 = vmatpush.bf16.msra.mxu3 %v5486_v59  ;;  %v5470_v20 = vor.u32 %v5765_v55, %v5469_v54  ;;  %v5010_v38 = vor.u32 %v5647_v25, %v5007_v10  ;;  %v2521_v37 = vrot.slane %v8098_v43, 1  ;;  %v2212_v9 = vpop.permute.xlu1 %2211  ;;  %v2244_v56 = vpop.permute.xlu0 %2243  ;;  %v9492_v39 = vld [vmem:[#allocation7_spill] sm:$0xff] }
 0x276   : > { %v8249_v6 = vadd.f32 %v9489_v53, %v2408_v34  ;;  %v2359_v5 = vadd.f32 %v8013_v21, %v2333_v24  ;;  %v8259_v2 = vadd.f32 %v9490_v50, %v2262_v12  ;;  %4153 = vmatpush.bf16.msrb.mxu0 %v5026_v33  ;;  %v2601_v63 = vrot.slane %v8101_v62, 2  ;;  %v9491_v21 = vld [vmem:[#allocation4_spill] sm:$0xff] }
 0x277   : > { %v2681_v34 = vrot.slane %v8104_v22, 3  ;;  %v2761_v16 = vrot.slane %v8116_v32, 4  ;;  %v2214_v43 = vsel %vm436_vm1, %v9492_v39, %v2212_v9  ;;  %v2318_v40 = vsel %vm436_vm1, %v2212_v9, %v5846_v4  ;;  %4123 = vmatpush.bf16.msra.mxu2 %v5310_v31 }
 0x278   : > { %2434 = vst [vmem:[#allocation2 + $0xa8] sm:$0xff] %v8249_v6  ;;  %v2379_v18 = vadd.f32 %v9491_v21, %v2359_v5  ;;  %v2246_v24 = vsel %vm473_vm2, %v7915_v45, %v2244_v56  ;;  %v9493_v62 = vperm.slane %v7504_v28, 3  ;;  %v9494_v22 = vperm.slane %v7480_v36, 7 }
 0x279   : > { %v9495_v33 = vperm.slane %v7504_v28, 7  ;;  %v9496_v55 = vperm.slane %v7504_v28, 4  ;;  %4162 = vmatpush.bf16.msrb.mxu1 %v5234_v23  ;;  %v9497_v4 = vperm.slane %v7605_v44, 0  ;;  %4135 = vmatpush.bf16.msra.mxu3 %v5470_v20  ;;  %v9498_v45 = vrot.slane %v7846_v14, 1 }
 0x27a   : > { %v2232_v59 = vmul.f32 %v9493_v62, %v2214_v43  ;;  %v2329_v32 = vmul.f32 %v9494_v22, %v2214_v43  ;;  %v2549_v31 = vadd.f32 %v2521_v37, %v8095_v30  ;;  %v9499_v36 = vrot.slane %v7855_v26, 2  ;;  %4154 = vmatpush.bf16.msrb.mxu0 %v5010_v38 }
 0x27b   : > { %v8279_v54 = vmul.f32 %v9495_v33, %v2318_v40  ;;  %v2258_v25 = vmul.f32 %v9496_v55, %v2246_v24  ;;  %v2355_v53 = vmul.f32 %v9497_v4, %v2246_v24  ;;  %v2522_v12 = vsel %vm580_vm3, %v9498_v45, %v2521_v37  ;;  %v2937_v40 = vld [vmem:[#allocation2 + $0x98] sm:$0x3]  ;;  %v9503_v24 = vld [vmem:[#allocation5_spill] sm:$0xff] }
 0x27c   : > { %v2602_v10 = vsel %vm641_vm5, %v9499_v36, %v2601_v63  ;;  %v2240_v5 = vadd.f32 %v2232_v59, %v2192_v47  ;;  %v2337_v50 = vadd.f32 %v2329_v32, %v2311_v52  ;;  %v2545_v9 = vadd.f32 %v2522_v12, %v7879_v3 }
 0x27d   : > { %v9500_v23 = vrot.slane %v7884_v49, 3  ;;  %v2629_v20 = vadd.f32 %v2601_v63, %v2549_v31  ;;  %v9501_v14 = vrot.slane %v7890_v42, 4  ;;  %v9502_v30 = vrot.slane %v7963_v15, 5  ;;  %v9504_v15 = vld [vmem:[#allocation6_spill] sm:$0xff]  ;;  %v5839_v59 = vpop.permute.xlu1 %5838 }
 0x27e   : > { %v2889_v37 = vrot.slane %v8072_v61, 6  ;;  %v2266_v47 = vadd.f32 %v2258_v25, %v2240_v5  ;;  %v2363_v52 = vadd.f32 %v2355_v53, %v2337_v50  ;;  %v2625_v38 = vadd.f32 %v2602_v10, %v2545_v9  ;;  %v5849_v61 = vpop.permute.xlu0 %5848 }
 0x27f   : > { %v2682_v21 = vsel %vm694_vm4, %v9500_v23, %v2681_v34  ;;  %v2762_v39 = vsel %vm747_vm6, %v9501_v14, %v2761_v16  ;;  %v2841_v26 = vadd.f32 %v9502_v30, %v8161_v57  ;;  %v2893_v3 = vrot.slane %v8081_v0, 6 }
 0x280   : > { %v2709_v49 = vadd.f32 %v2681_v34, %v2629_v20  ;;  %v2901_v43 = vrot.slane %v8163_v11, 6  ;;  %v2949_v42 = vmul.f32 %v8061_v51, %v7967_v58  ;;  %v2286_v62 = vadd.f32 %v9503_v24, %v2266_v47 }
 0x281   : > { %v2921_v63 = vadd.f32 %v2889_v37, %v2841_v26  ;;  %v2383_v57 = vadd.f32 %v9504_v15, %v2363_v52  ;;  %v2705_v22 = vadd.f32 %v2682_v21, %v2625_v38  ;;  %v2894_v32 = vsel %vm869_vm8, %v2889_v37, %v2893_v3 }
 0x282   : > { %v5841_v33 = vunpack.i.h.bf16 %v5839_v59  ;;  %v5840_v0 = vunpack.i.l.bf16 %v5839_v59  ;;  %v5851_v55 = vunpack.i.h.bf16 %v5849_v61  ;;  %v5850_v34 = vunpack.i.l.bf16 %v5849_v61  ;;  %v3014_v61 = vld [vmem:[#allocation2 + $0x78] sm:$0xf8] }
 0x283   : > { %v2785_v25 = vadd.f32 %v2762_v39, %v2705_v22  ;;  %v2789_v11 = vadd.f32 %v2761_v16, %v2709_v49  ;;  %v2902_v4 = vsel %vm869_vm8, %v2893_v3, %v2901_v43  ;;  %v2953_v53 = vmul.f32 %v8061_v51, %v2937_v40  ;;  %v3018_v22 = vld [vmem:[#allocation2 + $0x98] sm:$0x7] }
 0x284   : > { %v2292_v45 = vsel %vm407_vm0, %v8166_v41, %v5841_v33  ;;  %v2291_v12 = vsel %vm407_vm0, %v8046_v35, %v5840_v0  ;;  %v2344_v31 = vsel %vm473_vm2, %v2244_v56, %v5851_v55  ;;  %v2343_v36 = vsel %vm473_vm2, %v7900_v7, %v5850_v34  ;;  %v3050_v34 = vld [vmem:[#allocation2 + $0x78] sm:$0xf0] }
 0x285   : > { %v9505_v16 = vperm.slane %v7504_v28, 6  ;;  %v9506_v51 = vperm.slane %v7605_v44, 2  ;;  %v9509_v35 = vperm.slane %v8086_v19, 0  ;;  %v2845_v7 = vadd.f32 %v8148_v29, %v2785_v25  ;;  %v5854_v24 = vpop.permute.xlu1 %5853 }
 0x286   : > { %v9511_v14 = vrot.slane %v8041_v13, 5  ;;  %v2970_v44 = vrot.slane %v8175_v8, 7  ;;  %v2974_v38 = vrot.slane %v2949_v42, 7  ;;  %v9512_v3 = vperm.slane %v7629_v60, 2 }
 0x287   : > { %v2304_v10 = vmul.f32 %v9505_v16, %v2292_v45  ;;  %v2401_v5 = vmul.f32 %v9506_v51, %v2292_v45  ;;  %v9507_v50 = vmov %v9505_v16  ;;  %v9508_v9 = vmov %v9506_v51  ;;  %v8376_v16 = vld [vmem:[%s9430_s7 + $0xf4] sm:$0xf0] }
 0x288   : > { %v2300_v41 = vmul.f32 %v9507_v50, %v2291_v12  ;;  %v2397_v23 = vmul.f32 %v9508_v9, %v2291_v12  ;;  %v2356_v21 = vmul.f32 %v9509_v35, %v2344_v31  ;;  %v9510_v56 = vmov %v9509_v35  ;;  %v3054_v12 = vld [vmem:[#allocation2 + $0x98] sm:$0xf]  ;;  %v3130_v31 = vld [vmem:[#allocation2 + $0x78] sm:$0xe0] }
 0x289   : > { %v2352_v20 = vmul.f32 %v9510_v56, %v2343_v36  ;;  %v2849_v39 = vadd.f32 %v9511_v14, %v2789_v11  ;;  %v2312_v26 = vadd.f32 %v2304_v10, %v2286_v62  ;;  %v2409_v28 = vadd.f32 %v2401_v5, %v2383_v57  ;;  %v3134_v36 = vld [vmem:[#allocation2 + $0x98] sm:$0x1f]  ;;  %v5293_v56 = vld [vmem:[%s9430_s7 + $0x240] sm:$0xf] }
 0x28a   : > { %v2308_v30 = vadd.f32 %v2300_v41, %v8259_v2  ;;  %v2405_v37 = vadd.f32 %v2397_v23, %v2379_v18  ;;  %v2925_v47 = vadd.f32 %v2894_v32, %v2845_v7  ;;  %v9513_v43 = vmov %v9512_v3  ;;  %v5215_v41 = vld [vmem:[%s9430_s7 + $0x1b0] sm:$0xf0] }
 0x28b   : > { %v2929_v52 = vadd.f32 %v2902_v4, %v2849_v39  ;;  %v2427_v40 = vadd.f32 %v9513_v43, %v2409_v28  ;;  %v2338_v13 = vadd.f32 %v8279_v54, %v2312_v26  ;;  %v5856_v2 = vunpack.i.h.bf16 %v5854_v24  ;;  %v5761_v26 = vld [vmem:[%s9430_s7 + $0x38c] sm:$0xf0] }
 0x28c   : > { %v2423_v49 = vadd.f32 %v9512_v3, %v2405_v37  ;;  %v2334_v29 = vadd.f32 %v8213_v48, %v2308_v30  ;;  %v5855_v62 = vunpack.i.l.bf16 %v5854_v24  ;;  %v2975_v18 = vsel %vm2969_vm10, %v2970_v44, %v2974_v38  ;;  %v5453_v30 = vld [vmem:[%s9430_s7 + $0x380] sm:$0xf]  ;;  %v8405_v37 = vld [vmem:[%s9430_s7 + $0xc8] sm:$0xf]  ;;  %v5695_v3 = vld [vmem:[%s9430_s7 + $0x184] sm:$0xf] }
 0x28d   : > { %v2982_v15 = vrot.slane %v2953_v53, 7  ;;  %v2364_v57 = vadd.f32 %v2356_v21, %v2338_v13  ;;  %v2416_v42 = vperm.slane %v7629_v60, 3  ;;  %v3006_v59 = vadd.f32 %v2975_v18, %v2925_v47  ;;  %2435 = vst [vmem:[#allocation2 + $0x20] sm:$0xff] %v2427_v40  ;;  %v8424_v13 = vld [vmem:[%s9430_s7 + $0x220] sm:$0xf] }
 0x28e   : > { %2431 = vst [vmem:[#allocation2 + $0x10] sm:$0xff] %v2423_v49  ;;  %v2360_v8 = vadd.f32 %v2352_v20, %v2334_v29  ;;  %v2389_v48 = vsel %vm407_vm0, %v5840_v0, %v5855_v62  ;;  %v2390_v54 = vsel %vm407_vm0, %v5841_v33, %v5856_v2  ;;  %v3002_v55 = vadd.f32 %v2970_v44, %v2921_v63  ;;  %v5199_v49 = vld [vmem:[%s9430_s7 + $0x190] sm:$0xf0]  ;;  %v8429_v24 = vld [vmem:[%s9430_s7 + $0x22c] sm:$0xf0] }
 0x28f   : > { %v2983_v32 = vsel %vm2969_vm10, %v2974_v38, %v2982_v15  ;;  %v2384_v11 = vadd.f32 %v8159_v1, %v2364_v57  ;;  %v9514_v60 = vperm.slane %v8086_v19, 2  ;;  %v3026_v63 = vmul.f32 %v8119_v27, %v3014_v61  ;;  %v8371_v19 = vld [vmem:[%s9430_s7 + $0xe8] sm:$0xf]  ;;  %v8411_v38 = vld [vmem:[%s9430_s7 + $0xd4] sm:$0xf0] }
 0x290   : > { %v2380_v25 = vadd.f32 %v8159_v1, %v2360_v8  ;;  %v3010_v33 = vadd.f32 %v2983_v32, %v2929_v52  ;;  %v3030_v0 = vmul.f32 %v8119_v27, %v7967_v58  ;;  %v3034_v1 = vmul.f32 %v8119_v27, %v3018_v22  ;;  %v5699_v27 = vld [vmem:[%s9430_s7 + $0x1a4] sm:$0xf]  ;;  %v8434_v2 = vld [vmem:[%s9430_s7 + $0x360] sm:$0xf]  ;;  %v8439_v62 = vld [vmem:[%s9430_s7 + $0x36c] sm:$0xf0] }
 0x291   : > { %v2398_v4 = vmul.f32 %v9514_v60, %v2389_v48  ;;  %v9515_v53 = vmov %v9514_v60  ;;  %v3058_v5 = vperm.slane %v8051_v17, 1  ;;  %v3138_v50 = vperm.slane %v8051_v17, 2  ;;  %v5721_v17 = vld [vmem:[%s9430_s7 + $0x24c] sm:$0xf0]  ;;  %v8454_v61 = vld [vmem:[%s9430_s7 + $0x164] sm:$0xf] }
 0x292   : > { %v2402_v45 = vmul.f32 %v9515_v53, %v2390_v54  ;;  %v3038_v9 = vadd.f32 %v3026_v63, %v3002_v55  ;;  %v3042_v23 = vadd.f32 %v3030_v0, %v3006_v59  ;;  %v3046_v35 = vadd.f32 %v3034_v1, %v3010_v33  ;;  %v8449_v59 = vld [vmem:[%s9430_s7 + $0xb4] sm:$0xf0]  ;;  %v8459_v22 = vld [vmem:[%s9430_s7 + $0x170] sm:$0xf0]  ;;  %v8464_v48 = vld [vmem:[%s9430_s7 + $0x200] sm:$0xf] }
 0x293   : > { %v2406_v10 = vadd.f32 %v2398_v4, %v2380_v25  ;;  %v8387_v21 = vperm.slane %v8362_v46, 0  ;;  %v3062_v14 = vmul.f32 %v3058_v5, %v3050_v34  ;;  %v3066_v39 = vmul.f32 %v3058_v5, %v7967_v58  ;;  %v8469_v54 = vld [vmem:[%s9430_s7 + $0x20c] sm:$0xf0]  ;;  %v8487_v4 = vld [vmem:[%s9430_s7 + $0x2e4] sm:$0xf] }
 0x294   : > { %v2410_v51 = vadd.f32 %v2402_v45, %v2384_v11  ;;  %v3070_v28 = vmul.f32 %v3058_v5, %v3054_v12  ;;  %v3142_v47 = vmul.f32 %v3138_v50, %v3130_v31  ;;  %v3146_v52 = vmul.f32 %v3138_v50, %v7967_v58  ;;  %v8477_v11 = vld [vmem:[%s9430_s7 + $0x340] sm:$0xf]  ;;  %v8482_v60 = vld [vmem:[%s9430_s7 + $0x34c] sm:$0xf0]  ;;  %v8492_v53 = vld [vmem:[%s9430_s7 + $0x2f0] sm:$0xf0] }
 0x295   : > { %v2424_v20 = vadd.f32 %v2416_v42, %v2406_v10  ;;  %v3150_v44 = vmul.f32 %v3138_v50, %v3134_v36  ;;  %v3086_v43 = vrot.slane %v3062_v14, 1  ;;  %v3087_v40 = vrot.slane %v3066_v39, 1  ;;  %v8499_v63 = vld [vmem:[%s9430_s7 + $0x88] sm:$0xf]  ;;  %v8504_v0 = vld [vmem:[%s9430_s7 + $0x94] sm:$0xf0] }
 0x296   : > { %v2428_v7 = vadd.f32 %v2416_v42, %v2410_v51  ;;  %v5126_v58 = vor.u32 %v8376_v16, %v8371_v19  ;;  %v5218_v29 = vor.u32 %v5699_v27, %v5215_v41  ;;  %v3098_v18 = vrot.slane %v3070_v28, 1  ;;  %v8444_v42 = vld [vmem:[%s9430_s7 + $0xa8] sm:$0xf]  ;;  %v8509_v1 = vld [vmem:[%s9430_s7 + $0x144] sm:$0xf] }
 0x297   : > { %2432 = vst [vmem:[#allocation2 + $0x28] sm:$0xff] %v2424_v20  ;;  %v3166_v15 = vrot.slane %v3142_v47, 2  ;;  %v3167_v57 = vrot.slane %v3146_v52, 2  ;;  %v3178_v8 = vrot.slane %v3150_v44, 2  ;;  %v3088_v32 = vsel %vm580_vm3, %v3086_v43, %v3087_v40  ;;  %v8514_v36 = vld [vmem:[%s9430_s7 + $0x150] sm:$0xf0] }
 0x298   : > { %2436 = vst [vmem:[#allocation2 + $0x88] sm:$0xff] %v2428_v7  ;;  %4163 = vmatpush.bf16.msrb.mxu1 %v5218_v29  ;;  %v5294_v55 = vor.u32 %v5721_v17, %v5293_v56  ;;  %v5454_v34 = vor.u32 %v5761_v26, %v5453_v30  ;;  %v5110_v25 = vor.u32 %v8411_v38, %v8405_v37  ;;  %v8520_v50 = vld [vmem:[%s9430_s7 + $0x320] sm:$0xf]  ;;  %v8525_v27 = vld [vmem:[%s9430_s7 + $0x32c] sm:$0xf0] }
 0x299   : > { %v3099_v45 = vsel %vm580_vm3, %v3087_v40, %v3098_v18  ;;  %v3118_v12 = vadd.f32 %v3088_v32, %v3038_v9  ;;  %v3126_v31 = vadd.f32 %v3098_v18, %v3046_v35  ;;  %v3168_v33 = vsel %vm641_vm5, %v3166_v15, %v3167_v57  ;;  %v8530_v41 = vld [vmem:[%s9430_s7 + $0x2c4] sm:$0xf]  ;;  %v8535_v9 = vld [vmem:[%s9430_s7 + $0x2d0] sm:$0xf0]  ;;  %v8544_v20 = vld [vmem:[%s9430_s7 + $0x68] sm:$0xf] }
 0x29a   : > { %v3122_v10 = vadd.f32 %v3099_v45, %v3042_v23  ;;  %v3179_v51 = vsel %vm641_vm5, %v3167_v57, %v3178_v8  ;;  %4124 = vmatpush.bf16.msra.mxu2 %v5294_v55  ;;  %4136 = vmatpush.bf16.msra.mxu3 %v5454_v34  ;;  %v5202_v5 = vor.u32 %v5695_v3, %v5199_v49  ;;  %v8549_v7 = vld [vmem:[%s9430_s7 + $0x74] sm:$0xf0]  ;;  %v8554_v14 = vld [vmem:[%s9430_s7 + $0x124] sm:$0xf]  ;;  %v8565_v47 = vld [vmem:[%s9430_s7 + $0x130] sm:$0xf0] }
 0x29b   : > { %v3198_v23 = vadd.f32 %v3168_v33, %v3118_v12  ;;  %v3206_v35 = vadd.f32 %v3178_v8, %v3126_v31  ;;  %v5278_v56 = vor.u32 %v8429_v24, %v8424_v13  ;;  %v5438_v17 = vor.u32 %v8439_v62, %v8434_v2  ;;  %v8570_v52 = vld [vmem:[%s9430_s7 + $0x300] sm:$0xf]  ;;  %v8575_v44 = vld [vmem:[%s9430_s7 + $0x30c] sm:$0xf0]  ;;  %v8586_v29 = vld [vmem:[%s9430_s7 + $0x2a4] sm:$0xf] }
 0x29c   : > { %v3202_v39 = vadd.f32 %v3179_v51, %v3122_v10  ;;  %4164 = vmatpush.bf16.msrb.mxu1 %v5202_v5  ;;  %v5094_v30 = vor.u32 %v8449_v59, %v8444_v42  ;;  %v5186_v26 = vor.u32 %v8454_v61, %v8459_v22  ;;  %v5262_v28 = vor.u32 %v8469_v54, %v8464_v48  ;;  %v8591_v13 = vld [vmem:[%s9430_s7 + $0x2b0] sm:$0xf0]  ;;  %v8596_v24 = vld [vmem:[%s9430_s7 + $0x3e4] sm:$0xf]  ;;  %v8611_v57 = vld [vmem:[%s9430_s7 + $0x48] sm:$0xf] }
 0x29d   : > { %v3220_v3 = vadd.f32 %v8387_v21, %v3198_v23  ;;  %v3228_v49 = vadd.f32 %v8387_v21, %v3206_v35  ;;  %v5422_v43 = vor.u32 %v8482_v60, %v8477_v11  ;;  %v5378_v40 = vor.u32 %v8487_v4, %v8492_v53  ;;  %v8606_v15 = vld [vmem:[%s9430_s7 + $0x3f0] sm:$0xf0]  ;;  %v8627_v54 = vld [vmem:[%s9430_s7 + $0x104] sm:$0xf]  ;;  %v8637_v55 = vld [vmem:[%s9428_s5 + $0x8] sm:$0xff] }
 0x29e   : > { %v3224_v2 = vadd.f32 %v8387_v21, %v3202_v39  ;;  %4125 = vmatpush.bf16.msra.mxu2 %v5278_v56  ;;  %4137 = vmatpush.bf16.msra.mxu3 %v5438_v17  ;;  %v5078_v62 = vor.u32 %v8504_v0, %v8499_v63  ;;  %v5170_v18 = vor.u32 %v8509_v1, %v8514_v36  ;;  %v8616_v21 = vld [vmem:[%s9430_s7 + $0x54] sm:$0xf0]  ;;  %v8632_v32 = vld [vmem:[%s9430_s7 + $0x110] sm:$0xf0]  ;;  %v2474_v53 = vld [vmem:[#allocation2 + $0x18] sm:$0xf0] }
 0x29f   : > { %v3236_v8 = vpack.c.bf16 %v3228_v49, %v3228_v49  ;;  %v5406_v61 = vor.u32 %v8525_v27, %v8520_v50  ;;  %v5362_v22 = vor.u32 %v8530_v41, %v8535_v9  ;;  %v5062_v48 = vor.u32 %v8549_v7, %v8544_v20  ;;  %v2446_v1 = vld [vmem:[#allocation2 + $0x18] sm:$0xf8]  ;;  %v2454_v50 = vld [vmem:[#allocation2 + $0xa8] sm:$0x7]  ;;  %v2858_v38 = vld [vmem:[#allocation2 + $0xb8] sm:$0x1] }
 0x2a0   : > { %v3232_v34 = vpack.c.bf16 %v3224_v2, %v3220_v3  ;;  %4165 = vmatpush.bf16.msrb.mxu1 %v5186_v26  ;;  %v5154_v11 = vor.u32 %v8554_v14, %v8565_v47  ;;  %v5390_v60 = vor.u32 %v8575_v44, %v8570_v52  ;;  %v5346_v4 = vor.u32 %v8586_v29, %v8591_v13  ;;  %v2554_v36 = vld [vmem:[#allocation2 + $0x18] sm:$0xe0]  ;;  %v2478_v23 = vld [vmem:[#allocation2 + $0xa8] sm:$0xf]  ;;  %v9516_v26 = vld [vmem:[#allocation9_spill] sm:$0xff] }
 0x2a1   : > { %v3388_v45 = vshrl.u32 %v3236_v8, 16  ;;  %v3391_v12 = vshll.u32 %v3236_v8, 16  ;;  %v5506_v31 = vor.u32 %v8596_v24, %v8606_v15  ;;  %v5046_v33 = vor.u32 %v8616_v21, %v8611_v57  ;;  %v2558_v47 = vld [vmem:[#allocation2 + $0xa8] sm:$0x1f]  ;;  %v2634_v24 = vld [vmem:[#allocation2 + $0x18] sm:$0xc0] }
 0x2a2   : > { %v3380_v10 = vshrl.u32 %v3232_v34, 16  ;;  %v3383_v51 = vshll.u32 %v3232_v34, 16  ;;  %4126 = vmatpush.bf16.msra.mxu2 %v5262_v28  ;;  %4138 = vmatpush.bf16.msra.mxu3 %v5422_v43  ;;  %v5138_v5 = vor.u32 %v8627_v54, %v8632_v32  ;;  %v2458_v27 = vperm.slane %v8637_v55, 0  ;;  %v8707_v63 = vld [vmem:[%s9430_s7 + $0x1f4] sm:$0xf0] }
 0x2a3   : > { %v3390_v41 = vrot.slane %v3388_v45, 1  ;;  %v3393_v9 = vrot.slane %v3391_v12, 2  ;;  %v2482_v35 = vperm.slane %v8637_v55, 1  ;;  %v2562_v56 = vperm.slane %v8637_v55, 2  ;;  %v2638_v12 = vld [vmem:[#allocation2 + $0xa8] sm:$0x3f] }
 0x2a4   : > { %v3382_v17 = vrot.slane %v3380_v10, 1  ;;  %v3385_v14 = vrot.slane %v3383_v51, 2  ;;  %4166 = vmatpush.bf16.msrb.mxu1 %v5170_v18  ;;  %v2462_v39 = vmul.f32 %v2458_v27, %v2446_v1  ;;  %v2466_v28 = vmul.f32 %v2458_v27, %v9516_v26  ;;  %v2714_v51 = vld [vmem:[#allocation2 + $0x18] sm:$0x80]  ;;  %v5727_v20 = vld [vmem:[%s9430_s7 + $0x284] sm:$0xf] }
 0x2a5   : > { %v3394_v52 = vor.u32 %v3393_v9, %v3390_v41  ;;  %v2470_v44 = vmul.f32 %v2458_v27, %v2454_v50  ;;  %v2486_v3 = vmul.f32 %v2482_v35, %v2474_v53  ;;  %v2490_v49 = vmul.f32 %v2482_v35, %v9516_v26  ;;  %v2718_v50 = vld [vmem:[#allocation2 + $0xa8] sm:$0x7f]  ;;  %v5327_v7 = vld [vmem:[%s9430_s7 + $0x290] sm:$0xf0] }
 0x2a6   : > { %4175 = vmatpush.bf16.msrb.mxu2 %v5378_v40  ;;  %v3386_v43 = vor.u32 %v3385_v14, %v3382_v17  ;;  %4139 = vmatpush.bf16.msra.mxu3 %v5406_v61  ;;  %v2494_v40 = vmul.f32 %v2482_v35, %v2478_v23  ;;  %v2566_v29 = vmul.f32 %v2562_v56, %v2554_v36  ;;  %v2642_v8 = vperm.slane %v8637_v55, 3  ;;  %v5471_v57 = vld [vmem:[%s9430_s7 + $0x3b0] sm:$0xf0]  ;;  %v8768_v21 = vld [vmem:[%s9430_s7 + $0x8] sm:$0xf] }
 0x2a7   : > { %v2570_v13 = vmul.f32 %v2562_v56, %v9516_v26  ;;  %v2512_v2 = vrot.slane %v2486_v3, 1  ;;  %v2513_v15 = vrot.slane %v2490_v49, 1  ;;  %v2574_v18 = vmul.f32 %v2562_v56, %v2558_v47  ;;  %v2854_v47 = vld [vmem:[#allocation2 + $0x60] sm:$0xfe] }
 0x2a8   : > { %v8659_v54 = vsel %vm3378_vm11, %v3386_v43, %v3394_v52  ;;  %4167 = vmatpush.bf16.msrb.mxu1 %v5154_v11  ;;  %v2523_v32 = vrot.slane %v2494_v40, 1  ;;  %v2592_v34 = vrot.slane %v2566_v29, 2  ;;  %v2646_v1 = vmul.f32 %v2642_v8, %v2634_v24 }
 0x2a9   : > { %v2593_v53 = vrot.slane %v2570_v13, 2  ;;  %4099 = vmatmul.bf16.vlgmr.msra.gmra.mxu0 %v8659_v54  ;;  %v2514_v61 = vsel %vm580_vm3, %v2512_v2, %v2513_v15  ;;  %v2603_v45 = vrot.slane %v2574_v18, 2  ;;  %v2722_v27 = vperm.slane %v8637_v55, 4 }
 0x2aa   : > { %4176 = vmatpush.bf16.msrb.mxu2 %v5362_v22  ;;  %v2650_v22 = vmul.f32 %v2642_v8, %v9516_v26  ;;  %4203 = vmatpush.bf16.msra.mxu0 %v5126_v58  ;;  %v2524_v36 = vsel %vm580_vm3, %v2513_v15, %v2523_v32  ;;  %v2542_v11 = vadd.f32 %v2514_v61, %v2462_v39  ;;  %v2672_v35 = vrot.slane %v2646_v1, 3  ;;  %v2442_v15 = vld [vmem:[%s9428_s5 + $0x28] sm:$0x7]  ;;  %v2938_v1 = vld [vmem:[#allocation2 + $0xb8] sm:$0x3] }
 0x2ab   : > { %4140 = vmatpush.bf16.msra.mxu3 %v5390_v60  ;;  %v2550_v10 = vadd.f32 %v2523_v32, %v2470_v44  ;;  %v2546_v41 = vadd.f32 %v2524_v36, %v2466_v28  ;;  %v2594_v9 = vsel %vm641_vm5, %v2592_v34, %v2593_v53  ;;  %v2604_v23 = vsel %vm641_vm5, %v2593_v53, %v2603_v45 }
 0x2ac   : > { %4168 = vmatpush.bf16.msrb.mxu1 %v5138_v5  ;;  %v2622_v19 = vadd.f32 %v2594_v9, %v2542_v11  ;;  %v2654_v58 = vmul.f32 %v2642_v8, %v2638_v12  ;;  %v2673_v60 = vrot.slane %v2650_v22, 3  ;;  %v2726_v17 = vmul.f32 %v2722_v27, %v2714_v51  ;;  %v2934_v12 = vld [vmem:[#allocation2 + $0x60] sm:$0xfc] }
 0x2ad   : > { %v2630_v16 = vadd.f32 %v2603_v45, %v2550_v10  ;;  %v2626_v56 = vadd.f32 %v2604_v23, %v2546_v41  ;;  %v2730_v14 = vmul.f32 %v2722_v27, %v9516_v26  ;;  %v2734_v39 = vmul.f32 %v2722_v27, %v2718_v50 }
 0x2ae   : > { %4177 = vmatpush.bf16.msrb.mxu2 %v5346_v4  ;;  %4204 = vmatpush.bf16.msra.mxu0 %v5110_v25  ;;  %v2674_v4 = vsel %vm694_vm4, %v2672_v35, %v2673_v60  ;;  %v2798_v28 = vperm.slane %v8637_v55, 5  ;;  %v2862_v5 = vperm.slane %v8637_v55, 6  ;;  %v2752_v44 = vrot.slane %v2726_v17, 4  ;;  %v3019_v35 = vld [vmem:[#allocation2 + $0xb8] sm:$0x7] }
 0x2af   : > { %4189 = vmatpush.bf16.msrb.mxu3 %v5506_v31  ;;  %v2683_v31 = vrot.slane %v2654_v58, 3  ;;  %v2702_v52 = vadd.f32 %v2674_v4, %v2622_v19  ;;  %v2753_v3 = vrot.slane %v2730_v14, 4  ;;  %v2763_v49 = vrot.slane %v2734_v39, 4  ;;  %v3051_v14 = vld [vmem:[#allocation2 + $0x60] sm:$0xf0] }
 0x2b0   : > { %v2802_v29 = vmul.f32 %v2798_v28, %v9516_v26  ;;  %v2806_v37 = vmul.f32 %v2798_v28, %v8249_v6  ;;  %v2866_v2 = vmul.f32 %v2862_v5, %v2854_v47  ;;  %v2870_v53 = vmul.f32 %v2862_v5, %v8249_v6  ;;  %v3055_v39 = vld [vmem:[#allocation2 + $0xb8] sm:$0xf]  ;;  %v3131_v47 = vld [vmem:[#allocation2 + $0x60] sm:$0xe0] }
 0x2b1   : > { %v2684_v43 = vsel %vm694_vm4, %v2673_v60, %v2683_v31  ;;  %v2710_v40 = vadd.f32 %v2683_v31, %v2630_v16  ;;  %v2754_v13 = vsel %vm747_vm6, %v2752_v44, %v2753_v3  ;;  %v2764_v24 = vsel %vm747_vm6, %v2753_v3, %v2763_v49  ;;  %v8702_v60 = vld [vmem:[%s9430_s7 + $0x1e8] sm:$0xf]  ;;  %v3135_v3 = vld [vmem:[#allocation2 + $0xb8] sm:$0x1f] }
 0x2b2   : > { %v2706_v25 = vadd.f32 %v2684_v43, %v2626_v56  ;;  %4205 = vmatpush.bf16.msra.mxu0 %v5094_v30  ;;  %v2782_v18 = vadd.f32 %v2754_v13, %v2702_v52  ;;  %v2818_v26 = vrot.slane %v2802_v29, 5  ;;  %v2823_v32 = vrot.slane %v2806_v37, 5  ;;  %v3015_v30 = vld [vmem:[#allocation2 + $0x60] sm:$0xf8] }
 0x2b3   : > { %v2790_v8 = vadd.f32 %v2763_v49, %v2710_v40  ;;  %v2874_v61 = vmul.f32 %v2862_v5, %v2858_v38  ;;  %v2890_v45 = vrot.slane %v2866_v2, 6  ;;  %v2942_v59 = vperm.slane %v8637_v55, 7  ;;  %v5487_v2 = vld [vmem:[%s9430_s7 + $0x3d0] sm:$0xf0] }
 0x2b4   : > { %v2786_v34 = vadd.f32 %v2764_v24, %v2706_v25  ;;  %v2824_v22 = vsel %vm808_vm7, %v2818_v26, %v2823_v32  ;;  %v2842_v36 = vadd.f32 %v2818_v26, %v2782_v18  ;;  %v2895_v10 = vrot.slane %v2870_v53, 6  ;;  %v5654_v18 = vld [vmem:[%s9430_s7 + $0x34] sm:$0xf0]  ;;  %v8743_v53 = vld [vmem:[%s9430_s7 + $0x1c8] sm:$0xf] }
 0x2b5   : > { %v2850_v42 = vadd.f32 %v2823_v32, %v2790_v8  ;;  %v2903_v51 = vrot.slane %v2874_v61, 6  ;;  %v3023_v50 = vperm.slane %v2442_v15, 0  ;;  %v2946_v41 = vmul.f32 %v2942_v59, %v2934_v12  ;;  %v8748_v61 = vld [vmem:[%s9430_s7 + $0x1d4] sm:$0xf0] }
 0x2b6   : > { %v2846_v11 = vadd.f32 %v2824_v22, %v2786_v34  ;;  %4206 = vmatpush.bf16.msra.mxu0 %v5078_v62  ;;  %v2922_v27 = vadd.f32 %v2890_v45, %v2842_v36  ;;  %v2950_v9 = vmul.f32 %v2942_v59, %v8249_v6  ;;  %v2954_v23 = vmul.f32 %v2942_v59, %v2938_v1  ;;  %v5311_v36 = vld [vmem:[%s9430_s7 + $0x270] sm:$0xf0] }
 0x2b7   : > { %v2896_v19 = vsel %vm869_vm8, %v2890_v45, %v2895_v10  ;;  %v2904_v16 = vsel %vm869_vm8, %v2895_v10, %v2903_v51  ;;  %v3027_v55 = vmul.f32 %v3023_v50, %v3015_v30  ;;  %v3031_v58 = vmul.f32 %v3023_v50, %v8249_v6  ;;  %v8779_v51 = vld [vmem:[%s9430_s7 + $0xec] sm:$0xf] }
 0x2b8   : > { %v2926_v0 = vadd.f32 %v2896_v19, %v2846_v11  ;;  %v2930_v62 = vadd.f32 %v2904_v16, %v2850_v42  ;;  %v2971_v56 = vrot.slane %v2946_v41, 7  ;;  %v2976_v17 = vrot.slane %v2950_v9, 7  ;;  %v5763_v42 = vld [vmem:[%s9430_s7 + $0x3a4] sm:$0xf]  ;;  %v8794_v41 = vld [vmem:[%s9430_s7 + $0x1b4] sm:$0xf0] }
 0x2b9   : > { %4155 = vmatmul.bf16.vlgmr.msrb.gmra.mxu0 %v8659_v54  ;;  %v2984_v4 = vrot.slane %v2954_v23, 7  ;;  %v3035_v31 = vmul.f32 %v3023_v50, %v3019_v35  ;;  %v3059_v28 = vperm.slane %v2442_v15, 1  ;;  %v3139_v5 = vperm.slane %v2442_v15, 2  ;;  %v5029_v15 = vld [vmem:[%s9430_s7 + $0x28] sm:$0xf] }
 0x2ba   : > { %4207 = vmatpush.bf16.msra.mxu0 %v5062_v48  ;;  %v2977_v52 = vsel %vm2969_vm10, %v2971_v56, %v2976_v17  ;;  %v3003_v44 = vadd.f32 %v2971_v56, %v2922_v27  ;;  %v8715_v49 = vperm.slane %v8362_v46, 1  ;;  %v5254_v43 = vor.u32 %v8707_v63, %v8702_v60  ;;  %v5767_v46 = vld [vmem:[%s9430_s7 + $0x3c4] sm:$0xf]  ;;  %v8784_v50 = vld [vmem:[%s9430_s7 + $0xf8] sm:$0xf0] }
 0x2bb   : > { %v2985_v40 = vsel %vm2969_vm10, %v2976_v17, %v2984_v4  ;;  %v3007_v29 = vadd.f32 %v2977_v52, %v2926_v0  ;;  %v3063_v37 = vmul.f32 %v3059_v28, %v3051_v14  ;;  %v3067_v38 = vmul.f32 %v3059_v28, %v8249_v6  ;;  %v8789_v27 = vld [vmem:[%s9430_s7 + $0x1a8] sm:$0xf]  ;;  %v8800_v16 = vld [vmem:[%s9430_s7 + $0x244] sm:$0xf]  ;;  %v5455_v0 = vld [vmem:[%s9430_s7 + $0x390] sm:$0xf0] }
 0x2bc   : > { %v3011_v48 = vadd.f32 %v2985_v40, %v2930_v62  ;;  %v3039_v25 = vadd.f32 %v3027_v55, %v3003_v44  ;;  %v3071_v13 = vmul.f32 %v3059_v28, %v3055_v39  ;;  %v3143_v24 = vmul.f32 %v3139_v5, %v3131_v47  ;;  %v8805_v55 = vld [vmem:[%s9430_s7 + $0x250] sm:$0xf0]  ;;  %v8824_v39 = vld [vmem:[%s9430_s7 + $0xcc] sm:$0xf]  ;;  %v8829_v4 = vld [vmem:[%s9430_s7 + $0xd8] sm:$0xf0] }
 0x2bd   : > { %v3043_v8 = vadd.f32 %v3031_v58, %v3007_v29  ;;  %v3089_v26 = vrot.slane %v3063_v37, 1  ;;  %v3090_v32 = vrot.slane %v3067_v38, 1  ;;  %v3147_v34 = vmul.f32 %v3139_v5, %v8249_v6  ;;  %v5723_v6 = vld [vmem:[%s9430_s7 + $0x264] sm:$0xf]  ;;  %v8818_v62 = vld [vmem:[%s9428_s5 + $0x10] sm:$0xff] }
 0x2be   : > { %4208 = vmatpush.bf16.msra.mxu0 %v5046_v33  ;;  %v3047_v45 = vadd.f32 %v3035_v31, %v3011_v48  ;;  %v3100_v12 = vrot.slane %v3071_v13, 1  ;;  %v3151_v1 = vmul.f32 %v3139_v5, %v3135_v3  ;;  %v3169_v22 = vrot.slane %v3143_v24, 2  ;;  %v8773_v33 = vld [vmem:[%s9430_s7 + $0x14] sm:$0xf0]  ;;  %v8810_v58 = vld [vmem:[%s9430_s7 + $0x384] sm:$0xf] }
 0x2bf   : > { %v3091_v59 = vsel %vm580_vm3, %v3089_v26, %v3090_v32  ;;  %v3170_v30 = vrot.slane %v3147_v34, 2  ;;  %v5330_v11 = vor.u32 %v5727_v20, %v5327_v7  ;;  %v5490_v10 = vor.u32 %v5767_v46, %v5487_v2  ;;  %v8834_v31 = vld [vmem:[%s9430_s7 + $0x188] sm:$0xf]  ;;  %v8839_v28 = vld [vmem:[%s9430_s7 + $0x194] sm:$0xf0] }
 0x2c0   : > { %v3101_v9 = vsel %vm580_vm3, %v3090_v32, %v3100_v12  ;;  %v3119_v23 = vadd.f32 %v3091_v59, %v3039_v25  ;;  %v3127_v35 = vadd.f32 %v3100_v12, %v3047_v45  ;;  %v3180_v19 = vrot.slane %v3151_v1, 2  ;;  %v8844_v47 = vld [vmem:[%s9430_s7 + $0x224] sm:$0xf]  ;;  %v8852_v40 = vld [vmem:[%s9430_s7 + $0x230] sm:$0xf0] }
 0x2c1   : > { %v3123_v56 = vadd.f32 %v3101_v9, %v3043_v8  ;;  %v3171_v17 = vsel %vm641_vm5, %v3169_v22, %v3170_v30  ;;  %4178 = vmatpush.bf16.msrb.mxu2 %v5330_v11  ;;  %4190 = vmatpush.bf16.msrb.mxu3 %v5490_v10  ;;  %v5030_v14 = vor.u32 %v5654_v18, %v5029_v15  ;;  %v8857_v29 = vld [vmem:[%s9430_s7 + $0x364] sm:$0xf]  ;;  %v8862_v37 = vld [vmem:[%s9430_s7 + $0x370] sm:$0xf0]  ;;  %v8869_v48 = vld [vmem:[%s9430_s7 + $0xac] sm:$0xf] }
 0x2c2   : > { %v3181_v5 = vsel %vm641_vm5, %v3170_v30, %v3180_v19  ;;  %v3199_v52 = vadd.f32 %v3171_v17, %v3119_v23  ;;  %v3207_v44 = vadd.f32 %v3180_v19, %v3127_v35  ;;  %v5238_v3 = vor.u32 %v8748_v61, %v8743_v53  ;;  %v8874_v25 = vld [vmem:[%s9430_s7 + $0xb8] sm:$0xf0]  ;;  %v8879_v13 = vld [vmem:[%s9430_s7 + $0x168] sm:$0xf]  ;;  %v8890_v8 = vld [vmem:[%s9430_s7 + $0x174] sm:$0xf0] }
 0x2c3   : > { %v3203_v38 = vadd.f32 %v3181_v5, %v3123_v56  ;;  %4209 = vmatpush.bf16.msra.mxu0 %v5030_v14  ;;  %v5314_v20 = vor.u32 %v5723_v6, %v5311_v36  ;;  %v5474_v7 = vor.u32 %v5763_v42, %v5471_v57  ;;  %v5014_v46 = vor.u32 %v8773_v33, %v8768_v21  ;;  %v8895_v26 = vld [vmem:[%s9430_s7 + $0x204] sm:$0xf]  ;;  %v8900_v32 = vld [vmem:[%s9430_s7 + $0x210] sm:$0xf0]  ;;  %v2479_v56 = vld [vmem:[#allocation2 + $0x20] sm:$0xf] }
 0x2c4   : > { %v3221_v24 = vadd.f32 %v8715_v49, %v3199_v52  ;;  %v3229_v2 = vadd.f32 %v8715_v49, %v3207_v44  ;;  %v5130_v15 = vor.u32 %v8779_v51, %v8784_v50  ;;  %v5222_v18 = vor.u32 %v8794_v41, %v8789_v27  ;;  %v8909_v1 = vld [vmem:[%s9430_s7 + $0x344] sm:$0xf]  ;;  %v8914_v22 = vld [vmem:[%s9430_s7 + $0x350] sm:$0xf0]  ;;  %v2455_v51 = vld [vmem:[#allocation2 + $0x20] sm:$0x7] }
 0x2c5   : > { %v3225_v34 = vadd.f32 %v8715_v49, %v3203_v38  ;;  %4179 = vmatpush.bf16.msrb.mxu2 %v5314_v20  ;;  %4191 = vmatpush.bf16.msrb.mxu3 %v5474_v7  ;;  %v5298_v45 = vor.u32 %v8800_v16, %v8805_v55  ;;  %v5458_v12 = vor.u32 %v8810_v58, %v5455_v0  ;;  %v2459_v6 = vperm.slane %v8818_v62, 0  ;;  %v2447_v21 = vld [vmem:[#allocation2 + $0xd0] sm:$0xf8]  ;;  %v2559_v44 = vld [vmem:[#allocation2 + $0x20] sm:$0x1f] }
 0x2c6   : > { %v3237_v49 = vpack.c.bf16 %v3229_v2, %v3229_v2  ;;  %v5114_v36 = vor.u32 %v8824_v39, %v8829_v4  ;;  %v5206_v42 = vor.u32 %v8839_v28, %v8834_v31  ;;  %v5282_v57 = vor.u32 %v8844_v47, %v8852_v40  ;;  %v8923_v33 = vld [vmem:[#allocation2 + $0x10] sm:$0xff]  ;;  %v2859_v61 = vld [vmem:[#allocation2 + $0xe0] sm:$0x1] }
 0x2c7   : > { %v3233_v59 = vpack.c.bf16 %v3225_v34, %v3221_v24  ;;  %4210 = vmatpush.bf16.msra.mxu0 %v5014_v46  ;;  %v5442_v30 = vor.u32 %v8857_v29, %v8862_v37  ;;  %v5098_v11 = vor.u32 %v8869_v48, %v8874_v25  ;;  %v5190_v10 = vor.u32 %v8890_v8, %v8879_v13  ;;  %v2475_v0 = vld [vmem:[#allocation2 + $0xd0] sm:$0xf0]  ;;  %v3056_v31 = vld [vmem:[#allocation2 + $0xe0] sm:$0xf] }
 0x2c8   : > { %v3405_v50 = vshrl.u32 %v3237_v49, 16  ;;  %v3408_v9 = vshll.u32 %v3237_v49, 16  ;;  %v5266_v23 = vor.u32 %v8895_v26, %v8900_v32  ;;  %v5426_v35 = vor.u32 %v8909_v1, %v8914_v22  ;;  %v2555_v47 = vld [vmem:[#allocation2 + $0xd0] sm:$0xe0]  ;;  %v2639_v22 = vld [vmem:[#allocation2 + $0x20] sm:$0x3f] }
 0x2c9   : > { %v3397_v19 = vshrl.u32 %v3233_v59, 16  ;;  %v3400_v16 = vshll.u32 %v3233_v59, 16  ;;  %4180 = vmatpush.bf16.msrb.mxu2 %v5298_v45  ;;  %4192 = vmatpush.bf16.msrb.mxu3 %v5458_v12  ;;  %v2463_v55 = vmul.f32 %v2459_v6, %v2447_v21  ;;  %v2467_v58 = vmul.f32 %v2459_v6, %v8923_v33  ;;  %v2635_v46 = vld [vmem:[#allocation2 + $0xd0] sm:$0xc0] }
 0x2ca   : > { %v3407_v17 = vrot.slane %v3405_v50, 1  ;;  %v3410_v14 = vrot.slane %v3408_v9, 2  ;;  %4211 = vmatmul.bf16.vlgmr.msra.gmra.mxu0 %v8659_v54  ;;  %v2471_v39 = vmul.f32 %v2459_v6, %v2455_v51  ;;  %v2483_v4 = vperm.slane %v8818_v62, 1  ;;  %v2715_v59 = vld [vmem:[#allocation2 + $0xd0] sm:$0x80] }
 0x2cb   : > { %4259 = vmatpush.bf16.msrb.mxu0 %v5130_v15  ;;  %v3399_v5 = vrot.slane %v3397_v19, 1  ;;  %v3402_v52 = vrot.slane %v3400_v16, 2  ;;  %v2563_v40 = vperm.slane %v8818_v62, 2  ;;  %v2643_v29 = vperm.slane %v8818_v62, 3  ;;  %v2719_v19 = vld [vmem:[#allocation2 + $0x20] sm:$0x7f] }
 0x2cc   : > { %v3411_v37 = vor.u32 %v3410_v14, %v3407_v17  ;;  %v2487_v38 = vmul.f32 %v2483_v4, %v2475_v0  ;;  %v2491_v20 = vmul.f32 %v2483_v4, %v8923_v33  ;;  %v2495_v7 = vmul.f32 %v2483_v4, %v2479_v56  ;;  %v3132_v28 = vld [vmem:[#allocation2 + $0x10] sm:$0xe0] }
 0x2cd   : > { %v3403_v48 = vor.u32 %v3402_v52, %v3399_v5  ;;  %4181 = vmatpush.bf16.msrb.mxu2 %v5282_v57  ;;  %4193 = vmatpush.bf16.msrb.mxu3 %v5442_v30  ;;  %v2567_v25 = vmul.f32 %v2563_v40, %v2555_v47  ;;  %v2571_v24 = vmul.f32 %v2563_v40, %v8923_v33  ;;  %v2723_v2 = vperm.slane %v8818_v62, 4  ;;  %v2855_v47 = vld [vmem:[#allocation2 + $0x10] sm:$0xfe] }
 0x2ce   : > { %v2515_v15 = vrot.slane %v2487_v38, 1  ;;  %v2516_v26 = vrot.slane %v2491_v20, 1  ;;  %v2525_v32 = vrot.slane %v2495_v7, 1  ;;  %v2575_v34 = vmul.f32 %v2563_v40, %v2559_v44 }
 0x2cf   : > { %4260 = vmatpush.bf16.msrb.mxu0 %v5114_v36  ;;  %v8944_v45 = vsel %vm3378_vm11, %v3403_v48, %v3411_v37  ;;  %v2595_v12 = vrot.slane %v2567_v25, 2  ;;  %v2596_v1 = vrot.slane %v2571_v24, 2  ;;  %v2647_v6 = vmul.f32 %v2643_v29, %v2635_v46  ;;  %v2939_v24 = vld [vmem:[#allocation2 + $0xe0] sm:$0x3] }
 0x2d0   : > { %4113 = vmatmul.bf16.vlgmr.msra.gmra.mxu1 %v8944_v45  ;;  %v2517_v49 = vsel %vm580_vm3, %v2515_v15, %v2516_v26  ;;  %v2526_v36 = vsel %vm580_vm3, %v2516_v26, %v2525_v32  ;;  %v2551_v57 = vadd.f32 %v2525_v32, %v2471_v39  ;;  %v2605_v21 = vrot.slane %v2575_v34, 2 }
 0x2d1   : > { %4217 = vmatpush.bf16.msra.mxu1 %v5254_v43  ;;  %4182 = vmatpush.bf16.msrb.mxu2 %v5266_v23  ;;  %v2543_v30 = vadd.f32 %v2517_v49, %v2463_v55  ;;  %v2547_v51 = vadd.f32 %v2526_v36, %v2467_v58  ;;  %v2597_v50 = vsel %vm641_vm5, %v2595_v12, %v2596_v1  ;;  %v2675_v9 = vrot.slane %v2647_v6, 3  ;;  %v8956_v55 = vld [vmem:[#allocation2 + $0x20] sm:$0xff] }
 0x2d2   : > { %4194 = vmatpush.bf16.msrb.mxu3 %v5426_v35  ;;  %v2631_v16 = vadd.f32 %v2605_v21, %v2551_v57  ;;  %v2651_v0 = vmul.f32 %v2643_v29, %v8923_v33  ;;  %v2655_v56 = vmul.f32 %v2643_v29, %v2639_v22  ;;  %v2727_v39 = vmul.f32 %v2723_v2, %v2715_v59  ;;  %v2443_v22 = vld [vmem:[%s9428_s5 + $0x30] sm:$0x7] }
 0x2d3   : > { %4261 = vmatpush.bf16.msrb.mxu0 %v5098_v11  ;;  %v2606_v11 = vsel %vm641_vm5, %v2596_v1, %v2605_v21  ;;  %v2623_v17 = vadd.f32 %v2597_v50, %v2543_v30  ;;  %v2731_v60 = vmul.f32 %v2723_v2, %v8923_v33  ;;  %v2735_v23 = vmul.f32 %v2723_v2, %v2719_v19  ;;  %v3020_v19 = vld [vmem:[#allocation2 + $0xe0] sm:$0x7] }
 0x2d4   : > { %v2627_v14 = vadd.f32 %v2606_v11, %v2547_v51  ;;  %v2676_v63 = vrot.slane %v2651_v0, 3  ;;  %v2685_v43 = vrot.slane %v2655_v56, 3  ;;  %v2799_v58 = vperm.slane %v8818_v62, 5  ;;  %v3052_v56 = vld [vmem:[#allocation2 + $0x10] sm:$0xf0] }
 0x2d5   : > { %4218 = vmatpush.bf16.msra.mxu1 %v5238_v3  ;;  %v2755_v35 = vrot.slane %v2727_v39, 4  ;;  %v2756_v4 = vrot.slane %v2731_v60, 4  ;;  %v2863_v5 = vperm.slane %v8818_v62, 6  ;;  %v2943_v52 = vperm.slane %v8818_v62, 7  ;;  %v2935_v3 = vld [vmem:[#allocation2 + $0x10] sm:$0xfc] }
 0x2d6   : > { %v2677_v44 = vsel %vm694_vm4, %v2675_v9, %v2676_v63  ;;  %v2686_v40 = vsel %vm694_vm4, %v2676_v63, %v2685_v43  ;;  %v2711_v29 = vadd.f32 %v2685_v43, %v2631_v16  ;;  %v2765_v37 = vrot.slane %v2735_v23, 4  ;;  %v3016_v9 = vld [vmem:[#allocation2 + $0x10] sm:$0xf8] }
 0x2d7   : > { %v2703_v38 = vadd.f32 %v2677_v44, %v2623_v17  ;;  %v2707_v20 = vadd.f32 %v2686_v40, %v2627_v14  ;;  %v2757_v7 = vsel %vm747_vm6, %v2755_v35, %v2756_v4  ;;  %v2803_v53 = vmul.f32 %v2799_v58, %v8923_v33 }
 0x2d8   : > { %v2766_v46 = vsel %vm747_vm6, %v2756_v4, %v2765_v37  ;;  %v2791_v48 = vadd.f32 %v2765_v37, %v2711_v29  ;;  %v2807_v25 = vmul.f32 %v2799_v58, %v8956_v55  ;;  %v2867_v62 = vmul.f32 %v2863_v5, %v2855_v47  ;;  %v8991_v4 = vld [vmem:[%s9430_s7 + $0x2e8] sm:$0xf]  ;;  %v8996_v47 = vld [vmem:[%s9430_s7 + $0x2f4] sm:$0xf0]  ;;  %v5079_v37 = vld [vmem:[%s9430_s7 + $0x98] sm:$0xf0] }
 0x2d9   : > { %4219 = vmatpush.bf16.msra.mxu1 %v5222_v18  ;;  %v2783_v2 = vadd.f32 %v2757_v7, %v2703_v38  ;;  %v2787_v15 = vadd.f32 %v2766_v46, %v2707_v20  ;;  %v2819_v26 = vrot.slane %v2803_v53, 5  ;;  %v2871_v32 = vmul.f32 %v2863_v5, %v8956_v55  ;;  %v5173_v38 = vld [vmem:[%s9430_s7 + $0x148] sm:$0xf]  ;;  %v5690_v20 = vld [vmem:[%s9430_s7 + $0x154] sm:$0xf0] }
 0x2da   : > { %v2825_v34 = vrot.slane %v2807_v25, 5  ;;  %v2875_v33 = vmul.f32 %v2863_v5, %v2859_v61  ;;  %v2891_v12 = vrot.slane %v2867_v62, 6  ;;  %v2947_v1 = vmul.f32 %v2943_v52, %v2935_v3  ;;  %v5664_v5 = vld [vmem:[%s9430_s7 + $0x8c] sm:$0xf]  ;;  %v5747_v61 = vld [vmem:[%s9430_s7 + $0x324] sm:$0xf] }
 0x2db   : > { %v2843_v6 = vadd.f32 %v2819_v26, %v2783_v2  ;;  %v2897_v49 = vrot.slane %v2871_v32, 6  ;;  %v2951_v36 = vmul.f32 %v2943_v52, %v8956_v55  ;;  %v2955_v57 = vmul.f32 %v2943_v52, %v2939_v24  ;;  %v5407_v3 = vld [vmem:[%s9430_s7 + $0x330] sm:$0xf0]  ;;  %v9029_v24 = vld [vmem:[%s9430_s7 + $0x2c8] sm:$0xf] }
 0x2dc   : > { %v2826_v27 = vsel %vm808_vm7, %v2819_v26, %v2825_v34  ;;  %v2851_v41 = vadd.f32 %v2825_v34, %v2791_v48  ;;  %v2905_v18 = vrot.slane %v2875_v33, 6  ;;  %v2972_v21 = vrot.slane %v2947_v1, 7  ;;  %v9034_v2 = vld [vmem:[%s9430_s7 + $0x2d4] sm:$0xf0]  ;;  %v5157_v1 = vld [vmem:[%s9430_s7 + $0x128] sm:$0xf] }
 0x2dd   : > { %4220 = vmatpush.bf16.msra.mxu1 %v5206_v42  ;;  %v2847_v59 = vadd.f32 %v2826_v27, %v2787_v15  ;;  %v2898_v30 = vsel %vm869_vm8, %v2891_v12, %v2897_v49  ;;  %v2923_v51 = vadd.f32 %v2891_v12, %v2843_v6  ;;  %v2978_v50 = vrot.slane %v2951_v36, 7  ;;  %v3136_v42 = vld [vmem:[#allocation2 + $0xe0] sm:$0x1f]  ;;  %v5660_v15 = vld [vmem:[%s9430_s7 + $0x6c] sm:$0xf] }
 0x2de   : > { %v2906_v11 = vsel %vm869_vm8, %v2897_v49, %v2905_v18  ;;  %v2986_v16 = vrot.slane %v2955_v57, 7  ;;  %v3024_v0 = vperm.slane %v2443_v22, 0  ;;  %v3060_v17 = vperm.slane %v2443_v22, 1  ;;  %v5063_v12 = vld [vmem:[%s9430_s7 + $0x78] sm:$0xf0] }
 0x2df   : > { %v2927_v14 = vadd.f32 %v2898_v30, %v2847_v59  ;;  %v2931_v39 = vadd.f32 %v2906_v11, %v2851_v41  ;;  %v2979_v60 = vsel %vm2969_vm10, %v2972_v21, %v2978_v50  ;;  %v3004_v63 = vadd.f32 %v2972_v21, %v2923_v51  ;;  %v5743_v57 = vld [vmem:[%s9430_s7 + $0x304] sm:$0xf]  ;;  %v5391_v27 = vld [vmem:[%s9430_s7 + $0x310] sm:$0xf0]  ;;  %v9062_v30 = vld [vmem:[%s9428_s5 + $0x18] sm:$0xff] }
 0x2e0   : > { %4169 = vmatmul.bf16.vlgmr.msrb.gmra.mxu1 %v8944_v45  ;;  %v2987_v43 = vsel %vm2969_vm10, %v2978_v50, %v2986_v16  ;;  %v3028_v23 = vmul.f32 %v3024_v0, %v3016_v9  ;;  %v3032_v58 = vmul.f32 %v3024_v0, %v8956_v55  ;;  %v3036_v35 = vmul.f32 %v3024_v0, %v3020_v19 }
 0x2e1   : > { %4221 = vmatpush.bf16.msra.mxu1 %v5190_v10  ;;  %v3008_v52 = vadd.f32 %v2979_v60, %v2927_v14  ;;  %v3012_v44 = vadd.f32 %v2987_v43, %v2931_v39  ;;  %v3064_v40 = vmul.f32 %v3060_v17, %v3052_v56  ;;  %v3068_v29 = vmul.f32 %v3060_v17, %v8956_v55  ;;  %v9017_v10 = vld [vmem:[%s9429_s6] sm:$0xf]  ;;  %v9066_v14 = vld [vmem:[#allocation2 + $0x28] sm:$0xff] }
 0x2e2   : > { %v3040_v7 = vadd.f32 %v3028_v23, %v3004_v63  ;;  %v3072_v13 = vmul.f32 %v3060_v17, %v3056_v31  ;;  %v3140_v8 = vperm.slane %v2443_v22, 2  ;;  %v3214_v53 = vperm.slane %v9017_v10, 2  ;;  %v2448_v17 = vld [vmem:[#allocation2 + $0xe8] sm:$0xf8]  ;;  %v2456_v31 = vld [vmem:[#allocation2 + $0x88] sm:$0x7] }
 0x2e3   : > { %v3044_v46 = vadd.f32 %v3032_v58, %v3008_v52  ;;  %v3048_v48 = vadd.f32 %v3036_v35, %v3012_v44  ;;  %v3092_v25 = vrot.slane %v3064_v40, 1  ;;  %v3093_v62 = vrot.slane %v3068_v29, 1  ;;  %v2480_v58 = vld [vmem:[#allocation2 + $0x88] sm:$0xf] }
 0x2e4   : > { %v3102_v26 = vrot.slane %v3072_v13, 1  ;;  %v3144_v32 = vmul.f32 %v3140_v8, %v3132_v28  ;;  %v3148_v34 = vmul.f32 %v3140_v8, %v8956_v55  ;;  %v3152_v33 = vmul.f32 %v3140_v8, %v3136_v42  ;;  %v5686_v55 = vld [vmem:[%s9430_s7 + $0x134] sm:$0xf0]  ;;  %v2476_v42 = vld [vmem:[#allocation2 + $0xe8] sm:$0xf0] }
 0x2e5   : > { %v3094_v22 = vsel %vm580_vm3, %v3092_v25, %v3093_v62  ;;  %v5382_v6 = vor.u32 %v8996_v47, %v8991_v4  ;;  %v5082_v49 = vor.u32 %v5664_v5, %v5079_v37  ;;  %v5174_v36 = vor.u32 %v5690_v20, %v5173_v38  ;;  %v2556_v5 = vld [vmem:[#allocation2 + $0xe8] sm:$0xe0]  ;;  %v2560_v37 = vld [vmem:[#allocation2 + $0x88] sm:$0x1f] }
 0x2e6   : > { %v3103_v41 = vsel %vm580_vm3, %v3093_v62, %v3102_v26  ;;  %v3120_v18 = vadd.f32 %v3094_v22, %v3040_v7  ;;  %v3128_v21 = vadd.f32 %v3102_v26, %v3048_v48  ;;  %v3172_v59 = vrot.slane %v3144_v32, 2 }
 0x2e7   : > { %v3124_v51 = vadd.f32 %v3103_v41, %v3044_v46  ;;  %v3173_v50 = vrot.slane %v3148_v34, 2  ;;  %v3182_v9 = vrot.slane %v3152_v33, 2  ;;  %4262 = vmatpush.bf16.msrb.mxu0 %v5082_v49  ;;  %4222 = vmatpush.bf16.msra.mxu1 %v5174_v36  ;;  %v5410_v19 = vor.u32 %v5747_v61, %v5407_v3  ;;  %v2636_v41 = vld [vmem:[#allocation2 + $0xe8] sm:$0xc0] }
 0x2e8   : > { %v5366_v11 = vor.u32 %v9034_v2, %v9029_v24  ;;  %v5066_v16 = vor.u32 %v5660_v15, %v5063_v12  ;;  %v5158_v0 = vor.u32 %v5686_v55, %v5157_v1  ;;  %v5394_v56 = vor.u32 %v5743_v57, %v5391_v27  ;;  %v2444_v24 = vld [vmem:[%s9428_s5 + $0x38] sm:$0x7] }
 0x2e9   : > { %v3174_v39 = vsel %vm641_vm5, %v3172_v59, %v3173_v50  ;;  %v3183_v60 = vsel %vm641_vm5, %v3173_v50, %v3182_v9  ;;  %v3208_v63 = vadd.f32 %v3182_v9, %v3128_v21  ;;  %4195 = vmatpush.bf16.msrb.mxu3 %v5410_v19  ;;  %v2460_v28 = vperm.slane %v9062_v30, 0  ;;  %v2640_v50 = vld [vmem:[#allocation2 + $0x88] sm:$0x3f] }
 0x2ea   : > { %v3200_v43 = vadd.f32 %v3174_v39, %v3120_v18  ;;  %v3204_v23 = vadd.f32 %v3183_v60, %v3124_v51  ;;  %v2484_v35 = vperm.slane %v9062_v30, 1  ;;  %v2564_v52 = vperm.slane %v9062_v30, 2 }
 0x2eb   : > { %v3230_v44 = vadd.f32 %v3214_v53, %v3208_v63  ;;  %4263 = vmatpush.bf16.msrb.mxu0 %v5066_v16  ;;  %4223 = vmatpush.bf16.msra.mxu1 %v5158_v0  ;;  %v2464_v40 = vmul.f32 %v2460_v28, %v2448_v17  ;;  %v2468_v29 = vmul.f32 %v2460_v28, %v9066_v14  ;;  %v2644_v38 = vperm.slane %v9062_v30, 3  ;;  %v2716_v63 = vld [vmem:[#allocation2 + $0xe8] sm:$0x80] }
 0x2ec   : > { %v3222_v20 = vadd.f32 %v3214_v53, %v3200_v43  ;;  %v3226_v7 = vadd.f32 %v3214_v53, %v3204_v23  ;;  %v2472_v13 = vmul.f32 %v2460_v28, %v2456_v31  ;;  %v2488_v8 = vmul.f32 %v2484_v35, %v2476_v42  ;;  %v2720_v31 = vld [vmem:[#allocation2 + $0x88] sm:$0x7f] }
 0x2ed   : > { %v3238_v61 = vpack.c.bf16 %v3230_v44, %v3230_v44  ;;  %4196 = vmatpush.bf16.msrb.mxu3 %v5394_v56  ;;  %v2492_v3 = vmul.f32 %v2484_v35, %v9066_v14  ;;  %v2496_v46 = vmul.f32 %v2484_v35, %v2480_v58  ;;  %v2568_v48 = vmul.f32 %v2564_v52, %v2556_v5 }
 0x2ee   : > { %v3234_v25 = vpack.c.bf16 %v3226_v7, %v3222_v20  ;;  %v2518_v62 = vrot.slane %v2488_v8, 1  ;;  %v2572_v15 = vmul.f32 %v2564_v52, %v9066_v14  ;;  %v2576_v26 = vmul.f32 %v2564_v52, %v2560_v37  ;;  %v2856_v20 = vld [vmem:[#allocation2 + $0x28] sm:$0xfe]  ;;  %v2860_v8 = vld [vmem:[#allocation2 + $0xa0] sm:$0x1] }
 0x2ef   : > { %v3422_v32 = vshrl.u32 %v3238_v61, 16  ;;  %v3425_v34 = vshll.u32 %v3238_v61, 16  ;;  %v2519_v33 = vrot.slane %v2492_v3, 1  ;;  %v2527_v12 = vrot.slane %v2496_v46, 1  ;;  %v9092_v7 = vld [vmem:[#allocation2 + $0x88] sm:$0xff] }
 0x2f0   : > { %v3414_v1 = vshrl.u32 %v3234_v25, 16  ;;  %v3417_v22 = vshll.u32 %v3234_v25, 16  ;;  %v2598_v53 = vrot.slane %v2568_v48, 2  ;;  %v2599_v49 = vrot.slane %v2572_v15, 2 }
 0x2f1   : > { %v3424_v36 = vrot.slane %v3422_v32, 1  ;;  %v3427_v55 = vrot.slane %v3425_v34, 2  ;;  %v2520_v57 = vsel %vm580_vm3, %v2518_v62, %v2519_v33  ;;  %v2528_v27 = vsel %vm580_vm3, %v2519_v33, %v2527_v12 }
 0x2f2   : > { %v3416_v18 = vrot.slane %v3414_v1, 1  ;;  %v3419_v21 = vrot.slane %v3417_v22, 2  ;;  %v2544_v59 = vadd.f32 %v2520_v57, %v2464_v40  ;;  %v2548_v51 = vadd.f32 %v2528_v27, %v2468_v29 }
 0x2f3   : > { %v3428_v9 = vor.u32 %v3427_v55, %v3424_v36  ;;  %v2552_v19 = vadd.f32 %v2527_v12, %v2472_v13  ;;  %v2600_v16 = vsel %vm641_vm5, %v2598_v53, %v2599_v49  ;;  %v2607_v0 = vrot.slane %v2576_v26, 2  ;;  %v2936_v12 = vld [vmem:[#allocation2 + $0x28] sm:$0xfc] }
 0x2f4   : > { %v3420_v56 = vor.u32 %v3419_v21, %v3416_v18  ;;  %v2624_v17 = vadd.f32 %v2600_v16, %v2544_v59  ;;  %v2648_v39 = vmul.f32 %v2644_v38, %v2636_v41  ;;  %v2652_v60 = vmul.f32 %v2644_v38, %v9066_v14 }
 0x2f5   : > { %v2608_v28 = vsel %vm641_vm5, %v2599_v49, %v2607_v0  ;;  %v2632_v42 = vadd.f32 %v2607_v0, %v2552_v19  ;;  %v2656_v43 = vmul.f32 %v2644_v38, %v2640_v50  ;;  %v2724_v23 = vperm.slane %v9062_v30, 4  ;;  %v2940_v49 = vld [vmem:[#allocation2 + $0xa0] sm:$0x3]  ;;  %v3017_v0 = vld [vmem:[#allocation2 + $0x28] sm:$0xf8] }
 0x2f6   : > { %v9084_v58 = vsel %vm3378_vm11, %v3420_v56, %v3428_v9  ;;  %v2628_v35 = vadd.f32 %v2608_v28, %v2548_v51  ;;  %v2678_v5 = vrot.slane %v2648_v39, 3  ;;  %v2679_v52 = vrot.slane %v2652_v60, 3 }
 0x2f7   : > { %4127 = vmatmul.bf16.vlgmr.msra.gmra.mxu2 %v9084_v58  ;;  %v2687_v44 = vrot.slane %v2656_v43, 3  ;;  %v2728_v40 = vmul.f32 %v2724_v23, %v2716_v63  ;;  %v2732_v29 = vmul.f32 %v2724_v23, %v9066_v14  ;;  %v2736_v37 = vmul.f32 %v2724_v23, %v2720_v31  ;;  %v3053_v63 = vld [vmem:[#allocation2 + $0x28] sm:$0xf0]  ;;  %v3057_v31 = vld [vmem:[#allocation2 + $0xa0] sm:$0xf] }
 0x2f8   : > { %4231 = vmatpush.bf16.msra.mxu2 %v5382_v6  ;;  %v2680_v38 = vsel %vm694_vm4, %v2678_v5, %v2679_v52  ;;  %v2800_v13 = vperm.slane %v9062_v30, 5  ;;  %v2864_v61 = vperm.slane %v9062_v30, 6  ;;  %v2944_v3 = vperm.slane %v9062_v30, 7 }
 0x2f9   : > { %v2688_v46 = vsel %vm694_vm4, %v2679_v52, %v2687_v44  ;;  %v2704_v48 = vadd.f32 %v2680_v38, %v2624_v17  ;;  %v2712_v25 = vadd.f32 %v2687_v44, %v2632_v42  ;;  %v2758_v62 = vrot.slane %v2728_v40, 4  ;;  %v3021_v42 = vld [vmem:[#allocation2 + $0xa0] sm:$0x7]  ;;  %v3133_v40 = vld [vmem:[#allocation2 + $0x28] sm:$0xe0] }
 0x2fa   : > { %v2708_v15 = vadd.f32 %v2688_v46, %v2628_v35  ;;  %v2759_v26 = vrot.slane %v2732_v29, 4  ;;  %v2767_v4 = vrot.slane %v2736_v37, 4  ;;  %v2804_v47 = vmul.f32 %v2800_v13, %v9066_v14  ;;  %v3137_v46 = vld [vmem:[#allocation2 + $0xa0] sm:$0x1f] }
 0x2fb   : > { %v2808_v6 = vmul.f32 %v2800_v13, %v9092_v7  ;;  %v2868_v32 = vmul.f32 %v2864_v61, %v2856_v20  ;;  %v2872_v34 = vmul.f32 %v2864_v61, %v9092_v7  ;;  %v2876_v33 = vmul.f32 %v2864_v61, %v2860_v8 }
 0x2fc   : > { %4232 = vmatpush.bf16.msra.mxu2 %v5366_v11  ;;  %v2760_v30 = vsel %vm747_vm6, %v2758_v62, %v2759_v26  ;;  %v2768_v1 = vsel %vm747_vm6, %v2759_v26, %v2767_v4  ;;  %v2792_v22 = vadd.f32 %v2767_v4, %v2712_v25  ;;  %v2820_v53 = vrot.slane %v2804_v47, 5  ;;  %v5734_v25 = vld [vmem:[%s9430_s7 + $0x2b4] sm:$0xf0]  ;;  %v5656_v47 = vld [vmem:[%s9430_s7 + $0x4c] sm:$0xf] }
 0x2fd   : > { %v2784_v36 = vadd.f32 %v2760_v30, %v2704_v48  ;;  %v2788_v14 = vadd.f32 %v2768_v1, %v2708_v15  ;;  %v2827_v55 = vrot.slane %v2808_v6, 5  ;;  %v2892_v57 = vrot.slane %v2868_v32, 6  ;;  %v5349_v48 = vld [vmem:[%s9430_s7 + $0x2a8] sm:$0xf]  ;;  %v5047_v6 = vld [vmem:[%s9430_s7 + $0x58] sm:$0xf0] }
 0x2fe   : > { %v2899_v27 = vrot.slane %v2872_v34, 6  ;;  %v2907_v41 = vrot.slane %v2876_v33, 6  ;;  %v2948_v18 = vmul.f32 %v2944_v3, %v2936_v12  ;;  %v2952_v21 = vmul.f32 %v2944_v3, %v9092_v7  ;;  %v5141_v32 = vld [vmem:[%s9430_s7 + $0x108] sm:$0xf]  ;;  %v5682_v34 = vld [vmem:[%s9430_s7 + $0x114] sm:$0xf0] }
 0x2ff   : > { %v2828_v2 = vsel %vm808_vm7, %v2820_v53, %v2827_v55  ;;  %v2844_v11 = vadd.f32 %v2820_v53, %v2784_v36  ;;  %v2852_v59 = vadd.f32 %v2827_v55, %v2792_v22  ;;  %v2956_v51 = vmul.f32 %v2944_v3, %v2940_v49  ;;  %v5255_v22 = vld [vmem:[%s9430_s7 + $0x1f8] sm:$0xf0]  ;;  %v5333_v55 = vld [vmem:[%s9430_s7 + $0x288] sm:$0xf] }
 0x300   : > { %v2848_v50 = vadd.f32 %v2828_v2, %v2788_v14  ;;  %v2900_v9 = vsel %vm869_vm8, %v2892_v57, %v2899_v27  ;;  %v2908_v19 = vsel %vm869_vm8, %v2899_v27, %v2907_v41  ;;  %v2973_v16 = vrot.slane %v2948_v18, 7  ;;  %v5031_v2 = vld [vmem:[%s9430_s7 + $0x38] sm:$0xf0] }
 0x301   : > { %v2924_v56 = vadd.f32 %v2892_v57, %v2844_v11  ;;  %v2932_v17 = vadd.f32 %v2908_v19, %v2852_v59  ;;  %v2980_v39 = vrot.slane %v2952_v21, 7  ;;  %v2988_v60 = vrot.slane %v2956_v51, 7  ;;  %v5730_v57 = vld [vmem:[%s9430_s7 + $0x294] sm:$0xf0] }
 0x302   : > { %v2928_v28 = vadd.f32 %v2900_v9, %v2848_v50  ;;  %v3025_v43 = vperm.slane %v2444_v24, 0  ;;  %v3061_v23 = vperm.slane %v2444_v24, 1  ;;  %v3141_v35 = vperm.slane %v2444_v24, 2  ;;  %v5652_v24 = vld [vmem:[%s9430_s7 + $0x2c] sm:$0xf] }
 0x303   : > { %v2981_v5 = vsel %vm2969_vm10, %v2973_v16, %v2980_v39  ;;  %v2989_v52 = vsel %vm2969_vm10, %v2980_v39, %v2988_v60  ;;  %v3005_v44 = vadd.f32 %v2973_v16, %v2924_v56  ;;  %v5350_v14 = vor.u32 %v5734_v25, %v5349_v48  ;;  %v5704_v9 = vld [vmem:[%s9430_s7 + $0x1cc] sm:$0xf]  ;;  %v5726_v39 = vld [vmem:[%s9430_s7 + $0x274] sm:$0xf0]  ;;  %v5509_v48 = vld [vmem:[%s9430_s7 + $0x3e8] sm:$0xf] }
 0x304   : > { %v3009_v29 = vadd.f32 %v2981_v5, %v2928_v28  ;;  %v3013_v37 = vadd.f32 %v2989_v52, %v2932_v17  ;;  %v3029_v20 = vmul.f32 %v3025_v43, %v3017_v0  ;;  %v3033_v38 = vmul.f32 %v3025_v43, %v9092_v7  ;;  %v5317_v17 = vld [vmem:[%s9430_s7 + $0x268] sm:$0xf]  ;;  %v5648_v52 = vld [vmem:[%s9430_s7 + $0xc] sm:$0xf]  ;;  %v5774_v25 = vld [vmem:[%s9430_s7 + $0x3f4] sm:$0xf0] }
 0x305   : > { %v3037_v13 = vmul.f32 %v3025_v43, %v3021_v42  ;;  %v3065_v8 = vmul.f32 %v3061_v23, %v3053_v63  ;;  %v3069_v61 = vmul.f32 %v3061_v23, %v9092_v7  ;;  %v3073_v3 = vmul.f32 %v3061_v23, %v3057_v31  ;;  %4233 = vmatpush.bf16.msra.mxu2 %v5350_v14 }
 0x306   : > { %v3041_v62 = vadd.f32 %v3029_v20, %v3005_v44  ;;  %v3045_v15 = vadd.f32 %v3033_v38, %v3009_v29  ;;  %v3145_v26 = vmul.f32 %v3141_v35, %v3133_v40  ;;  %v3149_v4 = vmul.f32 %v3141_v35, %v9092_v7  ;;  %v5708_v7 = vld [vmem:[%s9430_s7 + $0x1ec] sm:$0xf]  ;;  %v5015_v44 = vld [vmem:[%s9430_s7 + $0x18] sm:$0xf0]  ;;  %v5301_v20 = vld [vmem:[%s9430_s7 + $0x248] sm:$0xf] }
 0x307   : > { %v3049_v33 = vadd.f32 %v3037_v13, %v3013_v37  ;;  %v3095_v12 = vrot.slane %v3065_v8, 1  ;;  %v3096_v30 = vrot.slane %v3069_v61, 1  ;;  %v3104_v1 = vrot.slane %v3073_v3, 1  ;;  %4183 = vmatmul.bf16.vlgmr.msrb.gmra.mxu2 %v9084_v58  ;;  %v5700_v40 = vld [vmem:[%s9430_s7 + $0x1ac] sm:$0xf] }
 0x308   : > { %v3153_v53 = vmul.f32 %v3141_v35, %v3137_v46  ;;  %v3175_v49 = vrot.slane %v3145_v26, 2  ;;  %v3176_v36 = vrot.slane %v3149_v4, 2  ;;  %v3215_v21 = vperm.slane %v9017_v10, 3  ;;  %v5239_v10 = vld [vmem:[%s9430_s7 + $0x1d8] sm:$0xf0] }
 0x309   : > { %v3097_v27 = vsel %vm580_vm3, %v3095_v12, %v3096_v30  ;;  %v3105_v41 = vsel %vm580_vm3, %v3096_v30, %v3104_v1  ;;  %v3129_v18 = vadd.f32 %v3104_v1, %v3049_v33  ;;  %v5050_v19 = vor.u32 %v5656_v47, %v5047_v6  ;;  %v5223_v37 = vld [vmem:[%s9430_s7 + $0x1b8] sm:$0xf0]  ;;  %v5722_v38 = vld [vmem:[%s9430_s7 + $0x254] sm:$0xf0]  ;;  %v5696_v47 = vld [vmem:[%s9430_s7 + $0x18c] sm:$0xf] }
 0x30a   : > { %v3121_v11 = vadd.f32 %v3097_v27, %v3041_v62  ;;  %v3125_v59 = vadd.f32 %v3105_v41, %v3045_v15  ;;  %v3177_v51 = vsel %vm641_vm5, %v3175_v49, %v3176_v36  ;;  %v3184_v50 = vrot.slane %v3153_v53, 2  ;;  %v5207_v6 = vld [vmem:[%s9430_s7 + $0x198] sm:$0xf0]  ;;  %v5718_v33 = vld [vmem:[%s9430_s7 + $0x234] sm:$0xf0] }
 0x30b   : > { %v5142_v16 = vor.u32 %v5682_v34, %v5141_v32  ;;  %v5258_v0 = vor.u32 %v5708_v7, %v5255_v22  ;;  %v5334_v56 = vor.u32 %v5730_v57, %v5333_v55  ;;  %4264 = vmatpush.bf16.msrb.mxu0 %v5050_v19  ;;  %v5034_v42 = vor.u32 %v5652_v24, %v5031_v2  ;;  %v5285_v7 = vld [vmem:[%s9430_s7 + $0x228] sm:$0xf]  ;;  %v5692_v55 = vld [vmem:[%s9430_s7 + $0x16c] sm:$0xf]  ;;  %v5191_v57 = vld [vmem:[%s9430_s7 + $0x178] sm:$0xf0] }
 0x30c   : > { %v3185_v60 = vsel %vm641_vm5, %v3176_v36, %v3184_v50  ;;  %v3201_v63 = vadd.f32 %v3177_v51, %v3121_v11  ;;  %v3209_v31 = vadd.f32 %v3184_v50, %v3129_v18  ;;  %v5242_v43 = vor.u32 %v5704_v9, %v5239_v10  ;;  %v5493_v36 = vld [vmem:[%s9430_s7 + $0x3c8] sm:$0xf]  ;;  %v5770_v27 = vld [vmem:[%s9430_s7 + $0x3d4] sm:$0xf0]  ;;  %v5740_v24 = vld [vmem:[%s9430_s7 + $0x2ec] sm:$0xf] }
 0x30d   : > { %v3205_v28 = vadd.f32 %v3185_v60, %v3125_v59  ;;  %4224 = vmatpush.bf16.msra.mxu1 %v5142_v16  ;;  %4234 = vmatpush.bf16.msra.mxu2 %v5334_v56  ;;  %v5318_v5 = vor.u32 %v5726_v39, %v5317_v17  ;;  %v5018_v61 = vor.u32 %v5648_v52, %v5015_v44  ;;  %v5269_v41 = vld [vmem:[%s9430_s7 + $0x208] sm:$0xf]  ;;  %v5714_v18 = vld [vmem:[%s9430_s7 + $0x214] sm:$0xf0]  ;;  %v5383_v2 = vld [vmem:[%s9430_s7 + $0x2f8] sm:$0xf0] }
 0x30e   : > { %v3223_v23 = vadd.f32 %v3215_v21, %v3201_v63  ;;  %v3231_v35 = vadd.f32 %v3215_v21, %v3209_v31  ;;  %v5226_v62 = vor.u32 %v5700_v40, %v5223_v37  ;;  %v5302_v15 = vor.u32 %v5722_v38, %v5301_v20  ;;  %v5688_v51 = vld [vmem:[%s9430_s7 + $0x14c] sm:$0xf]  ;;  %v5175_v50 = vld [vmem:[%s9430_s7 + $0x158] sm:$0xf0]  ;;  %v5477_v9 = vld [vmem:[%s9430_s7 + $0x3a8] sm:$0xf] }
 0x30f   : > { %v3227_v29 = vadd.f32 %v3215_v21, %v3205_v28  ;;  %4265 = vmatpush.bf16.msrb.mxu0 %v5034_v42  ;;  %v5210_v22 = vor.u32 %v5696_v47, %v5207_v6  ;;  %v5510_v49 = vor.u32 %v5774_v25, %v5509_v48  ;;  %v5286_v14 = vor.u32 %v5718_v33, %v5285_v7  ;;  %v5766_v10 = vld [vmem:[%s9430_s7 + $0x3b4] sm:$0xf0]  ;;  %v5736_v16 = vld [vmem:[%s9430_s7 + $0x2cc] sm:$0xf]  ;;  %v5159_v60 = vld [vmem:[%s9430_s7 + $0x138] sm:$0xf0] }
 0x310   : > { %v3239_v13 = vpack.c.bf16 %v3231_v35, %v3231_v35  ;;  %4225 = vmatmul.bf16.vlgmr.msra.gmra.mxu1 %v8944_v45  ;;  %v5494_v11 = vor.u32 %v5770_v27, %v5493_v36  ;;  %v5270_v59 = vor.u32 %v5714_v18, %v5269_v41  ;;  %v5386_v19 = vor.u32 %v5740_v24, %v5383_v2  ;;  %v5684_v39 = vld [vmem:[%s9430_s7 + $0x12c] sm:$0xf]  ;;  %v5461_v63 = vld [vmem:[%s9430_s7 + $0x388] sm:$0xf]  ;;  %v5762_v31 = vld [vmem:[%s9430_s7 + $0x394] sm:$0xf0] }
 0x311   : > { %4273 = vmatpush.bf16.msrb.mxu1 %v5258_v0  ;;  %v3235_v8 = vpack.c.bf16 %v3227_v29, %v3223_v23  ;;  %4235 = vmatpush.bf16.msra.mxu2 %v5318_v5  ;;  %v5367_v0 = vld [vmem:[%s9430_s7 + $0x2d8] sm:$0xf0]  ;;  %v5178_v56 = vor.u32 %v5688_v51, %v5175_v50  ;;  %v5478_v17 = vor.u32 %v5766_v10, %v5477_v9  ;;  %v5732_v42 = vld [vmem:[%s9430_s7 + $0x2ac] sm:$0xf]  ;;  %v5445_v44 = vld [vmem:[%s9430_s7 + $0x368] sm:$0xf] }
 0x312   : > { %v3439_v3 = vshrl.u32 %v3239_v13, 16  ;;  %v3442_v46 = vshll.u32 %v3239_v13, 16  ;;  %v5370_v28 = vor.u32 %v5736_v16, %v5367_v0  ;;  %v5162_v23 = vor.u32 %v5684_v39, %v5159_v60  ;;  %v5680_v5 = vld [vmem:[%s9430_s7 + $0x10c] sm:$0xf]  ;;  %v5143_v52 = vld [vmem:[%s9430_s7 + $0x118] sm:$0xf0] }
 0x313   : > { %v3431_v26 = vshrl.u32 %v3235_v8, 16  ;;  %v3434_v4 = vshll.u32 %v3235_v8, 16  ;;  %4266 = vmatpush.bf16.msrb.mxu0 %v5018_v61  ;;  %v5462_v35 = vor.u32 %v5762_v31, %v5461_v63  ;;  %v5758_v40 = vld [vmem:[%s9430_s7 + $0x374] sm:$0xf0]  ;;  %v5728_v37 = vld [vmem:[%s9430_s7 + $0x28c] sm:$0xf]  ;;  %v5146_v38 = vor.u32 %v5680_v5, %v5143_v52 }
 0x314   : > { %v3441_v32 = vrot.slane %v3439_v3, 1  ;;  %v3444_v34 = vrot.slane %v3442_v46, 2  ;;  %v5335_v20 = vld [vmem:[%s9430_s7 + $0x298] sm:$0xf0]  ;;  %v5446_v13 = vor.u32 %v5758_v40, %v5445_v44  ;;  %v5429_v8 = vld [vmem:[%s9430_s7 + $0x348] sm:$0xf] }
 0x315   : > { %4274 = vmatpush.bf16.msrb.mxu1 %v5242_v43  ;;  %v3433_v12 = vrot.slane %v3431_v26, 1  ;;  %v3436_v30 = vrot.slane %v3434_v4, 2  ;;  %4236 = vmatpush.bf16.msra.mxu2 %v5302_v15  ;;  %v5351_v43 = vld [vmem:[%s9430_s7 + $0x2b8] sm:$0xf0]  ;;  %v5754_v61 = vld [vmem:[%s9430_s7 + $0x354] sm:$0xf0]  ;;  %v5338_v3 = vor.u32 %v5728_v37, %v5335_v20 }
 0x316   : > { %v3445_v1 = vor.u32 %v3444_v34, %v3441_v32  ;;  %4267 = vmatmul.bf16.vlgmr.msrb.gmra.mxu0 %v8659_v54  ;;  %v5194_v54 = vor.u32 %v5692_v55, %v5191_v57  ;;  %v5354_v29 = vor.u32 %v5732_v42, %v5351_v43  ;;  %v5724_v46 = vld [vmem:[%s9430_s7 + $0x26c] sm:$0xf]  ;;  %v5319_v48 = vld [vmem:[%s9430_s7 + $0x278] sm:$0xf0]  ;;  %v5430_v25 = vor.u32 %v5754_v61, %v5429_v8  ;;  %v5750_v15 = vld [vmem:[%s9430_s7 + $0x334] sm:$0xf0] }
 0x317   : > { %v3437_v53 = vor.u32 %v3436_v30, %v3433_v12  ;;  %v5322_v26 = vor.u32 %v5724_v46, %v5319_v48  ;;  %v5720_v4 = vld [vmem:[%s9430_s7 + $0x24c] sm:$0xf]  ;;  %v5303_v47 = vld [vmem:[%s9430_s7 + $0x258] sm:$0xf0]  ;;  %v5397_v32 = vld [vmem:[%s9430_s7 + $0x308] sm:$0xf] }
 0x318   : > { %v5746_v34 = vld [vmem:[%s9430_s7 + $0x314] sm:$0xf0]  ;;  %v5306_v7 = vor.u32 %v5720_v4, %v5303_v47  ;;  %v5511_v33 = vld [vmem:[%s9430_s7 + $0x3f8] sm:$0xf0]  ;;  %v5716_v12 = vld [vmem:[%s9430_s7 + $0x22c] sm:$0xf] }
 0x319   : > { %4275 = vmatpush.bf16.msrb.mxu1 %v5226_v62  ;;  %v9229_v21 = vsel %vm3378_vm11, %v3437_v53, %v3445_v1  ;;  %4237 = vmatpush.bf16.msra.mxu2 %v5286_v14  ;;  %v5413_v62 = vld [vmem:[%s9430_s7 + $0x328] sm:$0xf]  ;;  %v5287_v30 = vld [vmem:[%s9430_s7 + $0x238] sm:$0xf0]  ;;  %v5398_v1 = vor.u32 %v5746_v34, %v5397_v32  ;;  %v5768_v53 = vld [vmem:[%s9430_s7 + $0x3cc] sm:$0xf] }
 0x31a   : > { %4141 = vmatmul.bf16.vlgmr.msra.gmra.mxu3 %v9229_v21  ;;  %v5414_v6 = vor.u32 %v5750_v15, %v5413_v62  ;;  %v5495_v36 = vld [vmem:[%s9430_s7 + $0x3d8] sm:$0xf0]  ;;  %v5712_v14 = vld [vmem:[%s9430_s7 + $0x20c] sm:$0xf] }
 0x31b   : > { %4245 = vmatpush.bf16.msra.mxu3 %v5510_v49  ;;  %v5290_v49 = vor.u32 %v5716_v12, %v5287_v30  ;;  %v5271_v55 = vld [vmem:[%s9430_s7 + $0x218] sm:$0xf0]  ;;  %v5498_v57 = vor.u32 %v5768_v53, %v5495_v36  ;;  %v5764_v41 = vld [vmem:[%s9430_s7 + $0x3ac] sm:$0xf] }
 0x31c   : > { %v5274_v27 = vor.u32 %v5712_v14, %v5271_v55  ;;  %v5479_v18 = vld [vmem:[%s9430_s7 + $0x3b8] sm:$0xf0]  ;;  %v5760_v2 = vld [vmem:[%s9430_s7 + $0x38c] sm:$0xf] }
 0x31d   : > { %4276 = vmatpush.bf16.msrb.mxu1 %v5210_v22  ;;  %4238 = vmatpush.bf16.msra.mxu2 %v5270_v59  ;;  %v5482_v24 = vor.u32 %v5764_v41, %v5479_v18  ;;  %v5756_v59 = vld [vmem:[%s9430_s7 + $0x36c] sm:$0xf]  ;;  %v5447_v51 = vld [vmem:[%s9430_s7 + $0x378] sm:$0xf0] }
 0x31e   : > { %v5450_v50 = vor.u32 %v5756_v59, %v5447_v51  ;;  %v5752_v9 = vld [vmem:[%s9430_s7 + $0x34c] sm:$0xf]  ;;  %v5415_v16 = vld [vmem:[%s9430_s7 + $0x338] sm:$0xf0] }
 0x31f   : > { %4246 = vmatpush.bf16.msra.mxu3 %v5494_v11 }
 0x320   : > { %4239 = vmatmul.bf16.vlgmr.msra.gmra.mxu2 %v9084_v58 }
 0x321   : > { %4277 = vmatpush.bf16.msrb.mxu1 %v5194_v54  ;;  %4287 = vmatpush.bf16.msrb.mxu2 %v5386_v19  ;;  %v5463_v54 = vld [vmem:[%s9430_s7 + $0x398] sm:$0xf0]  ;;  %v5748_v19 = vld [vmem:[%s9430_s7 + $0x32c] sm:$0xf] }
 0x322   : > { %v5466_v11 = vor.u32 %v5760_v2, %v5463_v54  ;;  %v5418_v0 = vor.u32 %v5748_v19, %v5415_v16 }
 0x323   : > { %4247 = vmatpush.bf16.msra.mxu3 %v5478_v17  ;;  %v5399_v17 = vld [vmem:[%s9430_s7 + $0x318] sm:$0xf0] }
 0x325   : > { %4278 = vmatpush.bf16.msrb.mxu1 %v5178_v56  ;;  %4288 = vmatpush.bf16.msrb.mxu2 %v5370_v28  ;;  %v5744_v56 = vld [vmem:[%s9430_s7 + $0x30c] sm:$0xf]  ;;  %v9391_v28 = vld [vmem:[%s9431_s8] sm:$0xf] }
 0x326   : > { %v5402_v39 = vor.u32 %v5744_v56, %v5399_v17  ;;  %v4100_v60 = vpop.f32.mrf.mxu0  ;;  %v3370_v42 = vperm.slane %v9391_v28, 0 }
 0x327   : > { %4248 = vmatpush.bf16.msra.mxu3 %v5462_v35 }
 0x328   : > { %v4101_v35 = vadd.f32 %v4100_v60, %v3370_v42 }
 0x329   : > { %4279 = vmatpush.bf16.msrb.mxu1 %v5162_v23  ;;  %4289 = vmatpush.bf16.msrb.mxu2 %v5354_v29 }
 0x32a   : > { %4197 = vmatmul.bf16.vlgmr.msrb.gmra.mxu3 %v9229_v21 }
 0x32b   : > { %4249 = vmatpush.bf16.msra.mxu3 %v5446_v13 }
 0x32d   : > { %4280 = vmatpush.bf16.msrb.mxu1 %v5146_v38  ;;  %4290 = vmatpush.bf16.msrb.mxu2 %v5338_v3  ;;  %v3371_v3 = vperm.slane %v9391_v28, 1 }
 0x32e   : > { %v4102_v43 = vpop.f32.mrf.mxu0 }
 0x32f   : > { %4250 = vmatpush.bf16.msra.mxu3 %v5430_v25 }
 0x330   : > { %4281 = vmatmul.bf16.vlgmr.msrb.gmra.mxu1 %v8944_v45  ;;  %v5772_v45 = vld [vmem:[%s9430_s7 + $0x3ec] sm:$0xf] }
 0x331   : > { %4291 = vmatpush.bf16.msrb.mxu2 %v5322_v26  ;;  %v5514_v22 = vor.u32 %v5772_v45, %v5511_v33 }
 0x333   : > { %4251 = vmatpush.bf16.msra.mxu3 %v5414_v6 }
 0x335   : > { %4292 = vmatpush.bf16.msrb.mxu2 %v5306_v7 }
 0x336   : > { %v4156_v37 = vpop.f32.mrf.mxu0 }
 0x337   : > { %4252 = vmatpush.bf16.msra.mxu3 %v5398_v1  ;;  %v4157_v15 = vadd.f32 %v4156_v37, %v3371_v3 }
 0x339   : > { %4293 = vmatpush.bf16.msrb.mxu2 %v5290_v49 }
 0x33a   : > { %4253 = vmatmul.bf16.vlgmr.msra.gmra.mxu3 %v9229_v21 }
 0x33b   : > { %4301 = vmatpush.bf16.msrb.mxu3 %v5514_v22 }
 0x33d   : > { %4294 = vmatpush.bf16.msrb.mxu2 %v5274_v27 }
 0x33e   : > { %v4158_v4 = vpop.f32.mrf.mxu0 }
 0x33f   : > { %4302 = vmatpush.bf16.msrb.mxu3 %v5498_v57  ;;  %v4159_v22 = vadd.f32 %v4158_v4, %v3371_v3  ;;  %v3372_v57 = vperm.slane %v9391_v28, 2 }
 0x340   : > { %4295 = vmatmul.bf16.vlgmr.msrb.gmra.mxu2 %v9084_v58  ;;  %v5431_v58 = vld [vmem:[%s9430_s7 + $0x358] sm:$0xf0] }
 0x341   : > { %v5434_v10 = vor.u32 %v5752_v9, %v5431_v58 }
 0x343   : > { %4303 = vmatpush.bf16.msrb.mxu3 %v5482_v24 }
 0x347   : > { %4304 = vmatpush.bf16.msrb.mxu3 %v5466_v11  ;;  %v4212_v14 = vpop.f32.mrf.mxu0 }
 0x34b   : > { %4305 = vmatpush.bf16.msrb.mxu3 %v5450_v50  ;;  %v4213_v50 = vadd.f32 %v4212_v14, %v3372_v57 }
 0x34d   : > { %v4114_v63 = vpop.f32.mrf.mxu1 }
 0x34e   : > { %v4115_v52 = vadd.f32 %v4114_v63, %v4101_v35 }
 0x34f   : > { %4306 = vmatpush.bf16.msrb.mxu3 %v5434_v10  ;;  %v4214_v63 = vpop.f32.mrf.mxu0 }
 0x353   : > { %4307 = vmatpush.bf16.msrb.mxu3 %v5418_v0 }
 0x355   : > { %v4116_v23 = vpop.f32.mrf.mxu1 }
 0x357   : > { %4308 = vmatpush.bf16.msrb.mxu3 %v5402_v39 }
 0x35a   : > { %4309 = vmatmul.bf16.vlgmr.msrb.gmra.mxu3 %v9229_v21  ;;  %v4103_v21 = vadd.f32 %v4102_v43, %v3370_v42 }
 0x35c   : > { %v4117_v13 = vadd.f32 %v4116_v23, %v4103_v21 }
 0x35d   : > { %v4170_v38 = vpop.f32.mrf.mxu1 }
 0x35e   : > { %v4171_v47 = vadd.f32 %v4170_v38, %v4157_v15 }
 0x365   : > { %v4172_v32 = vpop.f32.mrf.mxu1 }
 0x366   : > { %v4173_v49 = vadd.f32 %v4172_v32, %v4159_v22 }
 0x37a   : > { %v4128_v31 = vpop.f32.mrf.mxu2 }
 0x37b   : > { %v4129_v44 = vadd.f32 %v4128_v31, %v4115_v52 }
 0x382   : > { %v4130_v5 = vpop.f32.mrf.mxu2 }
 0x383   : > { %v4131_v46 = vadd.f32 %v4130_v5, %v4117_v13  ;;  %v4215_v5 = vadd.f32 %v4214_v63, %v3372_v57 }
 0x38a   : > { %v4184_v61 = vpop.f32.mrf.mxu2 }
 0x38b   : > { %v4185_v7 = vadd.f32 %v4184_v61, %v4171_v47 }
 0x38d   : > { %v4226_v24 = vpop.f32.mrf.mxu1 }
 0x38e   : > { %v4227_v19 = vadd.f32 %v4226_v24, %v4213_v50 }
 0x392   : > { %v4186_v12 = vpop.f32.mrf.mxu2 }
 0x393   : > { %v4187_v27 = vadd.f32 %v4186_v12, %v4173_v49  ;;  %v4268_v22 = vpop.f32.mrf.mxu0  ;;  %v3373_v49 = vperm.slane %v9391_v28, 3 }
 0x395   : > { %v4228_v35 = vpop.f32.mrf.mxu1 }
 0x396   : > { %v4229_v37 = vadd.f32 %v4228_v35, %v4215_v5 }
 0x39d   : > { %v4142_v40 = vpop.f32.mrf.mxu3 }
 0x39e   : > { %v4143_v29 = vadd.f32 %v4142_v40, %v4129_v44 }
 0x3a0   : > { %v4315_v20 = vsub.f32 0.0, %v4143_v29 }
 0x3a2   : > { %v4323_v8 = vmin.f32 %v4315_v20, 80.0 }
 0x3a3   : > { %v4240_v51 = vpop.f32.mrf.mxu2 }
 0x3a4   : > { %v4331_v48 = vmul.f32 1.442695, %v4323_v8  ;;  %v4241_v39 = vadd.f32 %v4240_v51, %v4227_v19 }
 0x3a5   : > { %v4144_v25 = vpop.f32.mrf.mxu3 }
 0x3a6   : > { %5889 = vpow2.f32 %v4331_v48  ;;  %v4145_v62 = vadd.f32 %v4144_v25, %v4131_v46 }
 0x3a8   : > { %v4319_v26 = vsub.f32 0.0, %v4145_v62 }
 0x3aa   : > { %v4327_v6 = vmin.f32 %v4319_v26, 80.0 }
 0x3ab   : > { %v4242_v40 = vpop.f32.mrf.mxu2 }
 0x3ac   : > { %v5890_v34 = vpop.eup %5889  ;;  %v4339_v45 = vmul.f32 1.442695, %v4327_v6  ;;  %v4243_v13 = vadd.f32 %v4242_v40, %v4229_v37 }
 0x3ad   : > { %v4347_v33 = vadd.f32 1.0, %v5890_v34  ;;  %v4198_v30 = vpop.f32.mrf.mxu3  ;;  %v4282_v14 = vpop.f32.mrf.mxu1 }
 0x3ae   : > { %5891 = vpow2.f32 %v4339_v45  ;;  %v4199_v1 = vadd.f32 %v4198_v30, %v4185_v7 }
 0x3af   : > { %5893 = vrcp.f32 %v4347_v33 }
 0x3b0   : > { %v4316_v53 = vsub.f32 0.0, %v4199_v1 }
 0x3b2   : > { %v4324_v36 = vmin.f32 %v4316_v53, 80.0 }
 0x3b4   : > { %v5892_v55 = vpop.eup %5891  ;;  %v4333_v41 = vmul.f32 1.442695, %v4324_v36 }
 0x3b5   : > { %v5894_v18 = vpop.eup %5893  ;;  %v4351_v2 = vadd.f32 1.0, %v5892_v55  ;;  %v4200_v54 = vpop.f32.mrf.mxu3 }
 0x3b6   : > { %v4363_v11 = vmul.f32 %v5894_v18, %v4143_v29  ;;  %5895 = vpow2.f32 %v4333_v41  ;;  %v4201_v59 = vadd.f32 %v4200_v54, %v4187_v27  ;;  %v4269_v18 = vadd.f32 %v4268_v22, %v3373_v49 }
 0x3b7   : > { %5897 = vrcp.f32 %v4351_v2 }
 0x3b8   : > { %v4371_v9 = vsub.f32 0.0, %v4363_v11  ;;  %v4320_v58 = vsub.f32 0.0, %v4201_v59  ;;  %v4283_v51 = vadd.f32 %v4282_v14, %v4269_v18 }
 0x3ba   : > { %v4379_v10 = vmin.f32 %v4371_v9, 80.0  ;;  %v4328_v16 = vmin.f32 %v4320_v58, 80.0  ;;  %v4270_v9 = vpop.f32.mrf.mxu0 }
 0x3bc   : > { %v5896_v0 = vpop.eup %5895  ;;  %v4387_v56 = vmul.f32 1.442695, %v4379_v10  ;;  %v4341_v17 = vmul.f32 1.442695, %v4328_v16 }
 0x3bd   : > { %v5898_v60 = vpop.eup %5897  ;;  %v4348_v31 = vadd.f32 1.0, %v5896_v0  ;;  %v4254_v42 = vpop.f32.mrf.mxu3 }
 0x3be   : > { %5899 = vpow2.f32 %v4387_v56  ;;  %v4367_v43 = vmul.f32 %v5898_v60, %v4145_v62  ;;  %v9396_v23 = vadd.f32 %v4254_v42, %v4241_v39  ;;  %v4284_v0 = vpop.f32.mrf.mxu1 }
 0x3bf   : > { %5901 = vrcp.f32 %v4348_v31 }
 0x3c0   : > { %v4375_v52 = vsub.f32 0.0, %v4367_v43  ;;  %5903 = vpow2.f32 %v4341_v17  ;;  %v4317_v44 = vsub.f32 0.0, %v9396_v23  ;;  %v4271_v17 = vadd.f32 %v4270_v9, %v3373_v49 }
 0x3c2   : > { %v4383_v29 = vmin.f32 %v4375_v52, 80.0  ;;  %v4325_v21 = vmin.f32 %v4317_v44, 80.0  ;;  %v4285_v35 = vadd.f32 %v4284_v0, %v4271_v17 }
 0x3c3   : > { %v4296_v27 = vpop.f32.mrf.mxu2 }
 0x3c4   : > { %v5900_v20 = vpop.eup %5899  ;;  %v4395_v38 = vmul.f32 1.442695, %v4383_v29  ;;  %v4335_v8 = vmul.f32 1.442695, %v4325_v21  ;;  %v4297_v50 = vadd.f32 %v4296_v27, %v4283_v51 }
 0x3c5   : > { %v5902_v61 = vpop.eup %5901  ;;  %v4403_v3 = vadd.f32 1.0, %v5900_v20  ;;  %v4256_v46 = vpop.f32.mrf.mxu3 }
 0x3c6   : > { %v5904_v48 = vpop.eup %5903  ;;  %5905 = vpow2.f32 %v4395_v38  ;;  %v4364_v25 = vmul.f32 %v5902_v61, %v4199_v1  ;;  %v9399_v62 = vadd.f32 %v4256_v46, %v4243_v13 }
 0x3c7   : > { %5907 = vrcp.f32 %v4403_v3  ;;  %v4352_v15 = vadd.f32 1.0, %v5904_v48 }
 0x3c8   : > { %v4372_v26 = vsub.f32 0.0, %v4364_v25  ;;  %5909 = vpow2.f32 %v4335_v8  ;;  %v4321_v4 = vsub.f32 0.0, %v9399_v62 }
 0x3c9   : > { %5911 = vrcp.f32 %v4352_v15 }
 0x3ca   : > { %v4380_v47 = vmin.f32 %v4372_v26, 80.0  ;;  %v4329_v6 = vmin.f32 %v4321_v4, 80.0 }
 0x3cb   : > { %v4298_v31 = vpop.f32.mrf.mxu2 }
 0x3cc   : > { %v5906_v32 = vpop.eup %5905  ;;  %v4389_v34 = vmul.f32 1.442695, %v4380_v47  ;;  %v4343_v45 = vmul.f32 1.442695, %v4329_v6  ;;  %v4299_v52 = vadd.f32 %v4298_v31, %v4285_v35 }
 0x3cd   : > { %v5908_v7 = vpop.eup %5907  ;;  %v4407_v33 = vadd.f32 1.0, %v5906_v32 }
 0x3ce   : > { %v5910_v12 = vpop.eup %5909  ;;  %4419 = vst [vmem:[%s9407_s18] sm:$0xff] %v5908_v7  ;;  %5913 = vpow2.f32 %v4389_v34 }
 0x3cf   : > { %v5912_v30 = vpop.eup %5911  ;;  %5915 = vrcp.f32 %v4407_v33  ;;  %v4349_v1 = vadd.f32 1.0, %v5910_v12 }
 0x3d0   : > { %v4368_v53 = vmul.f32 %v5912_v30, %v4201_v59  ;;  %5917 = vpow2.f32 %v4343_v45 }
 0x3d1   : > { %5919 = vrcp.f32 %v4349_v1 }
 0x3d2   : > { %v4376_v36 = vsub.f32 0.0, %v4368_v53 }
 0x3d4   : > { %v5914_v55 = vpop.eup %5913  ;;  %v4384_v57 = vmin.f32 %v4376_v36, 80.0 }
 0x3d5   : > { %v5916_v41 = vpop.eup %5915  ;;  %v4404_v24 = vadd.f32 1.0, %v5914_v55 }
 0x3d6   : > { %v5918_v2 = vpop.eup %5917  ;;  %4423 = vst [vmem:[%s9407_s18 + $0x20] sm:$0xff] %v5916_v41  ;;  %v4397_v54 = vmul.f32 1.442695, %v4384_v57 }
 0x3d7   : > { %v5920_v11 = vpop.eup %5919  ;;  %5921 = vrcp.f32 %v4404_v24  ;;  %v4353_v59 = vadd.f32 1.0, %v5918_v2 }
 0x3d8   : > { %5923 = vpow2.f32 %v4397_v54  ;;  %v4365_v28 = vmul.f32 %v5920_v11, %v9396_v23 }
 0x3d9   : > { %5925 = vrcp.f32 %v4353_v59 }
 0x3da   : > { %v4373_v58 = vsub.f32 0.0, %v4365_v28 }
 0x3dc   : > { %v4381_v16 = vmin.f32 %v4373_v58, 80.0 }
 0x3dd   : > { %v4310_v10 = vpop.f32.mrf.mxu3  ;;  %v5922_v56 = vpop.eup %5921 }
 0x3de   : > { %v4311_v19 = vadd.f32 %v4310_v10, %v4297_v50  ;;  %v5924_v60 = vpop.eup %5923  ;;  %4420 = vst [vmem:[%s9407_s18 + $0x8] sm:$0xff] %v5922_v56  ;;  %v4391_v63 = vmul.f32 1.442695, %v4381_v16 }
 0x3df   : > { %v5926_v42 = vpop.eup %5925  ;;  %v4408_v43 = vadd.f32 1.0, %v5924_v60 }
 0x3e0   : > { %v4318_v39 = vsub.f32 0.0, %v4311_v19  ;;  %5927 = vpow2.f32 %v4391_v63  ;;  %v4369_v23 = vmul.f32 %v5926_v42, %v9399_v62 }
 0x3e1   : > { %5929 = vrcp.f32 %v4408_v43 }
 0x3e2   : > { %v4326_v5 = vmin.f32 %v4318_v39, 80.0  ;;  %v4377_v40 = vsub.f32 0.0, %v4369_v23 }
 0x3e4   : > { %v4337_v44 = vmul.f32 1.442695, %v4326_v5  ;;  %v4385_v21 = vmin.f32 %v4377_v40, 80.0 }
 0x3e5   : > { %v4312_v29 = vpop.f32.mrf.mxu3 }
 0x3e6   : > { %5931 = vpow2.f32 %v4337_v44  ;;  %v4313_v37 = vadd.f32 %v4312_v29, %v4299_v52  ;;  %v5928_v38 = vpop.eup %5927  ;;  %v4399_v13 = vmul.f32 1.442695, %v4385_v21 }
 0x3e7   : > { %v5930_v8 = vpop.eup %5929  ;;  %v4405_v61 = vadd.f32 1.0, %v5928_v38 }
 0x3e8   : > { %v4322_v20 = vsub.f32 0.0, %v4313_v37  ;;  %4424 = vst [vmem:[%s9407_s18 + $0x28] sm:$0xff] %v5930_v8  ;;  %5933 = vpow2.f32 %v4399_v13 }
 0x3e9   : > { %5935 = vrcp.f32 %v4405_v61 }
 0x3ea   : > { %v4330_v3 = vmin.f32 %v4322_v20, 80.0 }
 0x3ec   : > { %v5932_v46 = vpop.eup %5931  ;;  %v4345_v48 = vmul.f32 1.442695, %v4330_v3 }
 0x3ed   : > { %v4350_v25 = vadd.f32 1.0, %v5932_v46 }
 0x3ee   : > { %5937 = vpow2.f32 %v4345_v48  ;;  %v5934_v62 = vpop.eup %5933 }
 0x3ef   : > { %5939 = vrcp.f32 %v4350_v25  ;;  %v5936_v15 = vpop.eup %5935  ;;  %v4409_v26 = vadd.f32 1.0, %v5934_v62 }
 0x3f0   : > { %4421 = vst [vmem:[%s9407_s18 + $0x10] sm:$0xff] %v5936_v15 }
 0x3f1   : > { %5941 = vrcp.f32 %v4409_v26 }
 0x3f4   : > { %v5938_v4 = vpop.eup %5937 }
 0x3f5   : > { %v5940_v47 = vpop.eup %5939  ;;  %v4354_v6 = vadd.f32 1.0, %v5938_v4 }
 0x3f6   : > { %v4366_v32 = vmul.f32 %v5940_v47, %v4311_v19 }
 0x3f7   : > { %5943 = vrcp.f32 %v4354_v6  ;;  %v5942_v45 = vpop.eup %5941 }
 0x3f8   : > { %v4374_v34 = vsub.f32 0.0, %v4366_v32  ;;  %4425 = vst [vmem:[%s9407_s18 + $0x30] sm:$0xff] %v5942_v45 }
 0x3fa   : > { %v4382_v7 = vmin.f32 %v4374_v34, 80.0 }
 0x3fc   : > { %v4393_v33 = vmul.f32 1.442695, %v4382_v7 }
 0x3fd   : > { %v5944_v12 = vpop.eup %5943 }
 0x3fe   : > { %5945 = vpow2.f32 %v4393_v33  ;;  %v4370_v30 = vmul.f32 %v5944_v12, %v4313_v37 }
 0x400   : > { %v4378_v1 = vsub.f32 0.0, %v4370_v30 }
 0x402   : > { %v4386_v22 = vmin.f32 %v4378_v1, 80.0 }
 0x404   : > { %v5946_v53 = vpop.eup %5945  ;;  %v4401_v49 = vmul.f32 1.442695, %v4386_v22 }
 0x405   : > { %v4406_v36 = vadd.f32 1.0, %v5946_v53 }
 0x406   : > { %5947 = vpow2.f32 %v4401_v49 }
 0x407   : > { %5949 = vrcp.f32 %v4406_v36 }
 0x40c   : > { %v5948_v14 = vpop.eup %5947 }
 0x40d   : > { %v5950_v55 = vpop.eup %5949  ;;  %v4410_v57 = vadd.f32 1.0, %v5948_v14 }
 0x40e   : > { %4422 = vst [vmem:[%s9407_s18 + $0x18] sm:$0xff] %v5950_v55 }
 0x40f   : > { %5951 = vrcp.f32 %v4410_v57 }
 0x415   : > { %v5952_v27 = vpop.eup %5951 }
 0x416   : > { %4426 = vst [vmem:[%s9407_s18 + $0x38] sm:$0xff] %v5952_v27 }
 0x417 PF: > { %s19_s30 = sadd.s32 1, %s5962_s30  }
 0x418   : > { %p16_p4 = scmp.ge.s32.totalorder %s19_s30, 4  }
 0x41a   :  { %18 = sbr.rel (!%p16_p4) target bundleno = 1 (0x1), region = 86 }

</bundles_post_ra>
